<compile_context>
chip_gen: v7x
topology: tpu7x:2x2x1
jax: 0.10.0
libtpu: 0.0.40
codegen_flags: <defaults>
</compile_context>

<pallas_src>
import jax
import jax.numpy as jnp
import numpy as np
from jax import lax
from jax.experimental import pallas as pl
from jax.experimental.pallas import tpu as pltpu

K = 5            # conv kernel size (both layers)
PAD = 2          # conv padding (both layers)
CPAD = 128       # lane-dense channel padding for kernel outputs
TM_MAX = 512     # rows of pooled output per grid step (multiple of 16)
VMEM_LIMIT = 32 * 1024 * 1024


def _round_up(x, m):
    return ((x + m - 1) // m) * m


# ----------------------------- Pallas kernels -----------------------------

def conv_relu_pool_kernel(p_ref, w_ref, b_ref, o_ref):
    """Fused conv (im2col matmul) + 2x2 max-pool + bias + ReLU for one M-tile.

    p_ref: (4, TM, R)  bf16 patches; leading axis = 4 positions of the 2x2
                       pool window, R = K*K*Cin
    w_ref: (R, 128)    bf16 conv weights, Cout zero-padded to 128 lanes
    b_ref: (1, 128)    f32 bias (zero-padded)
    o_ref: (TM, 128)   bf16 pooled output (lane-dense store)
    """
    q, tm, r = p_ref.shape
    # Single MXU pass for all 4 pool positions (one RHS push instead of 4).
    y = jnp.dot(p_ref[...].reshape(q * tm, r), w_ref[...],
                preferred_element_type=jnp.float32)            # (4*tm, 128) f32
    # 2x2 max-pool = max over the 4 row groups (pure VPU work on dense vregs).
    m = jnp.maximum(jnp.maximum(y[0 * tm:1 * tm], y[1 * tm:2 * tm]),
                    jnp.maximum(y[2 * tm:3 * tm], y[3 * tm:4 * tm]))
    # Bias + ReLU once, after the max (exact: bias shared across the window).
    o_ref[...] = jnp.maximum(m + b_ref[...], 0.0).astype(o_ref.dtype)


def linear_kernel(x_ref, w_ref, b_ref, o_ref):
    """Final FC layer for one batch tile: (TB, F) @ (F, 128) + b."""
    o_ref[...] = (
        jnp.dot(x_ref[...], w_ref[...], preferred_element_type=jnp.float32)
        + b_ref[...]
    )


# ------------------------------- JAX glue ---------------------------------

def _im2col_pool_patches(x_nhwc, pad, k):
    """Build (4, N*Hh*Wh, k*k*Cin) patches for fused conv+pool (XLA glue).

    patches[q, n*Hh*Wh + i*Wh + j, (ki*k+kj)*Cin + ci]
        = x_pad[n, 2i+di+ki, 2j+dj+kj, ci]   with q = 2*di + dj
    """
    N, H, W, Cin = x_nhwc.shape
    Hh, Wh = H // 2, W // 2
    xp = jnp.pad(x_nhwc, ((0, 0), (pad, pad), (pad, pad), (0, 0)))
    groups = []
    for di in range(2):
        for dj in range(2):
            taps = []
            for ki in range(k):
                for kj in range(k):
                    taps.append(
                        xp[:, di + ki: di + ki + 2 * Hh: 2,
                              dj + kj: dj + kj + 2 * Wh: 2, :]
                    )
            g = jnp.stack(taps, axis=3)                 # (N, Hh, Wh, k*k, Cin)
            groups.append(g.reshape(N * Hh * Wh, k * k * Cin))
    return jnp.stack(groups, axis=0)                    # (4, M, R)


def conv_relu_pool(x_nhwc, w_p, b_p, cout):
    """conv(5x5, pad 2) + ReLU + maxpool(2) via an M-tiled Pallas kernel.

    w_p: (K*K*Cin, 128) bf16 (pre-padded), b_p: (1, 128) f32 (pre-padded).
    Returns bf16 (N, H/2, W/2, cout).
    """
    N, H, W, Cin = x_nhwc.shape
    Hh, Wh = H // 2, W // 2
    M = N * Hh * Wh
    R = K * K * Cin

    patches = _im2col_pool_patches(x_nhwc.astype(jnp.bfloat16), PAD, K)  # (4,M,R)

    tm = min(TM_MAX, _round_up(M, 16))       # multiple of 16 (bf16 sublane tile)
    Mp = _round_up(M, tm)
    if Mp != M:
        patches = jnp.pad(patches, ((0, 0), (0, Mp - M), (0, 0)))

    out = pl.pallas_call(
        conv_relu_pool_kernel,
        out_shape=jax.ShapeDtypeStruct((Mp, CPAD), jnp.bfloat16),
        grid=(Mp // tm,),
        in_specs=[
            pl.BlockSpec((4, tm, R), lambda i: (0, i, 0)),   # streamed patches
            pl.BlockSpec((R, CPAD), lambda i: (0, 0)),       # resident weights
            pl.BlockSpec((1, CPAD), lambda i: (0, 0)),       # resident bias
        ],
        out_specs=pl.BlockSpec((tm, CPAD), lambda i: (i, 0)),
        compiler_params=pltpu.CompilerParams(
            dimension_semantics=("parallel",),               # 2 TCs on v7x
            vmem_limit_bytes=VMEM_LIMIT),
    )(patches, w_p, b_p)

    return out[:M, :cout].reshape(N, Hh, Wh, cout)


def linear(x, w_p, b_p, out_dim):
    """x: (N, F) bf16, w_p: (F, 128) bf16 pre-permuted/padded, b_p: (1, 128)."""
    N, F = x.shape
    tb = min(256, _round_up(N, 16))
    Np = _round_up(N, tb)
    xb = x.astype(jnp.bfloat16)
    if Np != N:
        xb = jnp.pad(xb, ((0, Np - N), (0, 0)))

    y = pl.pallas_call(
        linear_kernel,
        out_shape=jax.ShapeDtypeStruct((Np, CPAD), jnp.float32),
        grid=(Np // tb,),
        in_specs=[
            pl.BlockSpec((tb, F), lambda i: (i, 0)),
            pl.BlockSpec((F, CPAD), lambda i: (0, 0)),
            pl.BlockSpec((1, CPAD), lambda i: (0, 0)),
        ],
        out_specs=pl.BlockSpec((tb, CPAD), lambda i: (i, 0)),
        compiler_params=pltpu.CompilerParams(
            dimension_semantics=("parallel",),
            vmem_limit_bytes=VMEM_LIMIT),
    )(xb, w_p, b_p)

    return y[:N, :out_dim]


def prepare_params(params):
    """One-time (offline) weight layout / dtype preparation.

    - conv weights -> (K*K*Cin, 128) bf16, Cout zero-padded to 128 lanes
    - conv biases  -> (1, 128) f32, zero-padded
    - linear weight rows permuted from NCHW-flatten order (PyTorch) to
      NHWC-flatten order so no runtime activation transpose is needed,
      pre-transposed to (1568, 128) bf16, zero-padded columns
    """
    w1, b1, w2, b2, wl, bl = params

    def conv_w(w):
        cout, cin = w.shape[0], w.shape[1]
        w2d = jnp.transpose(w, (2, 3, 1, 0)).reshape(K * K * cin, cout)
        return jnp.pad(w2d, ((0, 0), (0, CPAD - cout))).astype(jnp.bfloat16)

    def conv_b(b):
        return jnp.pad(b, (0, CPAD - b.shape[0])).reshape(1, CPAD).astype(jnp.float32)

    out_dim, feat = wl.shape                          # (10, 32*7*7), NCHW order
    wl_nhwc = jnp.transpose(wl.reshape(out_dim, 32, 7, 7),
                            (2, 3, 1, 0)).reshape(feat, out_dim)   # (h,w,c) order
    wl_p = jnp.pad(wl_nhwc, ((0, 0), (0, CPAD - out_dim))).astype(jnp.bfloat16)
    bl_p = jnp.pad(bl, (0, CPAD - out_dim)).reshape(1, CPAD).astype(jnp.float32)

    return (conv_w(w1), conv_b(b1), conv_w(w2), conv_b(b2), wl_p, bl_p)


def convolutional_net_forward(x_nchw, prep):
    """Forward pass of ConvolutionalNet.  x_nchw: (N, 1, 28, 28) float32."""
    w1, b1, w2, b2, wl, bl = prep
    N = x_nchw.shape[0]
    x = jnp.transpose(x_nchw, (0, 2, 3, 1))          # NCHW -> NHWC (Cin=1: free)
    y = conv_relu_pool(x, w1, b1, cout=16)           # (N, 14, 14, 16) bf16
    y = conv_relu_pool(y, w2, b2, cout=32)           # (N, 7, 7, 32)  bf16
    flat = y.reshape(N, 7 * 7 * 32)                  # NHWC flatten (weight is permuted)
    return linear(flat, wl, bl, out_dim=10)          # (N, 10) f32


# --------------------------- pure-JAX reference ----------------------------

def ref_forward(x, params):
    w1, b1, w2, b2, wl, bl = params

    def block(x, w, b):
        y = lax.conv_general_dilated(
            x, w, (1, 1), [(2, 2), (2, 2)],
            dimension_numbers=("NCHW", "OIHW", "NCHW"))
        y = jnp.maximum(y + b[None, :, None, None], 0.0)
        return lax.reduce_window(y, -jnp.inf, lax.max,
                                 (1, 1, 2, 2), (1, 1, 2, 2), "VALID")

    y = block(x, w1, b1)
    y = block(y, w2, b2)
    flat = y.reshape(x.shape[0], -1)                 # NCHW flatten (PyTorch)
    return flat @ wl.T + bl


# --------------------------------- main ------------------------------------

if __name__ == "__main__":
    key = jax.random.PRNGKey(0)
    ks = jax.random.split(key, 7)

    # Deterministic synthetic parameters (shapes from the module __init__).
    w1 = jax.random.normal(ks[1], (16, 1, 5, 5), jnp.float32) * 0.2
    b1 = jax.random.normal(ks[2], (16,), jnp.float32) * 0.1
    w2 = jax.random.normal(ks[3], (32, 16, 5, 5), jnp.float32) * 0.05
    b2 = jax.random.normal(ks[4], (32,), jnp.float32) * 0.1
    wl = jax.random.normal(ks[5], (10, 32 * 7 * 7), jnp.float32) * 0.02
    bl = jax.random.normal(ks[6], (10,), jnp.float32) * 0.1
    params = (w1, b1, w2, b2, wl, bl)
    prep = prepare_params(params)                    # offline weight prep

    # Input must be 28x28 so the flattened conv output is 32*7*7 = 1568.
    # batch=4 exercises the multi-block (grid > 1) path of conv1.
    x = jax.random.normal(ks[0], (4, 1, 28, 28), jnp.float32)

    fwd = jax.jit(convolutional_net_forward)
    out = jax.block_until_ready(fwd(x, prep))
    assert out.shape == (4, 10)

    ref = ref_forward(x, params)
    # bf16 matmul operands with f32 accumulation -> looser tolerance than f32.
    np.testing.assert_allclose(np.asarray(out), np.asarray(ref),
                               rtol=3e-2, atol=3e-2)
    print("KERNEL_OK")
</pallas_src>

<mosaic_0001>
module attributes {stable_mosaic.version = 11 : i64} {
  func.func @conv_relu_pool_kernel(%arg0: i32, %arg1: memref<4x512x25xbf16, #tpu.memory_space<vmem>>, %arg2: memref<25x128xbf16, #tpu.memory_space<vmem>>, %arg3: memref<1x128xf32, #tpu.memory_space<vmem>>, %arg4: memref<512x128xbf16, #tpu.memory_space<vmem>>) attributes {dimension_semantics = [#tpu.dimension_semantics<parallel>], iteration_bounds = array<i64: 2>, scalar_prefetch = 0 : i64, scratch_operands = 0 : i64, tpu.core_type = #tpu.core_type<tc>, window_params = [{transform_indices = @transform_0, window_bounds = array<i64: 4, 512, 25>}, {pipeline_mode = #tpu.pipeline_mode<synchronous>, transform_indices = @transform_1, window_bounds = array<i64: 25, 128>}, {pipeline_mode = #tpu.pipeline_mode<synchronous>, transform_indices = @transform_2, window_bounds = array<i64: 1, 128>}, {transform_indices = @transform_3, window_bounds = array<i64: 512, 128>}]} {
    %c0 = arith.constant 0 : index
    %c0_0 = arith.constant 0 : index
    %c0_1 = arith.constant 0 : index
    %0 = vector.load %arg1[%c0, %c0_0, %c0_1] : memref<4x512x25xbf16, #tpu.memory_space<vmem>>, vector<4x512x25xbf16>
    %1 = vector.shape_cast %0 : vector<4x512x25xbf16> to vector<2048x25xbf16>
    %c0_2 = arith.constant 0 : index
    %c0_3 = arith.constant 0 : index
    %2 = vector.load %arg2[%c0_2, %c0_3] : memref<25x128xbf16, #tpu.memory_space<vmem>>, vector<25x128xbf16>
    %cst = arith.constant dense<0.000000e+00> : vector<2048x128xf32>
    %3 = tpu.matmul %1, %2, %cst {dimension_numbers = #tpu.dot_dimension_numbers<[1], [0], [0], [1], [0, 0, 1, 1], [], []>} : vector<2048x25xbf16>, vector<25x128xbf16>, vector<2048x128xf32> -> vector<2048x128xf32>
    %4 = vector.extract_strided_slice %3 {offsets = [0, 0], sizes = [512, 128], strides = [1, 1]} : vector<2048x128xf32> to vector<512x128xf32>
    %5 = vector.extract_strided_slice %3 {offsets = [512, 0], sizes = [512, 128], strides = [1, 1]} : vector<2048x128xf32> to vector<512x128xf32>
    %6 = arith.maximumf %4, %5 : vector<512x128xf32>
    %7 = vector.extract_strided_slice %3 {offsets = [1024, 0], sizes = [512, 128], strides = [1, 1]} : vector<2048x128xf32> to vector<512x128xf32>
    %8 = vector.extract_strided_slice %3 {offsets = [1536, 0], sizes = [512, 128], strides = [1, 1]} : vector<2048x128xf32> to vector<512x128xf32>
    %9 = arith.maximumf %7, %8 : vector<512x128xf32>
    %10 = arith.maximumf %6, %9 : vector<512x128xf32>
    %c0_4 = arith.constant 0 : index
    %c0_5 = arith.constant 0 : index
    %11 = vector.load %arg3[%c0_4, %c0_5] : memref<1x128xf32, #tpu.memory_space<vmem>>, vector<1x128xf32>
    %12 = vector.broadcast %11 : vector<1x128xf32> to vector<512x128xf32>
    %13 = arith.addf %10, %12 : vector<512x128xf32>
    %cst_6 = arith.constant 0.000000e+00 : f32
    %14 = vector.broadcast %cst_6 : f32 to vector<512x128xf32>
    %15 = arith.maximumf %13, %14 : vector<512x128xf32>
    %16 = arith.truncf %15 : vector<512x128xf32> to vector<512x128xbf16>
    %c0_7 = arith.constant 0 : index
    %c0_8 = arith.constant 0 : index
    %17 = vector.load %arg4[%c0_7, %c0_8] : memref<512x128xbf16, #tpu.memory_space<vmem>>, vector<512x128xbf16>
    tpu.vector_store %arg4[%c0_7, %c0_8], %16 {strides = array<i32>} : memref<512x128xbf16, #tpu.memory_space<vmem>>, vector<512x128xbf16>,
    return
  }
  func.func @transform_0(%arg0: i32) -> (i32, i32, i32) {
    %c0_i32 = arith.constant 0 : i32
    %c0_i32_0 = arith.constant 0 : i32
    %c0_i32_1 = arith.constant 0 : i32
    return %c0_i32, %arg0, %c0_i32_0 : i32, i32, i32
  }
  func.func @transform_1(%arg0: i32) -> (i32, i32) {
    %c0_i32 = arith.constant 0 : i32
    %c0_i32_0 = arith.constant 0 : i32
    %c0_i32_1 = arith.constant 0 : i32
    return %c0_i32, %c0_i32_0 : i32, i32
  }
  func.func @transform_2(%arg0: i32) -> (i32, i32) {
    %c0_i32 = arith.constant 0 : i32
    %c0_i32_0 = arith.constant 0 : i32
    %c0_i32_1 = arith.constant 0 : i32
    return %c0_i32, %c0_i32_0 : i32, i32
  }
  func.func @transform_3(%arg0: i32) -> (i32, i32) {
    %c0_i32 = arith.constant 0 : i32
    %c0_i32_0 = arith.constant 0 : i32
    return %arg0, %c0_i32 : i32, i32
  }
}

module attributes {stable_mosaic.version = 11 : i64} {
  func.func @conv_relu_pool_kernel(%arg0: i32, %arg1: memref<4x208x400xbf16, #tpu.memory_space<vmem>>, %arg2: memref<400x128xbf16, #tpu.memory_space<vmem>>, %arg3: memref<1x128xf32, #tpu.memory_space<vmem>>, %arg4: memref<208x128xbf16, #tpu.memory_space<vmem>>) attributes {dimension_semantics = [#tpu.dimension_semantics<parallel>], iteration_bounds = array<i64: 1>, scalar_prefetch = 0 : i64, scratch_operands = 0 : i64, tpu.core_type = #tpu.core_type<tc>, window_params = [{transform_indices = @transform_0, window_bounds = array<i64: 4, 208, 400>}, {pipeline_mode = #tpu.pipeline_mode<synchronous>, transform_indices = @transform_1, window_bounds = array<i64: 400, 128>}, {pipeline_mode = #tpu.pipeline_mode<synchronous>, transform_indices = @transform_2, window_bounds = array<i64: 1, 128>}, {transform_indices = @transform_3, window_bounds = array<i64: 208, 128>}]} {
    %c0 = arith.constant 0 : index
    %c0_0 = arith.constant 0 : index
    %c0_1 = arith.constant 0 : index
    %0 = vector.load %arg1[%c0, %c0_0, %c0_1] : memref<4x208x400xbf16, #tpu.memory_space<vmem>>, vector<4x208x400xbf16>
    %1 = vector.shape_cast %0 : vector<4x208x400xbf16> to vector<832x400xbf16>
    %c0_2 = arith.constant 0 : index
    %c0_3 = arith.constant 0 : index
    %2 = vector.load %arg2[%c0_2, %c0_3] : memref<400x128xbf16, #tpu.memory_space<vmem>>, vector<400x128xbf16>
    %cst = arith.constant dense<0.000000e+00> : vector<832x128xf32>
    %3 = tpu.matmul %1, %2, %cst {dimension_numbers = #tpu.dot_dimension_numbers<[1], [0], [0], [1], [0, 0, 1, 1], [], []>} : vector<832x400xbf16>, vector<400x128xbf16>, vector<832x128xf32> -> vector<832x128xf32>
    %4 = vector.extract_strided_slice %3 {offsets = [0, 0], sizes = [208, 128], strides = [1, 1]} : vector<832x128xf32> to vector<208x128xf32>
    %5 = vector.extract_strided_slice %3 {offsets = [208, 0], sizes = [208, 128], strides = [1, 1]} : vector<832x128xf32> to vector<208x128xf32>
    %6 = arith.maximumf %4, %5 : vector<208x128xf32>
    %7 = vector.extract_strided_slice %3 {offsets = [416, 0], sizes = [208, 128], strides = [1, 1]} : vector<832x128xf32> to vector<208x128xf32>
    %8 = vector.extract_strided_slice %3 {offsets = [624, 0], sizes = [208, 128], strides = [1, 1]} : vector<832x128xf32> to vector<208x128xf32>
    %9 = arith.maximumf %7, %8 : vector<208x128xf32>
    %10 = arith.maximumf %6, %9 : vector<208x128xf32>
    %c0_4 = arith.constant 0 : index
    %c0_5 = arith.constant 0 : index
    %11 = vector.load %arg3[%c0_4, %c0_5] : memref<1x128xf32, #tpu.memory_space<vmem>>, vector<1x128xf32>
    %12 = vector.broadcast %11 : vector<1x128xf32> to vector<208x128xf32>
    %13 = arith.addf %10, %12 : vector<208x128xf32>
    %cst_6 = arith.constant 0.000000e+00 : f32
    %14 = vector.broadcast %cst_6 : f32 to vector<208x128xf32>
    %15 = arith.maximumf %13, %14 : vector<208x128xf32>
    %16 = arith.truncf %15 : vector<208x128xf32> to vector<208x128xbf16>
    %c0_7 = arith.constant 0 : index
    %c0_8 = arith.constant 0 : index
    %17 = vector.load %arg4[%c0_7, %c0_8] : memref<208x128xbf16, #tpu.memory_space<vmem>>, vector<208x128xbf16>
    tpu.vector_store %arg4[%c0_7, %c0_8], %16 {strides = array<i32>} : memref<208x128xbf16, #tpu.memory_space<vmem>>, vector<208x128xbf16>,
    return
  }
  func.func @transform_0(%arg0: i32) -> (i32, i32, i32) {
    %c0_i32 = arith.constant 0 : i32
    %c0_i32_0 = arith.constant 0 : i32
    %c0_i32_1 = arith.constant 0 : i32
    return %c0_i32, %arg0, %c0_i32_0 : i32, i32, i32
  }
  func.func @transform_1(%arg0: i32) -> (i32, i32) {
    %c0_i32 = arith.constant 0 : i32
    %c0_i32_0 = arith.constant 0 : i32
    %c0_i32_1 = arith.constant 0 : i32
    return %c0_i32, %c0_i32_0 : i32, i32
  }
  func.func @transform_2(%arg0: i32) -> (i32, i32) {
    %c0_i32 = arith.constant 0 : i32
    %c0_i32_0 = arith.constant 0 : i32
    %c0_i32_1 = arith.constant 0 : i32
    return %c0_i32, %c0_i32_0 : i32, i32
  }
  func.func @transform_3(%arg0: i32) -> (i32, i32) {
    %c0_i32 = arith.constant 0 : i32
    %c0_i32_0 = arith.constant 0 : i32
    return %arg0, %c0_i32 : i32, i32
  }
}

module attributes {stable_mosaic.version = 11 : i64} {
  func.func @linear_kernel(%arg0: i32, %arg1: memref<16x1568xbf16, #tpu.memory_space<vmem>>, %arg2: memref<1568x128xbf16, #tpu.memory_space<vmem>>, %arg3: memref<1x128xf32, #tpu.memory_space<vmem>>, %arg4: memref<16x128xf32, #tpu.memory_space<vmem>>) attributes {dimension_semantics = [#tpu.dimension_semantics<parallel>], iteration_bounds = array<i64: 1>, scalar_prefetch = 0 : i64, scratch_operands = 0 : i64, tpu.core_type = #tpu.core_type<tc>, window_params = [{transform_indices = @transform_0, window_bounds = array<i64: 16, 1568>}, {pipeline_mode = #tpu.pipeline_mode<synchronous>, transform_indices = @transform_1, window_bounds = array<i64: 1568, 128>}, {pipeline_mode = #tpu.pipeline_mode<synchronous>, transform_indices = @transform_2, window_bounds = array<i64: 1, 128>}, {transform_indices = @transform_3, window_bounds = array<i64: 16, 128>}]} {
    %c0 = arith.constant 0 : index
    %c0_0 = arith.constant 0 : index
    %0 = vector.load %arg1[%c0, %c0_0] : memref<16x1568xbf16, #tpu.memory_space<vmem>>, vector<16x1568xbf16>
    %c0_1 = arith.constant 0 : index
    %c0_2 = arith.constant 0 : index
    %1 = vector.load %arg2[%c0_1, %c0_2] : memref<1568x128xbf16, #tpu.memory_space<vmem>>, vector<1568x128xbf16>
    %cst = arith.constant dense<0.000000e+00> : vector<16x128xf32>
    %2 = tpu.matmul %0, %1, %cst {dimension_numbers = #tpu.dot_dimension_numbers<[1], [0], [0], [1], [0, 0, 1, 1], [], []>} : vector<16x1568xbf16>, vector<1568x128xbf16>, vector<16x128xf32> -> vector<16x128xf32>
    %c0_3 = arith.constant 0 : index
    %c0_4 = arith.constant 0 : index
    %3 = vector.load %arg3[%c0_3, %c0_4] : memref<1x128xf32, #tpu.memory_space<vmem>>, vector<1x128xf32>
    %4 = vector.broadcast %3 : vector<1x128xf32> to vector<16x128xf32>
    %5 = arith.addf %2, %4 : vector<16x128xf32>
    %c0_5 = arith.constant 0 : index
    %c0_6 = arith.constant 0 : index
    %6 = vector.load %arg4[%c0_5, %c0_6] : memref<16x128xf32, #tpu.memory_space<vmem>>, vector<16x128xf32>
    tpu.vector_store %arg4[%c0_5, %c0_6], %5 {strides = array<i32>} : memref<16x128xf32, #tpu.memory_space<vmem>>, vector<16x128xf32>,
    return
  }
  func.func @transform_0(%arg0: i32) -> (i32, i32) {
    %c0_i32 = arith.constant 0 : i32
    %c0_i32_0 = arith.constant 0 : i32
    return %arg0, %c0_i32 : i32, i32
  }
  func.func @transform_1(%arg0: i32) -> (i32, i32) {
    %c0_i32 = arith.constant 0 : i32
    %c0_i32_0 = arith.constant 0 : i32
    %c0_i32_1 = arith.constant 0 : i32
    return %c0_i32, %c0_i32_0 : i32, i32
  }
  func.func @transform_2(%arg0: i32) -> (i32, i32) {
    %c0_i32 = arith.constant 0 : i32
    %c0_i32_0 = arith.constant 0 : i32
    %c0_i32_1 = arith.constant 0 : i32
    return %c0_i32, %c0_i32_0 : i32, i32
  }
  func.func @transform_3(%arg0: i32) -> (i32, i32) {
    %c0_i32 = arith.constant 0 : i32
    %c0_i32_0 = arith.constant 0 : i32
    return %arg0, %c0_i32 : i32, i32
  }
}

</mosaic_0001>

<bundles_post_ra>
// kernel: convolutional_net_forward.3
= control target key start
LH: loop header
LB: loop body
LE: loop exit
PB: predicated region body
PF: predicated region fallthrough
CT: control target
= control target key end

     0   :  { %s5491_s12 = smov 0   ;;  %s5493_s13 = smov 0   ;;  %s6555_s0 = inlined_call_operand.vmem [shape: bf16[4,1024,25], index: 0, kind: input, shape index: {}]   ;;  %s6556_s1 = inlined_call_operand.vmem [shape: bf16[25,128], index: 1, kind: input, shape index: {}]   ;;  %s6557_s2 = inlined_call_operand.vmem [shape: f32[1,128], index: 2, kind: input, shape index: {}]   ;;  %s6558_s3 = inlined_call_operand.vmem [shape: bf16[1024,128], index: 3, kind: output, shape index: {}]  }
   0x1   :  { %s5495_s14 = smov 0  }
   0x2 LB: > { %s4305_s15 = sadd.s32 4294967295, %s5468_s14   ;;  %s5508_s16 = sadd.s32 1, %s5468_s14   ;;  %s5468_s14 = sphi %s5495_s14, %s6719_s14   ;;  %s5464_s13 = sphi %s5493_s13, %s6718_s13   ;;  %s5460_s12 = sphi %s5491_s12, %s6717_s12  }
   0x3   : > { %s17_s17 = ssub.s32 %s5468_s14, %s5508_s16  ;;  %s20_s18 = sadd.s32 1, %s5464_s13 }
   0x4   : > { %p18_p0 = scmp.eq.s32.totalorder %s17_s17, 0  ;;  %p27_p1 = scmp.ne.s32.totalorder %s5464_s13, %s5460_s12 }
   0x5   : > { %p28_p2 = scmp.eq.s32.totalorder %s5468_s14, 0  ;;  %p4308_p4 = scmp.ge.s32.totalorder %s5468_s14, 2 }
   0x6   : > { %s5517_s19 = scalar_select %p18_p0, %s5464_s13, %s20_s18  }
   0x7   : > { %p29_p3 = por %p28_p2, %p27_p1  ;;  %127 = sbr.rel (%p4308_p4) target bundleno = 82 (0x52), region = 24 }
   0xe   : > { %130 = sbr.rel (!%p29_p3) target bundleno = 82 (0x52), region = 28  ;;  %s132_s20 = sand.u32 (%p29_p3), 1, %s5464_s13  }
   0xf   : > { %s4641_s21 = sshll.u32 (%p29_p3), %s5468_s14, 8  ;;  %s4309_s22 = sshll.u32 (%p29_p3), %s132_s20, 10 }
  0x10   : > { %s5525_s25 = scalar_lea.vmem (%p29_p3), %s6555_s0, %s4641_s21  ;;  %s5530_s26 = scalar_lea.vmem (%p29_p3), [#allocation2], %s4309_s22 }
  0x11   : > { %v153_v0 = vld [vmem:[%s5525_s25] sm:$0xff] (%p29_p3)   ;;  %v157_v1 = vld [vmem:[%s5525_s25 + $0x8] sm:$0xff] (%p29_p3)   ;;  %v161_v2 = vld [vmem:[%s5525_s25 + $0x10] sm:$0xff] (%p29_p3)  }
  0x12   : > { %154 = vst [vmem:[%s5530_s26] sm:$0xff] (%p29_p3), %v153_v0   ;;  %158 = vst [vmem:[%s5530_s26 + $0x8] sm:$0xff] (%p29_p3), %v157_v1   ;;  %v165_v3 = vld [vmem:[%s5525_s25 + $0x18] sm:$0xff] (%p29_p3)   ;;  %v169_v4 = vld [vmem:[%s5525_s25 + $0x20] sm:$0xff] (%p29_p3)  }
  0x13   : > { %162 = vst [vmem:[%s5530_s26 + $0x10] sm:$0xff] (%p29_p3), %v161_v2   ;;  %v173_v5 = vld [vmem:[%s5525_s25 + $0x28] sm:$0xff] (%p29_p3)   ;;  %166 = vst [vmem:[%s5530_s26 + $0x18] sm:$0xff] (%p29_p3), %v165_v3   ;;  %v177_v6 = vld [vmem:[%s5525_s25 + $0x30] sm:$0xff] (%p29_p3)  }
  0x14   : > { %170 = vst [vmem:[%s5530_s26 + $0x20] sm:$0xff] (%p29_p3), %v169_v4   ;;  %174 = vst [vmem:[%s5530_s26 + $0x28] sm:$0xff] (%p29_p3), %v173_v5   ;;  %v181_v7 = vld [vmem:[%s5525_s25 + $0x38] sm:$0xff] (%p29_p3)   ;;  %v185_v8 = vld [vmem:[%s5525_s25 + $0x40] sm:$0xff] (%p29_p3)  }
  0x15   : > { %178 = vst [vmem:[%s5530_s26 + $0x30] sm:$0xff] %v177_v6   ;;  %182 = vst [vmem:[%s5530_s26 + $0x38] sm:$0xff] %v181_v7   ;;  %v189_v9 = vld [vmem:[%s5525_s25 + $0x48] sm:$0xff]   ;;  %v193_v10 = vld [vmem:[%s5525_s25 + $0x50] sm:$0xff]  }
  0x16   : > { %186 = vst [vmem:[%s5530_s26 + $0x40] sm:$0xff] %v185_v8   ;;  %v197_v11 = vld [vmem:[%s5525_s25 + $0x58] sm:$0xff]   ;;  %190 = vst [vmem:[%s5530_s26 + $0x48] sm:$0xff] %v189_v9   ;;  %v201_v12 = vld [vmem:[%s5525_s25 + $0x60] sm:$0xff]  }
  0x17   : > { %194 = vst [vmem:[%s5530_s26 + $0x50] sm:$0xff] %v193_v10   ;;  %198 = vst [vmem:[%s5530_s26 + $0x58] sm:$0xff] %v197_v11   ;;  %v205_v13 = vld [vmem:[%s5525_s25 + $0x68] sm:$0xff]   ;;  %v209_v14 = vld [vmem:[%s5525_s25 + $0x70] sm:$0xff]  }
  0x18   : > { %202 = vst [vmem:[%s5530_s26 + $0x60] sm:$0xff] %v201_v12   ;;  %206 = vst [vmem:[%s5530_s26 + $0x68] sm:$0xff] %v205_v13   ;;  %v213_v15 = vld [vmem:[%s5525_s25 + $0x78] sm:$0xff]   ;;  %v217_v16 = vld [vmem:[%s5525_s25 + $0x80] sm:$0xff]  }
  0x19   : > { %210 = vst [vmem:[%s5530_s26 + $0x70] sm:$0xff] %v209_v14   ;;  %v221_v17 = vld [vmem:[%s5525_s25 + $0x88] sm:$0xff]   ;;  %214 = vst [vmem:[%s5530_s26 + $0x78] sm:$0xff] %v213_v15   ;;  %v225_v18 = vld [vmem:[%s5525_s25 + $0x90] sm:$0xff]  }
  0x1a   : > { %218 = vst [vmem:[%s5530_s26 + $0x80] sm:$0xff] %v217_v16   ;;  %222 = vst [vmem:[%s5530_s26 + $0x88] sm:$0xff] %v221_v17   ;;  %v229_v19 = vld [vmem:[%s5525_s25 + $0x98] sm:$0xff]   ;;  %v233_v20 = vld [vmem:[%s5525_s25 + $0xa0] sm:$0xff]  }
  0x1b   : > { %226 = vst [vmem:[%s5530_s26 + $0x90] sm:$0xff] %v225_v18   ;;  %230 = vst [vmem:[%s5530_s26 + $0x98] sm:$0xff] %v229_v19   ;;  %v237_v21 = vld [vmem:[%s5525_s25 + $0xa8] sm:$0xff]   ;;  %v241_v22 = vld [vmem:[%s5525_s25 + $0xb0] sm:$0xff]  }
  0x1c   : > { %234 = vst [vmem:[%s5530_s26 + $0xa0] sm:$0xff] %v233_v20   ;;  %v245_v23 = vld [vmem:[%s5525_s25 + $0xb8] sm:$0xff]   ;;  %238 = vst [vmem:[%s5530_s26 + $0xa8] sm:$0xff] %v237_v21   ;;  %v249_v24 = vld [vmem:[%s5525_s25 + $0xc0] sm:$0xff]  }
  0x1d   : > { %242 = vst [vmem:[%s5530_s26 + $0xb0] sm:$0xff] %v241_v22   ;;  %246 = vst [vmem:[%s5530_s26 + $0xb8] sm:$0xff] %v245_v23   ;;  %v253_v25 = vld [vmem:[%s5525_s25 + $0xc8] sm:$0xff]   ;;  %v257_v26 = vld [vmem:[%s5525_s25 + $0xd0] sm:$0xff]  }
  0x1e   : > { %250 = vst [vmem:[%s5530_s26 + $0xc0] sm:$0xff] %v249_v24   ;;  %254 = vst [vmem:[%s5530_s26 + $0xc8] sm:$0xff] %v253_v25   ;;  %v261_v27 = vld [vmem:[%s5525_s25 + $0xd8] sm:$0xff]   ;;  %v265_v28 = vld [vmem:[%s5525_s25 + $0xe0] sm:$0xff]  }
  0x1f   : > { %258 = vst [vmem:[%s5530_s26 + $0xd0] sm:$0xff] %v257_v26   ;;  %v269_v29 = vld [vmem:[%s5525_s25 + $0xe8] sm:$0xff]   ;;  %262 = vst [vmem:[%s5530_s26 + $0xd8] sm:$0xff] %v261_v27   ;;  %v273_v30 = vld [vmem:[%s5525_s25 + $0xf0] sm:$0xff]  }
  0x20   : > { %266 = vst [vmem:[%s5530_s26 + $0xe0] sm:$0xff] %v265_v28   ;;  %270 = vst [vmem:[%s5530_s26 + $0xe8] sm:$0xff] %v269_v29   ;;  %v277_v31 = vld [vmem:[%s5525_s25 + $0xf8] sm:$0xff]   ;;  %v281_v32 = vld [vmem:[%s5525_s25 + $0x200] sm:$0xff]  }
  0x21   : > { %274 = vst [vmem:[%s5530_s26 + $0xf0] sm:$0xff] %v273_v30   ;;  %278 = vst [vmem:[%s5530_s26 + $0xf8] sm:$0xff] %v277_v31   ;;  %v285_v33 = vld [vmem:[%s5525_s25 + $0x208] sm:$0xff]   ;;  %v289_v34 = vld [vmem:[%s5525_s25 + $0x210] sm:$0xff]  }
  0x22   : > { %282 = vst [vmem:[%s5530_s26 + $0x100] sm:$0xff] %v281_v32   ;;  %v293_v35 = vld [vmem:[%s5525_s25 + $0x218] sm:$0xff]   ;;  %286 = vst [vmem:[%s5530_s26 + $0x108] sm:$0xff] %v285_v33   ;;  %v297_v36 = vld [vmem:[%s5525_s25 + $0x220] sm:$0xff]  }
  0x23   : > { %290 = vst [vmem:[%s5530_s26 + $0x110] sm:$0xff] %v289_v34   ;;  %294 = vst [vmem:[%s5530_s26 + $0x118] sm:$0xff] %v293_v35   ;;  %v301_v37 = vld [vmem:[%s5525_s25 + $0x228] sm:$0xff]   ;;  %v305_v38 = vld [vmem:[%s5525_s25 + $0x230] sm:$0xff]  }
  0x24   : > { %298 = vst [vmem:[%s5530_s26 + $0x120] sm:$0xff] %v297_v36   ;;  %302 = vst [vmem:[%s5530_s26 + $0x128] sm:$0xff] %v301_v37   ;;  %v309_v39 = vld [vmem:[%s5525_s25 + $0x238] sm:$0xff]   ;;  %v313_v40 = vld [vmem:[%s5525_s25 + $0x240] sm:$0xff]  }
  0x25   : > { %306 = vst [vmem:[%s5530_s26 + $0x130] sm:$0xff] %v305_v38   ;;  %v317_v41 = vld [vmem:[%s5525_s25 + $0x248] sm:$0xff]   ;;  %310 = vst [vmem:[%s5530_s26 + $0x138] sm:$0xff] %v309_v39   ;;  %v321_v42 = vld [vmem:[%s5525_s25 + $0x250] sm:$0xff]  }
  0x26   : > { %314 = vst [vmem:[%s5530_s26 + $0x140] sm:$0xff] %v313_v40   ;;  %318 = vst [vmem:[%s5530_s26 + $0x148] sm:$0xff] %v317_v41   ;;  %v325_v43 = vld [vmem:[%s5525_s25 + $0x258] sm:$0xff]   ;;  %v329_v44 = vld [vmem:[%s5525_s25 + $0x260] sm:$0xff]  }
  0x27   : > { %322 = vst [vmem:[%s5530_s26 + $0x150] sm:$0xff] %v321_v42   ;;  %326 = vst [vmem:[%s5530_s26 + $0x158] sm:$0xff] %v325_v43   ;;  %v333_v45 = vld [vmem:[%s5525_s25 + $0x268] sm:$0xff]   ;;  %v337_v46 = vld [vmem:[%s5525_s25 + $0x270] sm:$0xff]  }
  0x28   : > { %330 = vst [vmem:[%s5530_s26 + $0x160] sm:$0xff] %v329_v44   ;;  %v341_v47 = vld [vmem:[%s5525_s25 + $0x278] sm:$0xff]   ;;  %334 = vst [vmem:[%s5530_s26 + $0x168] sm:$0xff] %v333_v45   ;;  %v345_v48 = vld [vmem:[%s5525_s25 + $0x280] sm:$0xff]  }
  0x29   : > { %338 = vst [vmem:[%s5530_s26 + $0x170] sm:$0xff] %v337_v46   ;;  %342 = vst [vmem:[%s5530_s26 + $0x178] sm:$0xff] %v341_v47   ;;  %v349_v49 = vld [vmem:[%s5525_s25 + $0x288] sm:$0xff]   ;;  %v353_v50 = vld [vmem:[%s5525_s25 + $0x290] sm:$0xff]  }
  0x2a   : > { %346 = vst [vmem:[%s5530_s26 + $0x180] sm:$0xff] %v345_v48   ;;  %350 = vst [vmem:[%s5530_s26 + $0x188] sm:$0xff] %v349_v49   ;;  %v357_v51 = vld [vmem:[%s5525_s25 + $0x298] sm:$0xff]   ;;  %v361_v52 = vld [vmem:[%s5525_s25 + $0x2a0] sm:$0xff]  }
  0x2b   : > { %354 = vst [vmem:[%s5530_s26 + $0x190] sm:$0xff] %v353_v50   ;;  %v365_v53 = vld [vmem:[%s5525_s25 + $0x2a8] sm:$0xff]   ;;  %358 = vst [vmem:[%s5530_s26 + $0x198] sm:$0xff] %v357_v51   ;;  %v369_v54 = vld [vmem:[%s5525_s25 + $0x2b0] sm:$0xff]  }
  0x2c   : > { %362 = vst [vmem:[%s5530_s26 + $0x1a0] sm:$0xff] %v361_v52   ;;  %366 = vst [vmem:[%s5530_s26 + $0x1a8] sm:$0xff] %v365_v53   ;;  %v373_v55 = vld [vmem:[%s5525_s25 + $0x2b8] sm:$0xff]   ;;  %v377_v56 = vld [vmem:[%s5525_s25 + $0x2c0] sm:$0xff]  }
  0x2d   : > { %370 = vst [vmem:[%s5530_s26 + $0x1b0] sm:$0xff] %v369_v54   ;;  %374 = vst [vmem:[%s5530_s26 + $0x1b8] sm:$0xff] %v373_v55   ;;  %v381_v57 = vld [vmem:[%s5525_s25 + $0x2c8] sm:$0xff]   ;;  %v385_v58 = vld [vmem:[%s5525_s25 + $0x2d0] sm:$0xff]  }
  0x2e   : > { %378 = vst [vmem:[%s5530_s26 + $0x1c0] sm:$0xff] %v377_v56   ;;  %v389_v59 = vld [vmem:[%s5525_s25 + $0x2d8] sm:$0xff]   ;;  %382 = vst [vmem:[%s5530_s26 + $0x1c8] sm:$0xff] %v381_v57   ;;  %v393_v60 = vld [vmem:[%s5525_s25 + $0x2e0] sm:$0xff]  }
  0x2f   : > { %386 = vst [vmem:[%s5530_s26 + $0x1d0] sm:$0xff] %v385_v58   ;;  %390 = vst [vmem:[%s5530_s26 + $0x1d8] sm:$0xff] %v389_v59   ;;  %v397_v61 = vld [vmem:[%s5525_s25 + $0x2e8] sm:$0xff]   ;;  %v401_v62 = vld [vmem:[%s5525_s25 + $0x2f0] sm:$0xff]  }
  0x30   : > { %394 = vst [vmem:[%s5530_s26 + $0x1e0] sm:$0xff] %v393_v60   ;;  %398 = vst [vmem:[%s5530_s26 + $0x1e8] sm:$0xff] %v397_v61   ;;  %v405_v63 = vld [vmem:[%s5525_s25 + $0x2f8] sm:$0xff]   ;;  %v409_v0 = vld [vmem:[%s5525_s25 + $0x400] sm:$0xff]  }
  0x31   : > { %402 = vst [vmem:[%s5530_s26 + $0x1f0] sm:$0xff] %v401_v62   ;;  %v413_v1 = vld [vmem:[%s5525_s25 + $0x408] sm:$0xff]   ;;  %406 = vst [vmem:[%s5530_s26 + $0x1f8] sm:$0xff] %v405_v63   ;;  %v417_v2 = vld [vmem:[%s5525_s25 + $0x410] sm:$0xff]  }
  0x32   : > { %410 = vst [vmem:[%s5530_s26 + $0x200] sm:$0xff] %v409_v0   ;;  %414 = vst [vmem:[%s5530_s26 + $0x208] sm:$0xff] %v413_v1   ;;  %v421_v3 = vld [vmem:[%s5525_s25 + $0x418] sm:$0xff]   ;;  %v425_v4 = vld [vmem:[%s5525_s25 + $0x420] sm:$0xff]  }
  0x33   : > { %418 = vst [vmem:[%s5530_s26 + $0x210] sm:$0xff] %v417_v2   ;;  %422 = vst [vmem:[%s5530_s26 + $0x218] sm:$0xff] %v421_v3   ;;  %v429_v5 = vld [vmem:[%s5525_s25 + $0x428] sm:$0xff]   ;;  %v433_v6 = vld [vmem:[%s5525_s25 + $0x430] sm:$0xff]  }
  0x34   : > { %426 = vst [vmem:[%s5530_s26 + $0x220] sm:$0xff] %v425_v4   ;;  %v437_v7 = vld [vmem:[%s5525_s25 + $0x438] sm:$0xff]   ;;  %430 = vst [vmem:[%s5530_s26 + $0x228] sm:$0xff] %v429_v5   ;;  %v441_v8 = vld [vmem:[%s5525_s25 + $0x440] sm:$0xff]  }
  0x35   : > { %434 = vst [vmem:[%s5530_s26 + $0x230] sm:$0xff] %v433_v6   ;;  %438 = vst [vmem:[%s5530_s26 + $0x238] sm:$0xff] %v437_v7   ;;  %v445_v9 = vld [vmem:[%s5525_s25 + $0x448] sm:$0xff]   ;;  %v449_v10 = vld [vmem:[%s5525_s25 + $0x450] sm:$0xff]  }
  0x36   : > { %442 = vst [vmem:[%s5530_s26 + $0x240] sm:$0xff] %v441_v8   ;;  %446 = vst [vmem:[%s5530_s26 + $0x248] sm:$0xff] %v445_v9   ;;  %v453_v11 = vld [vmem:[%s5525_s25 + $0x458] sm:$0xff]   ;;  %v457_v12 = vld [vmem:[%s5525_s25 + $0x460] sm:$0xff]  }
  0x37   : > { %450 = vst [vmem:[%s5530_s26 + $0x250] sm:$0xff] %v449_v10   ;;  %v461_v13 = vld [vmem:[%s5525_s25 + $0x468] sm:$0xff]   ;;  %454 = vst [vmem:[%s5530_s26 + $0x258] sm:$0xff] %v453_v11   ;;  %v465_v14 = vld [vmem:[%s5525_s25 + $0x470] sm:$0xff]  }
  0x38   : > { %458 = vst [vmem:[%s5530_s26 + $0x260] sm:$0xff] %v457_v12   ;;  %462 = vst [vmem:[%s5530_s26 + $0x268] sm:$0xff] %v461_v13   ;;  %v469_v15 = vld [vmem:[%s5525_s25 + $0x478] sm:$0xff]   ;;  %v473_v16 = vld [vmem:[%s5525_s25 + $0x480] sm:$0xff]  }
  0x39   : > { %466 = vst [vmem:[%s5530_s26 + $0x270] sm:$0xff] %v465_v14   ;;  %470 = vst [vmem:[%s5530_s26 + $0x278] sm:$0xff] %v469_v15   ;;  %v477_v17 = vld [vmem:[%s5525_s25 + $0x488] sm:$0xff]   ;;  %v481_v18 = vld [vmem:[%s5525_s25 + $0x490] sm:$0xff]  }
  0x3a   : > { %474 = vst [vmem:[%s5530_s26 + $0x280] sm:$0xff] %v473_v16   ;;  %v485_v19 = vld [vmem:[%s5525_s25 + $0x498] sm:$0xff]   ;;  %478 = vst [vmem:[%s5530_s26 + $0x288] sm:$0xff] %v477_v17   ;;  %v489_v20 = vld [vmem:[%s5525_s25 + $0x4a0] sm:$0xff]  }
  0x3b   : > { %482 = vst [vmem:[%s5530_s26 + $0x290] sm:$0xff] %v481_v18   ;;  %486 = vst [vmem:[%s5530_s26 + $0x298] sm:$0xff] %v485_v19   ;;  %v493_v21 = vld [vmem:[%s5525_s25 + $0x4a8] sm:$0xff]   ;;  %v497_v22 = vld [vmem:[%s5525_s25 + $0x4b0] sm:$0xff]  }
  0x3c   : > { %490 = vst [vmem:[%s5530_s26 + $0x2a0] sm:$0xff] %v489_v20   ;;  %494 = vst [vmem:[%s5530_s26 + $0x2a8] sm:$0xff] %v493_v21   ;;  %v501_v23 = vld [vmem:[%s5525_s25 + $0x4b8] sm:$0xff]   ;;  %v505_v24 = vld [vmem:[%s5525_s25 + $0x4c0] sm:$0xff]  }
  0x3d   : > { %498 = vst [vmem:[%s5530_s26 + $0x2b0] sm:$0xff] %v497_v22   ;;  %v509_v25 = vld [vmem:[%s5525_s25 + $0x4c8] sm:$0xff]   ;;  %502 = vst [vmem:[%s5530_s26 + $0x2b8] sm:$0xff] %v501_v23   ;;  %v513_v26 = vld [vmem:[%s5525_s25 + $0x4d0] sm:$0xff]  }
  0x3e   : > { %506 = vst [vmem:[%s5530_s26 + $0x2c0] sm:$0xff] %v505_v24   ;;  %510 = vst [vmem:[%s5530_s26 + $0x2c8] sm:$0xff] %v509_v25   ;;  %v517_v27 = vld [vmem:[%s5525_s25 + $0x4d8] sm:$0xff]   ;;  %v521_v28 = vld [vmem:[%s5525_s25 + $0x4e0] sm:$0xff]  }
  0x3f   : > { %514 = vst [vmem:[%s5530_s26 + $0x2d0] sm:$0xff] %v513_v26   ;;  %518 = vst [vmem:[%s5530_s26 + $0x2d8] sm:$0xff] %v517_v27   ;;  %v525_v29 = vld [vmem:[%s5525_s25 + $0x4e8] sm:$0xff]   ;;  %v529_v30 = vld [vmem:[%s5525_s25 + $0x4f0] sm:$0xff]  }
  0x40   : > { %522 = vst [vmem:[%s5530_s26 + $0x2e0] sm:$0xff] %v521_v28   ;;  %v533_v31 = vld [vmem:[%s5525_s25 + $0x4f8] sm:$0xff]   ;;  %526 = vst [vmem:[%s5530_s26 + $0x2e8] sm:$0xff] %v525_v29   ;;  %v537_v32 = vld [vmem:[%s5525_s25 + $0x600] sm:$0xff]  }
  0x41   : > { %530 = vst [vmem:[%s5530_s26 + $0x2f0] sm:$0xff] %v529_v30   ;;  %534 = vst [vmem:[%s5530_s26 + $0x2f8] sm:$0xff] %v533_v31   ;;  %v541_v33 = vld [vmem:[%s5525_s25 + $0x608] sm:$0xff]   ;;  %v545_v34 = vld [vmem:[%s5525_s25 + $0x610] sm:$0xff]  }
  0x42   : > { %538 = vst [vmem:[%s5530_s26 + $0x300] sm:$0xff] %v537_v32   ;;  %542 = vst [vmem:[%s5530_s26 + $0x308] sm:$0xff] %v541_v33   ;;  %v549_v35 = vld [vmem:[%s5525_s25 + $0x618] sm:$0xff]   ;;  %v553_v36 = vld [vmem:[%s5525_s25 + $0x620] sm:$0xff]  }
  0x43   : > { %546 = vst [vmem:[%s5530_s26 + $0x310] sm:$0xff] %v545_v34   ;;  %v557_v37 = vld [vmem:[%s5525_s25 + $0x628] sm:$0xff]   ;;  %550 = vst [vmem:[%s5530_s26 + $0x318] sm:$0xff] %v549_v35   ;;  %v561_v38 = vld [vmem:[%s5525_s25 + $0x630] sm:$0xff]  }
  0x44   : > { %554 = vst [vmem:[%s5530_s26 + $0x320] sm:$0xff] %v553_v36   ;;  %558 = vst [vmem:[%s5530_s26 + $0x328] sm:$0xff] %v557_v37   ;;  %v565_v39 = vld [vmem:[%s5525_s25 + $0x638] sm:$0xff]   ;;  %v569_v40 = vld [vmem:[%s5525_s25 + $0x640] sm:$0xff]  }
  0x45   : > { %562 = vst [vmem:[%s5530_s26 + $0x330] sm:$0xff] %v561_v38   ;;  %566 = vst [vmem:[%s5530_s26 + $0x338] sm:$0xff] %v565_v39   ;;  %v573_v41 = vld [vmem:[%s5525_s25 + $0x648] sm:$0xff]   ;;  %v577_v42 = vld [vmem:[%s5525_s25 + $0x650] sm:$0xff]  }
  0x46   : > { %570 = vst [vmem:[%s5530_s26 + $0x340] sm:$0xff] %v569_v40   ;;  %v581_v43 = vld [vmem:[%s5525_s25 + $0x658] sm:$0xff]   ;;  %574 = vst [vmem:[%s5530_s26 + $0x348] sm:$0xff] %v573_v41   ;;  %v585_v44 = vld [vmem:[%s5525_s25 + $0x660] sm:$0xff]  }
  0x47   : > { %578 = vst [vmem:[%s5530_s26 + $0x350] sm:$0xff] %v577_v42   ;;  %582 = vst [vmem:[%s5530_s26 + $0x358] sm:$0xff] %v581_v43   ;;  %v589_v45 = vld [vmem:[%s5525_s25 + $0x668] sm:$0xff]   ;;  %v593_v46 = vld [vmem:[%s5525_s25 + $0x670] sm:$0xff]  }
  0x48   : > { %586 = vst [vmem:[%s5530_s26 + $0x360] sm:$0xff] %v585_v44   ;;  %590 = vst [vmem:[%s5530_s26 + $0x368] sm:$0xff] %v589_v45   ;;  %v597_v47 = vld [vmem:[%s5525_s25 + $0x678] sm:$0xff]   ;;  %v601_v48 = vld [vmem:[%s5525_s25 + $0x680] sm:$0xff]  }
  0x49   : > { %594 = vst [vmem:[%s5530_s26 + $0x370] sm:$0xff] %v593_v46   ;;  %v605_v49 = vld [vmem:[%s5525_s25 + $0x688] sm:$0xff]   ;;  %598 = vst [vmem:[%s5530_s26 + $0x378] sm:$0xff] %v597_v47   ;;  %v609_v50 = vld [vmem:[%s5525_s25 + $0x690] sm:$0xff]  }
  0x4a   : > { %602 = vst [vmem:[%s5530_s26 + $0x380] sm:$0xff] %v601_v48   ;;  %606 = vst [vmem:[%s5530_s26 + $0x388] sm:$0xff] %v605_v49   ;;  %v613_v51 = vld [vmem:[%s5525_s25 + $0x698] sm:$0xff]   ;;  %v617_v52 = vld [vmem:[%s5525_s25 + $0x6a0] sm:$0xff]  }
  0x4b   : > { %610 = vst [vmem:[%s5530_s26 + $0x390] sm:$0xff] %v609_v50   ;;  %614 = vst [vmem:[%s5530_s26 + $0x398] sm:$0xff] %v613_v51   ;;  %v621_v53 = vld [vmem:[%s5525_s25 + $0x6a8] sm:$0xff]   ;;  %v625_v54 = vld [vmem:[%s5525_s25 + $0x6b0] sm:$0xff]  }
  0x4c   : > { %618 = vst [vmem:[%s5530_s26 + $0x3a0] sm:$0xff] %v617_v52   ;;  %v629_v55 = vld [vmem:[%s5525_s25 + $0x6b8] sm:$0xff]   ;;  %622 = vst [vmem:[%s5530_s26 + $0x3a8] sm:$0xff] %v621_v53   ;;  %v633_v56 = vld [vmem:[%s5525_s25 + $0x6c0] sm:$0xff]  }
  0x4d   : > { %626 = vst [vmem:[%s5530_s26 + $0x3b0] sm:$0xff] %v625_v54   ;;  %630 = vst [vmem:[%s5530_s26 + $0x3b8] sm:$0xff] %v629_v55   ;;  %v637_v57 = vld [vmem:[%s5525_s25 + $0x6c8] sm:$0xff]   ;;  %v641_v58 = vld [vmem:[%s5525_s25 + $0x6d0] sm:$0xff]  }
  0x4e   : > { %634 = vst [vmem:[%s5530_s26 + $0x3c0] sm:$0xff] %v633_v56   ;;  %638 = vst [vmem:[%s5530_s26 + $0x3c8] sm:$0xff] %v637_v57   ;;  %v645_v59 = vld [vmem:[%s5525_s25 + $0x6d8] sm:$0xff]   ;;  %v649_v60 = vld [vmem:[%s5525_s25 + $0x6e0] sm:$0xff]  }
  0x4f   : > { %642 = vst [vmem:[%s5530_s26 + $0x3d0] sm:$0xff] %v641_v58   ;;  %v653_v61 = vld [vmem:[%s5525_s25 + $0x6e8] sm:$0xff]   ;;  %646 = vst [vmem:[%s5530_s26 + $0x3d8] sm:$0xff] %v645_v59   ;;  %v657_v62 = vld [vmem:[%s5525_s25 + $0x6f0] sm:$0xff]  }
  0x50   : > { %650 = vst [vmem:[%s5530_s26 + $0x3e0] sm:$0xff] %v649_v60   ;;  %654 = vst [vmem:[%s5530_s26 + $0x3e8] sm:$0xff] %v653_v61   ;;  %v661_v63 = vld [vmem:[%s5525_s25 + $0x6f8] sm:$0xff]  }
  0x51   : > { %658 = vst [vmem:[%s5530_s26 + $0x3f0] sm:$0xff] %v657_v62   ;;  %662 = vst [vmem:[%s5530_s26 + $0x3f8] sm:$0xff] %v661_v63  }
  0x52 PF: > { %p4312_p5 = scmp.ge.s32.totalorder %s5468_s14, 1  ;;  %p1198_p6 = scmp.lt.s32.totalorder %s5468_s14, 3 }
  0x54   : > { %p1199_p7 = pnand %p4312_p5, %p1198_p6 }
  0x56   : > { %1202 = sbr.rel (%p1199_p7) target bundleno = 577 (0x241), region = 69 }
  0x5d   : > { %v5316_v0 = vld [vmem:[%s6556_s1] sm:$0xff]   ;;  %vm2532_vm0 = vcmask 1043456   ;;  %v5317_v1 = vld [vmem:[%s6556_s1 + $0x8] sm:$0x1f]   ;;  %vm2533_vm1 = vcmask 1044480   ;;  %s1205_s4 = sand.u32 1, %s5460_s12  }
  0x5e   : > { %5027 = vmatprep.subr.bf16.mxu0 %v5316_v0  ;;  %5287 = vmatprep.subr.bf16.mxu1 %v5316_v0  ;;  %v5470_v2 = vmov 65535   ;;  %s4313_s5 = sshll.u32 %s1205_s4, 10  ;;  %vm2147_vm2 = vcmask 203776   ;;  %s4314_s7 = sshll.u32 %s4305_s15, 6 }
  0x5f   : > { %5028 = vmatpush3.bf16.msra.mxu0 %v5316_v0  ;;  %5289 = vmatpush3.bf16.msra.mxu1 %v5316_v0  ;;  %v2534_v3 = vsel %vm2532_vm0, 4294967295, %v5470_v2  ;;  %s5794_s6 = scalar_lea.vmem [#allocation2], %s4313_s5  ;;  %p1230_p8 = scmp.lt.s32.totalorder %s4314_s7, 127 }
  0x60   : > { %v2535_v4 = vsel %vm2533_vm1, %v2534_v3, 0  ;;  %v5318_v6 = vld [vmem:[%s5794_s6] sm:$0xff]   ;;  %v5320_v8 = vld [vmem:[%s5794_s6 + $0x8] sm:$0xff]   ;;  %v5322_v10 = vld [vmem:[%s5794_s6 + $0x10] sm:$0xff]  }
  0x61   : > { %v2537_v5 = vand.u32 %v5317_v1, %v2535_v4  ;;  %v5319_v7 = vld [vmem:[%s5794_s6 + $0x200] sm:$0xff]   ;;  %v5321_v9 = vld [vmem:[%s5794_s6 + $0x208] sm:$0xff]   ;;  %5031 = vmatprep.mubr.msk.bf16.mxu0 %vm2147_vm2, %v5318_v6  ;;  %v5323_v11 = vld [vmem:[%s5794_s6 + $0x210] sm:$0xff]   ;;  %s6721_s7 = smov (!%p1230_p8, %s4314_s7), 127 }
  0x62   : > { %5159 = vmatprep.mubr.msk.bf16.mxu1 %vm2147_vm2, %v5319_v7  ;;  %v5324_v12 = vld [vmem:[%s5794_s6 + $0x18] sm:$0xff]   ;;  %v5326_v14 = vld [vmem:[%s5794_s6 + $0x20] sm:$0xff]   ;;  %v5328_v16 = vld [vmem:[%s5794_s6 + $0x28] sm:$0xff]   ;;  %s4315_s10 = sshll.u32 %s6721_s7, 2 }
  0x63   : > { %5029 = vmatprep.subr.bf16.mxu0 %v2537_v5  ;;  %5288 = vmatprep.subr.bf16.mxu1 %v2537_v5  ;;  %v5325_v13 = vld [vmem:[%s5794_s6 + $0x218] sm:$0xff]   ;;  %v5327_v15 = vld [vmem:[%s5794_s6 + $0x220] sm:$0xff]   ;;  %v5329_v17 = vld [vmem:[%s5794_s6 + $0x228] sm:$0xff]   ;;  %s6333_s14 = scalar_lea.vmem %s6558_s3, %s4315_s10 }
  0x64   : > { %5030 = vmatpush3.bf16.msra.mxu0 %v2537_v5  ;;  %5290 = vmatpush3.bf16.msra.mxu1 %v2537_v5  ;;  %v5330_v18 = vld [vmem:[%s5794_s6 + $0x30] sm:$0xff]   ;;  %v5332_v20 = vld [vmem:[%s5794_s6 + $0x38] sm:$0xff]   ;;  %v5334_v22 = vld [vmem:[%s5794_s6 + $0x40] sm:$0xff]  }
  0x65   : > { %v5331_v19 = vld [vmem:[%s5794_s6 + $0x230] sm:$0xff]   ;;  %v5333_v21 = vld [vmem:[%s5794_s6 + $0x238] sm:$0xff]   ;;  %v5335_v23 = vld [vmem:[%s5794_s6 + $0x240] sm:$0xff]  }
  0x66   : > { %v5336_v24 = vld [vmem:[%s5794_s6 + $0x48] sm:$0xff]   ;;  %v5338_v26 = vld [vmem:[%s5794_s6 + $0x50] sm:$0xff]   ;;  %v5340_v28 = vld [vmem:[%s5794_s6 + $0x58] sm:$0xff]  }
  0x67   : > { %5032 = vmatmul.mubr.msk.bf16.vlgmr.msra.gmra.mrb[0].mxu0 %vm2147_vm2, %v5320_v8  ;;  %5160 = vmatmul.mubr.msk.bf16.vlgmr.msra.gmra.mrb[0].mxu1 %vm2147_vm2, %v5321_v9  ;;  %v5337_v25 = vld [vmem:[%s5794_s6 + $0x248] sm:$0xff]   ;;  %v5339_v27 = vld [vmem:[%s5794_s6 + $0x250] sm:$0xff]   ;;  %v5341_v29 = vld [vmem:[%s5794_s6 + $0x258] sm:$0xff]  }
  0x68   : > { %5035 = vmatprep.mubr.msk.bf16.mxu0 %vm2147_vm2, %v5322_v10  ;;  %5163 = vmatprep.mubr.msk.bf16.mxu1 %vm2147_vm2, %v5323_v11  ;;  %v5342_v30 = vld [vmem:[%s5794_s6 + $0x60] sm:$0xff]   ;;  %v5344_v32 = vld [vmem:[%s5794_s6 + $0x68] sm:$0xff]   ;;  %v5346_v34 = vld [vmem:[%s5794_s6 + $0x70] sm:$0xff]  }
  0x69   : > { %v5343_v31 = vld [vmem:[%s5794_s6 + $0x260] sm:$0xff]   ;;  %v5345_v33 = vld [vmem:[%s5794_s6 + $0x268] sm:$0xff]   ;;  %v5347_v35 = vld [vmem:[%s5794_s6 + $0x270] sm:$0xff]  }
  0x6a   : > { %v5348_v36 = vld [vmem:[%s5794_s6 + $0x78] sm:$0xff]   ;;  %v5350_v38 = vld [vmem:[%s5794_s6 + $0x80] sm:$0xff]   ;;  %v5352_v40 = vld [vmem:[%s5794_s6 + $0x88] sm:$0xff]  }
  0x6b   : > { %v5349_v37 = vld [vmem:[%s5794_s6 + $0x278] sm:$0xff]   ;;  %v5351_v39 = vld [vmem:[%s5794_s6 + $0x280] sm:$0xff]   ;;  %v5353_v41 = vld [vmem:[%s5794_s6 + $0x288] sm:$0xff]  }
  0x6c   : > { %v5354_v42 = vld [vmem:[%s5794_s6 + $0x90] sm:$0xff]   ;;  %v5356_v44 = vld [vmem:[%s5794_s6 + $0x98] sm:$0xff]   ;;  %v5358_v46 = vld [vmem:[%s5794_s6 + $0xa0] sm:$0xff]  }
  0x6d   : > { %v5355_v43 = vld [vmem:[%s5794_s6 + $0x290] sm:$0xff]   ;;  %v5357_v45 = vld [vmem:[%s5794_s6 + $0x298] sm:$0xff]   ;;  %v5359_v47 = vld [vmem:[%s5794_s6 + $0x2a0] sm:$0xff]  }
  0x6e   : > { %v5360_v48 = vld [vmem:[%s5794_s6 + $0xa8] sm:$0xff]   ;;  %v5362_v50 = vld [vmem:[%s5794_s6 + $0xb0] sm:$0xff]   ;;  %v5364_v52 = vld [vmem:[%s5794_s6 + $0xb8] sm:$0xff]  }
  0x6f   : > { %5036 = vmatmul.mubr.msk.bf16.gmra.mrb[4].mxu0 %vm2147_vm2, %v5324_v12  ;;  %5164 = vmatmul.mubr.msk.bf16.gmra.mrb[4].mxu1 %vm2147_vm2, %v5325_v13  ;;  %v5361_v49 = vld [vmem:[%s5794_s6 + $0x2a8] sm:$0xff]   ;;  %v5363_v51 = vld [vmem:[%s5794_s6 + $0x2b0] sm:$0xff]   ;;  %v5365_v53 = vld [vmem:[%s5794_s6 + $0x2b8] sm:$0xff]  }
  0x70   : > { %5039 = vmatprep.mubr.msk.bf16.mxu0 %vm2147_vm2, %v5326_v14  ;;  %5167 = vmatprep.mubr.msk.bf16.mxu1 %vm2147_vm2, %v5327_v15  ;;  %v5366_v54 = vld [vmem:[%s5794_s6 + $0xc0] sm:$0xff]   ;;  %v5368_v56 = vld [vmem:[%s5794_s6 + $0xc8] sm:$0xff]   ;;  %v5370_v58 = vld [vmem:[%s5794_s6 + $0xd0] sm:$0xff]  }
  0x71   : > { %v5367_v55 = vld [vmem:[%s5794_s6 + $0x2c0] sm:$0xff]   ;;  %v5369_v57 = vld [vmem:[%s5794_s6 + $0x2c8] sm:$0xff]   ;;  %v5371_v59 = vld [vmem:[%s5794_s6 + $0x2d0] sm:$0xff]  }
  0x72   : > { %v5372_v60 = vld [vmem:[%s5794_s6 + $0xd8] sm:$0xff]   ;;  %v5374_v62 = vld [vmem:[%s5794_s6 + $0xe0] sm:$0xff]   ;;  %v5376_v0 = vld [vmem:[%s5794_s6 + $0xe8] sm:$0xff]  }
  0x73   : > { %v5373_v61 = vld [vmem:[%s5794_s6 + $0x2d8] sm:$0xff]   ;;  %v5375_v63 = vld [vmem:[%s5794_s6 + $0x2e0] sm:$0xff]   ;;  %v5377_v1 = vld [vmem:[%s5794_s6 + $0x2e8] sm:$0xff]  }
  0x74   : > { %v5378_v2 = vld [vmem:[%s5794_s6 + $0xf0] sm:$0xff]   ;;  %v5380_v4 = vld [vmem:[%s5794_s6 + $0xf8] sm:$0xff]   ;;  %v5382_v6 = vld [vmem:[%s5794_s6 + $0x100] sm:$0xff]  }
  0x75   : > { %v5379_v3 = vld [vmem:[%s5794_s6 + $0x2f0] sm:$0xff]   ;;  %v5381_v5 = vld [vmem:[%s5794_s6 + $0x2f8] sm:$0xff]   ;;  %v5383_v7 = vld [vmem:[%s5794_s6 + $0x300] sm:$0xff]  }
  0x76   : > { %v5384_v8 = vld [vmem:[%s5794_s6 + $0x108] sm:$0xff]   ;;  %v5386_v10 = vld [vmem:[%s5794_s6 + $0x110] sm:$0xff]   ;;  %v5388_v12 = vld [vmem:[%s5794_s6 + $0x118] sm:$0xff]  }
  0x77   : > { %5040 = vmatmul.mubr.msk.bf16.gmra.mrb[8].mxu0 %vm2147_vm2, %v5328_v16  ;;  %5168 = vmatmul.mubr.msk.bf16.gmra.mrb[8].mxu1 %vm2147_vm2, %v5329_v17  ;;  %v5385_v9 = vld [vmem:[%s5794_s6 + $0x308] sm:$0xff]   ;;  %v5387_v11 = vld [vmem:[%s5794_s6 + $0x310] sm:$0xff]   ;;  %v5389_v13 = vld [vmem:[%s5794_s6 + $0x318] sm:$0xff]  }
  0x78   : > { %5043 = vmatprep.mubr.msk.bf16.mxu0 %vm2147_vm2, %v5330_v18  ;;  %5171 = vmatprep.mubr.msk.bf16.mxu1 %vm2147_vm2, %v5331_v19  ;;  %v5390_v14 = vld [vmem:[%s5794_s6 + $0x120] sm:$0xff]   ;;  %v5392_v16 = vld [vmem:[%s5794_s6 + $0x128] sm:$0xff]   ;;  %v5394_v18 = vld [vmem:[%s5794_s6 + $0x130] sm:$0xff]  }
  0x79   : > { %v5391_v15 = vld [vmem:[%s5794_s6 + $0x320] sm:$0xff]   ;;  %v5393_v17 = vld [vmem:[%s5794_s6 + $0x328] sm:$0xff]   ;;  %v5395_v19 = vld [vmem:[%s5794_s6 + $0x330] sm:$0xff]  }
  0x7f   : > { %5044 = vmatmul.mubr.msk.bf16.gmra.mrb[12].mxu0 %vm2147_vm2, %v5332_v20  ;;  %5172 = vmatmul.mubr.msk.bf16.gmra.mrb[12].mxu1 %vm2147_vm2, %v5333_v21  ;;  %v5396_v20 = vld [vmem:[%s5794_s6 + $0x138] sm:$0xff]  }
  0x80   : > { %5047 = vmatprep.mubr.msk.bf16.mxu0 %vm2147_vm2, %v5334_v22  ;;  %5175 = vmatprep.mubr.msk.bf16.mxu1 %vm2147_vm2, %v5335_v23  ;;  %v5397_v21 = vld [vmem:[%s5794_s6 + $0x338] sm:$0xff]   ;;  %v5398_v22 = vld [vmem:[%s5794_s6 + $0x140] sm:$0xff]  }
  0x81   : > { %v5399_v23 = vld [vmem:[%s5794_s6 + $0x340] sm:$0xff]  }
  0x87   : > { %5048 = vmatmul.mubr.msk.bf16.gmra.mrb[16].mxu0 %vm2147_vm2, %v5336_v24  ;;  %5176 = vmatmul.mubr.msk.bf16.gmra.mrb[16].mxu1 %vm2147_vm2, %v5337_v25  ;;  %v5400_v24 = vld [vmem:[%s5794_s6 + $0x148] sm:$0xff]  }
  0x88   : > { %5051 = vmatprep.mubr.msk.bf16.mxu0 %vm2147_vm2, %v5338_v26  ;;  %5179 = vmatprep.mubr.msk.bf16.mxu1 %vm2147_vm2, %v5339_v27  ;;  %v5401_v25 = vld [vmem:[%s5794_s6 + $0x348] sm:$0xff]   ;;  %v5402_v26 = vld [vmem:[%s5794_s6 + $0x150] sm:$0xff]  }
  0x89   : > { %v5403_v27 = vld [vmem:[%s5794_s6 + $0x350] sm:$0xff]  }
  0x8f   : > { %5052 = vmatmul.mubr.msk.bf16.gmra.mrb[20].mxu0 %vm2147_vm2, %v5340_v28  ;;  %5180 = vmatmul.mubr.msk.bf16.gmra.mrb[20].mxu1 %vm2147_vm2, %v5341_v29  ;;  %v5404_v28 = vld [vmem:[%s5794_s6 + $0x158] sm:$0xff]  }
  0x90   : > { %5055 = vmatprep.mubr.msk.bf16.mxu0 %vm2147_vm2, %v5342_v30  ;;  %5183 = vmatprep.mubr.msk.bf16.mxu1 %vm2147_vm2, %v5343_v31  ;;  %v5405_v29 = vld [vmem:[%s5794_s6 + $0x358] sm:$0xff]   ;;  %v5406_v30 = vld [vmem:[%s5794_s6 + $0x160] sm:$0xff]  }
  0x91   : > { %v5407_v31 = vld [vmem:[%s5794_s6 + $0x360] sm:$0xff]  }
  0x97   : > { %5056 = vmatmul.mubr.msk.bf16.gmra.mrb[24].mxu0 %vm2147_vm2, %v5344_v32  ;;  %5184 = vmatmul.mubr.msk.bf16.gmra.mrb[24].mxu1 %vm2147_vm2, %v5345_v33  ;;  %v5408_v32 = vld [vmem:[%s5794_s6 + $0x168] sm:$0xff]  }
  0x98   : > { %5059 = vmatprep.mubr.msk.bf16.mxu0 %vm2147_vm2, %v5346_v34  ;;  %5187 = vmatprep.mubr.msk.bf16.mxu1 %vm2147_vm2, %v5347_v35  ;;  %v5409_v33 = vld [vmem:[%s5794_s6 + $0x368] sm:$0xff]   ;;  %v5410_v34 = vld [vmem:[%s5794_s6 + $0x170] sm:$0xff]  }
  0x99   : > { %v5411_v35 = vld [vmem:[%s5794_s6 + $0x370] sm:$0xff]  }
  0x9f   : > { %5060 = vmatmul.mubr.msk.bf16.gmra.mrb[28].mxu0 %vm2147_vm2, %v5348_v36  ;;  %5188 = vmatmul.mubr.msk.bf16.gmra.mrb[28].mxu1 %vm2147_vm2, %v5349_v37  ;;  %v5412_v36 = vld [vmem:[%s5794_s6 + $0x178] sm:$0xff]  }
  0xa0   : > { %5063 = vmatprep.mubr.msk.bf16.mxu0 %vm2147_vm2, %v5350_v38  ;;  %5191 = vmatprep.mubr.msk.bf16.mxu1 %vm2147_vm2, %v5351_v39  ;;  %v5413_v37 = vld [vmem:[%s5794_s6 + $0x378] sm:$0xff]   ;;  %v5414_v38 = vld [vmem:[%s5794_s6 + $0x180] sm:$0xff]  }
  0xa1   : > { %v5415_v39 = vld [vmem:[%s5794_s6 + $0x380] sm:$0xff]  }
  0xa7   : > { %5064 = vmatmul.mubr.msk.bf16.gmra.mrb[32].mxu0 %vm2147_vm2, %v5352_v40  ;;  %5192 = vmatmul.mubr.msk.bf16.gmra.mrb[32].mxu1 %vm2147_vm2, %v5353_v41  ;;  %v5416_v40 = vld [vmem:[%s5794_s6 + $0x188] sm:$0xff]  }
  0xa8   : > { %5067 = vmatprep.mubr.msk.bf16.mxu0 %vm2147_vm2, %v5354_v42  ;;  %5195 = vmatprep.mubr.msk.bf16.mxu1 %vm2147_vm2, %v5355_v43  ;;  %v5417_v41 = vld [vmem:[%s5794_s6 + $0x388] sm:$0xff]   ;;  %v5418_v42 = vld [vmem:[%s5794_s6 + $0x190] sm:$0xff]  }
  0xa9   : > { %v5419_v43 = vld [vmem:[%s5794_s6 + $0x390] sm:$0xff]  }
  0xaf   : > { %5068 = vmatmul.mubr.msk.bf16.gmra.mrb[36].mxu0 %vm2147_vm2, %v5356_v44  ;;  %5196 = vmatmul.mubr.msk.bf16.gmra.mrb[36].mxu1 %vm2147_vm2, %v5357_v45  ;;  %v5420_v44 = vld [vmem:[%s5794_s6 + $0x198] sm:$0xff]  }
  0xb0   : > { %5071 = vmatprep.mubr.msk.bf16.mxu0 %vm2147_vm2, %v5358_v46  ;;  %5199 = vmatprep.mubr.msk.bf16.mxu1 %vm2147_vm2, %v5359_v47  ;;  %v5421_v45 = vld [vmem:[%s5794_s6 + $0x398] sm:$0xff]   ;;  %v5422_v46 = vld [vmem:[%s5794_s6 + $0x1a0] sm:$0xff]  }
  0xb1   : > { %v5423_v47 = vld [vmem:[%s5794_s6 + $0x3a0] sm:$0xff]  }
  0xb7   : > { %5072 = vmatmul.mubr.msk.bf16.gmra.mrb[40].mxu0 %vm2147_vm2, %v5360_v48  ;;  %5200 = vmatmul.mubr.msk.bf16.gmra.mrb[40].mxu1 %vm2147_vm2, %v5361_v49  ;;  %v5424_v48 = vld [vmem:[%s5794_s6 + $0x1a8] sm:$0xff]  }
  0xb8   : > { %5075 = vmatprep.mubr.msk.bf16.mxu0 %vm2147_vm2, %v5362_v50  ;;  %5203 = vmatprep.mubr.msk.bf16.mxu1 %vm2147_vm2, %v5363_v51  ;;  %v5425_v49 = vld [vmem:[%s5794_s6 + $0x3a8] sm:$0xff]   ;;  %v5426_v50 = vld [vmem:[%s5794_s6 + $0x1b0] sm:$0xff]  }
  0xb9   : > { %v5427_v51 = vld [vmem:[%s5794_s6 + $0x3b0] sm:$0xff]  }
  0xbf   : > { %5076 = vmatmul.mubr.msk.bf16.gmra.mrb[44].mxu0 %vm2147_vm2, %v5364_v52  ;;  %5204 = vmatmul.mubr.msk.bf16.gmra.mrb[44].mxu1 %vm2147_vm2, %v5365_v53 }
  0xc0   : > { %5079 = vmatprep.mubr.msk.bf16.mxu0 %vm2147_vm2, %v5366_v54  ;;  %5207 = vmatprep.mubr.msk.bf16.mxu1 %vm2147_vm2, %v5367_v55 }
  0xc7   : > { %5080 = vmatmul.mubr.msk.bf16.gmra.mrb[48].mxu0 %vm2147_vm2, %v5368_v56  ;;  %5208 = vmatmul.mubr.msk.bf16.gmra.mrb[48].mxu1 %vm2147_vm2, %v5369_v57  ;;  %v5428_v56 = vld [vmem:[%s5794_s6 + $0x1b8] sm:$0xff]  }
  0xc8   : > { %5083 = vmatprep.mubr.msk.bf16.mxu0 %vm2147_vm2, %v5370_v58  ;;  %5211 = vmatprep.mubr.msk.bf16.mxu1 %vm2147_vm2, %v5371_v59  ;;  %v5429_v57 = vld [vmem:[%s5794_s6 + $0x3b8] sm:$0xff]  }
  0xcf   : > { %5084 = vmatmul.mubr.msk.bf16.gmra.mrb[52].mxu0 %vm2147_vm2, %v5372_v60  ;;  %5212 = vmatmul.mubr.msk.bf16.gmra.mrb[52].mxu1 %vm2147_vm2, %v5373_v61  ;;  %v5430_v60 = vld [vmem:[%s5794_s6 + $0x1c0] sm:$0xff]  }
  0xd0   : > { %5087 = vmatprep.mubr.msk.bf16.mxu0 %vm2147_vm2, %v5374_v62  ;;  %5215 = vmatprep.mubr.msk.bf16.mxu1 %vm2147_vm2, %v5375_v63  ;;  %v5431_v61 = vld [vmem:[%s5794_s6 + $0x3c0] sm:$0xff]  }
  0xd7   : > { %5088 = vmatmul.mubr.msk.bf16.gmra.mrb[56].mxu0 %vm2147_vm2, %v5376_v0  ;;  %5216 = vmatmul.mubr.msk.bf16.gmra.mrb[56].mxu1 %vm2147_vm2, %v5377_v1 }
  0xd8   : > { %5091 = vmatprep.mubr.msk.bf16.mxu0 %vm2147_vm2, %v5378_v2  ;;  %5219 = vmatprep.mubr.msk.bf16.mxu1 %vm2147_vm2, %v5379_v3 }
  0xdf   : > { %5092 = vmatmul.mubr.msk.bf16.gmra.mrb[60].mxu0 %vm2147_vm2, %v5380_v4  ;;  %5220 = vmatmul.mubr.msk.bf16.gmra.mrb[60].mxu1 %vm2147_vm2, %v5381_v5  ;;  %v5432_v4 = vld [vmem:[%s5794_s6 + $0x1c8] sm:$0xff]  }
  0xe0   : > { %5095 = vmatprep.mubr.msk.bf16.mxu0 %vm2147_vm2, %v5382_v6  ;;  %5223 = vmatprep.mubr.msk.bf16.mxu1 %vm2147_vm2, %v5383_v7  ;;  %v5433_v5 = vld [vmem:[%s5794_s6 + $0x3c8] sm:$0xff]  }
  0xe7   : > { %5096 = vmatmul.mubr.msk.bf16.gmra.mrb[64].mxu0 %vm2147_vm2, %v5384_v8  ;;  %5224 = vmatmul.mubr.msk.bf16.gmra.mrb[64].mxu1 %vm2147_vm2, %v5385_v9  ;;  %v5434_v8 = vld [vmem:[%s5794_s6 + $0x1d0] sm:$0xff]  }
  0xe8   : > { %5099 = vmatprep.mubr.msk.bf16.mxu0 %vm2147_vm2, %v5386_v10  ;;  %5227 = vmatprep.mubr.msk.bf16.mxu1 %vm2147_vm2, %v5387_v11  ;;  %v5435_v9 = vld [vmem:[%s5794_s6 + $0x3d0] sm:$0xff]  }
  0xef   : > { %5100 = vmatmul.mubr.msk.bf16.gmra.mrb[68].mxu0 %vm2147_vm2, %v5388_v12  ;;  %5228 = vmatmul.mubr.msk.bf16.gmra.mrb[68].mxu1 %vm2147_vm2, %v5389_v13 }
  0xf0   : > { %5103 = vmatprep.mubr.msk.bf16.mxu0 %vm2147_vm2, %v5390_v14  ;;  %5231 = vmatprep.mubr.msk.bf16.mxu1 %vm2147_vm2, %v5391_v15 }
  0xf7   : > { %5104 = vmatmul.mubr.msk.bf16.gmra.mrb[72].mxu0 %vm2147_vm2, %v5392_v16  ;;  %5232 = vmatmul.mubr.msk.bf16.gmra.mrb[72].mxu1 %vm2147_vm2, %v5393_v17  ;;  %v5436_v16 = vld [vmem:[%s5794_s6 + $0x1d8] sm:$0xff]  }
  0xf8   : > { %5107 = vmatprep.mubr.msk.bf16.mxu0 %vm2147_vm2, %v5394_v18  ;;  %5235 = vmatprep.mubr.msk.bf16.mxu1 %vm2147_vm2, %v5395_v19  ;;  %v5437_v17 = vld [vmem:[%s5794_s6 + $0x3d8] sm:$0xff]  }
  0xff   : > { %5108 = vmatmul.mubr.msk.bf16.gmra.mrb[76].mxu0 %vm2147_vm2, %v5396_v20  ;;  %5236 = vmatmul.mubr.msk.bf16.gmra.mrb[76].mxu1 %vm2147_vm2, %v5397_v21  ;;  %v5438_v20 = vld [vmem:[%s5794_s6 + $0x1e0] sm:$0xff]  }
 0x100   : > { %5111 = vmatprep.mubr.msk.bf16.mxu0 %vm2147_vm2, %v5398_v22  ;;  %5239 = vmatprep.mubr.msk.bf16.mxu1 %vm2147_vm2, %v5399_v23  ;;  %v5439_v21 = vld [vmem:[%s5794_s6 + $0x3e0] sm:$0xff]  }
 0x107   : > { %5112 = vmatmul.mubr.msk.bf16.gmra.mrb[80].mxu0 %vm2147_vm2, %v5400_v24  ;;  %5240 = vmatmul.mubr.msk.bf16.gmra.mrb[80].mxu1 %vm2147_vm2, %v5401_v25 }
 0x108   : > { %5115 = vmatprep.mubr.msk.bf16.mxu0 %vm2147_vm2, %v5402_v26  ;;  %5243 = vmatprep.mubr.msk.bf16.mxu1 %vm2147_vm2, %v5403_v27 }
 0x10f   : > { %5116 = vmatmul.mubr.msk.bf16.gmra.mrb[84].mxu0 %vm2147_vm2, %v5404_v28  ;;  %5244 = vmatmul.mubr.msk.bf16.gmra.mrb[84].mxu1 %vm2147_vm2, %v5405_v29  ;;  %v5440_v28 = vld [vmem:[%s5794_s6 + $0x1e8] sm:$0xff]  }
 0x110   : > { %5119 = vmatprep.mubr.msk.bf16.mxu0 %vm2147_vm2, %v5406_v30  ;;  %5247 = vmatprep.mubr.msk.bf16.mxu1 %vm2147_vm2, %v5407_v31  ;;  %v5441_v29 = vld [vmem:[%s5794_s6 + $0x3e8] sm:$0xff]  }
 0x117   : > { %5120 = vmatmul.mubr.msk.bf16.gmra.mrb[88].mxu0 %vm2147_vm2, %v5408_v32  ;;  %5248 = vmatmul.mubr.msk.bf16.gmra.mrb[88].mxu1 %vm2147_vm2, %v5409_v33  ;;  %v5442_v32 = vld [vmem:[%s5794_s6 + $0x1f0] sm:$0xff]  }
 0x118   : > { %5123 = vmatprep.mubr.msk.bf16.mxu0 %vm2147_vm2, %v5410_v34  ;;  %5251 = vmatprep.mubr.msk.bf16.mxu1 %vm2147_vm2, %v5411_v35  ;;  %v5443_v33 = vld [vmem:[%s5794_s6 + $0x3f0] sm:$0xff]  }
 0x11f   : > { %5124 = vmatmul.mubr.msk.bf16.gmra.mrb[92].mxu0 %vm2147_vm2, %v5412_v36  ;;  %5252 = vmatmul.mubr.msk.bf16.gmra.mrb[92].mxu1 %vm2147_vm2, %v5413_v37 }
 0x120   : > { %5127 = vmatprep.mubr.msk.bf16.mxu0 %vm2147_vm2, %v5414_v38  ;;  %5255 = vmatprep.mubr.msk.bf16.mxu1 %vm2147_vm2, %v5415_v39 }
 0x127   : > { %5128 = vmatmul.mubr.msk.bf16.gmra.mrb[96].mxu0 %vm2147_vm2, %v5416_v40  ;;  %5256 = vmatmul.mubr.msk.bf16.gmra.mrb[96].mxu1 %vm2147_vm2, %v5417_v41  ;;  %v5444_v40 = vld [vmem:[%s5794_s6 + $0x1f8] sm:$0xff]  }
 0x128   : > { %5131 = vmatprep.mubr.msk.bf16.mxu0 %vm2147_vm2, %v5418_v42  ;;  %5259 = vmatprep.mubr.msk.bf16.mxu1 %vm2147_vm2, %v5419_v43  ;;  %v5445_v41 = vld [vmem:[%s5794_s6 + $0x3f8] sm:$0xff]  }
 0x12f   : > { %5132 = vmatmul.mubr.msk.bf16.gmra.mrb[100].mxu0 %vm2147_vm2, %v5420_v44  ;;  %5260 = vmatmul.mubr.msk.bf16.gmra.mrb[100].mxu1 %vm2147_vm2, %v5421_v45 }
 0x130   : > { %5135 = vmatprep.mubr.msk.bf16.mxu0 %vm2147_vm2, %v5422_v46  ;;  %5263 = vmatprep.mubr.msk.bf16.mxu1 %vm2147_vm2, %v5423_v47 }
 0x137   : > { %5136 = vmatmul.mubr.msk.bf16.gmra.mrb[104].mxu0 %vm2147_vm2, %v5424_v48  ;;  %5264 = vmatmul.mubr.msk.bf16.gmra.mrb[104].mxu1 %vm2147_vm2, %v5425_v49 }
 0x138   : > { %5139 = vmatprep.mubr.msk.bf16.mxu0 %vm2147_vm2, %v5426_v50  ;;  %5267 = vmatprep.mubr.msk.bf16.mxu1 %vm2147_vm2, %v5427_v51 }
 0x13a   : > { %v6016_v52 = vpop.f32.mrb[0].mxu0  ;;  %v6018_v53 = vpop.f32.mrb[0].mxu1 }
 0x13b   : > { %v6020_v54 = vpop.f32.mrb[1].mxu0  ;;  %v6022_v55 = vpop.f32.mrb[1].mxu1 }
 0x13c   : > { %v6026_v58 = vpop.f32.mrb[2].mxu0  ;;  %v6028_v59 = vpop.f32.mrb[2].mxu1 }
 0x13d   : > { %v6032_v62 = vpop.f32.mrb[3].mxu0  ;;  %v6034_v63 = vpop.f32.mrb[3].mxu1 }
 0x13f   : > { %5140 = vmatmul.mubr.msk.bf16.gmra.mrb[108].mxu0 %vm2147_vm2, %v5428_v56  ;;  %5268 = vmatmul.mubr.msk.bf16.gmra.mrb[108].mxu1 %vm2147_vm2, %v5429_v57 }
 0x140   : > { %5143 = vmatprep.mubr.msk.bf16.mxu0 %vm2147_vm2, %v5430_v60  ;;  %5271 = vmatprep.mubr.msk.bf16.mxu1 %vm2147_vm2, %v5431_v61 }
 0x142   : > { %v6040_v0 = vpop.f32.mrb[4].mxu0  ;;  %v6042_v1 = vpop.f32.mrb[4].mxu1 }
 0x143   : > { %v6044_v2 = vpop.f32.mrb[5].mxu0  ;;  %v6046_v3 = vpop.f32.mrb[5].mxu1 }
 0x144   : > { %v6050_v6 = vpop.f32.mrb[6].mxu0  ;;  %v6052_v7 = vpop.f32.mrb[6].mxu1 }
 0x145   : > { %v6056_v10 = vpop.f32.mrb[7].mxu0  ;;  %v6058_v11 = vpop.f32.mrb[7].mxu1 }
 0x147   : > { %5144 = vmatmul.mubr.msk.bf16.gmra.mrb[112].mxu0 %vm2147_vm2, %v5432_v4  ;;  %5272 = vmatmul.mubr.msk.bf16.gmra.mrb[112].mxu1 %vm2147_vm2, %v5433_v5 }
 0x148   : > { %5147 = vmatprep.mubr.msk.bf16.mxu0 %vm2147_vm2, %v5434_v8  ;;  %5275 = vmatprep.mubr.msk.bf16.mxu1 %vm2147_vm2, %v5435_v9 }
 0x14a   : > { %v6064_v12 = vpop.f32.mrb[8].mxu0  ;;  %v6066_v13 = vpop.f32.mrb[8].mxu1 }
 0x14b   : > { %v6068_v14 = vpop.f32.mrb[9].mxu0  ;;  %v6070_v15 = vpop.f32.mrb[9].mxu1 }
 0x14c   : > { %v6074_v18 = vpop.f32.mrb[10].mxu0  ;;  %v6076_v19 = vpop.f32.mrb[10].mxu1 }
 0x14d   : > { %v6080_v22 = vpop.f32.mrb[11].mxu0  ;;  %v6082_v23 = vpop.f32.mrb[11].mxu1 }
 0x14f   : > { %5148 = vmatmul.mubr.msk.bf16.gmra.mrb[116].mxu0 %vm2147_vm2, %v5436_v16  ;;  %5276 = vmatmul.mubr.msk.bf16.gmra.mrb[116].mxu1 %vm2147_vm2, %v5437_v17 }
 0x150   : > { %5151 = vmatprep.mubr.msk.bf16.mxu0 %vm2147_vm2, %v5438_v20  ;;  %5279 = vmatprep.mubr.msk.bf16.mxu1 %vm2147_vm2, %v5439_v21 }
 0x152   : > { %v6088_v24 = vpop.f32.mrb[12].mxu0  ;;  %v6090_v25 = vpop.f32.mrb[12].mxu1 }
 0x153   : > { %v6092_v26 = vpop.f32.mrb[13].mxu0  ;;  %v6094_v27 = vpop.f32.mrb[13].mxu1 }
 0x154   : > { %v6098_v30 = vpop.f32.mrb[14].mxu0  ;;  %v6100_v31 = vpop.f32.mrb[14].mxu1 }
 0x155   : > { %v6104_v34 = vpop.f32.mrb[15].mxu0  ;;  %v6106_v35 = vpop.f32.mrb[15].mxu1 }
 0x157   : > { %5152 = vmatmul.mubr.msk.bf16.gmra.mrb[120].mxu0 %vm2147_vm2, %v5440_v28  ;;  %5280 = vmatmul.mubr.msk.bf16.gmra.mrb[120].mxu1 %vm2147_vm2, %v5441_v29 }
 0x158   : > { %5155 = vmatprep.mubr.msk.bf16.mxu0 %vm2147_vm2, %v5442_v32  ;;  %5283 = vmatprep.mubr.msk.bf16.mxu1 %vm2147_vm2, %v5443_v33 }
 0x15a   : > { %v6112_v36 = vpop.f32.mrb[16].mxu0  ;;  %v6114_v37 = vpop.f32.mrb[16].mxu1 }
 0x15b   : > { %v6116_v38 = vpop.f32.mrb[17].mxu0  ;;  %v6118_v39 = vpop.f32.mrb[17].mxu1 }
 0x15c   : > { %v6122_v42 = vpop.f32.mrb[18].mxu0  ;;  %v6124_v43 = vpop.f32.mrb[18].mxu1 }
 0x15d   : > { %v6126_v44 = vpop.f32.mrb[19].mxu0  ;;  %v6128_v45 = vpop.f32.mrb[19].mxu1 }
 0x15f   : > { %5156 = vmatmul.mubr.msk.bf16.gmra.mrb[124].mxu0 %vm2147_vm2, %v5444_v40  ;;  %5284 = vmatmul.mubr.msk.bf16.gmra.mrb[124].mxu1 %vm2147_vm2, %v5445_v41 }
 0x162   : > { %v6132_v46 = vpop.f32.mrb[20].mxu0  ;;  %v6134_v47 = vpop.f32.mrb[20].mxu1 }
 0x163   : > { %v6136_v48 = vpop.f32.mrb[21].mxu0  ;;  %v6138_v49 = vpop.f32.mrb[21].mxu1 }
 0x164   : > { %v6140_v50 = vpop.f32.mrb[22].mxu0  ;;  %v6142_v51 = vpop.f32.mrb[22].mxu1 }
 0x165   : > { %v6144_v56 = vpop.f32.mrb[23].mxu0  ;;  %v6146_v57 = vpop.f32.mrb[23].mxu1 }
 0x16a   : > { %v6148_v60 = vpop.f32.mrb[24].mxu0  ;;  %v6150_v61 = vpop.f32.mrb[24].mxu1 }
 0x16b   : > { %6559 = vst [vmem:[#allocation3_spill] sm:$0xff] %v6150_v61  ;;  %v6152_v4 = vpop.f32.mrb[25].mxu0  ;;  %v6154_v5 = vpop.f32.mrb[25].mxu1 }
 0x16c   : > { %6560 = vst [vmem:[#allocation4_spill] sm:$0xff] %v6152_v4  ;;  %6561 = vst [vmem:[#allocation5_spill] sm:$0xff] %v6154_v5  ;;  %v6156_v8 = vpop.f32.mrb[26].mxu0  ;;  %v6158_v9 = vpop.f32.mrb[26].mxu1 }
 0x16d   : > { %6562 = vst [vmem:[#allocation6_spill] sm:$0xff] %v6156_v8  ;;  %6563 = vst [vmem:[#allocation7_spill] sm:$0xff] %v6158_v9  ;;  %v6160_v16 = vpop.f32.mrb[27].mxu0  ;;  %v6162_v17 = vpop.f32.mrb[27].mxu1 }
 0x16e   : > { %6564 = vst [vmem:[#allocation8_spill] sm:$0xff] %v6160_v16  ;;  %6565 = vst [vmem:[#allocation9_spill] sm:$0xff] %v6162_v17 }
 0x172   : > { %v6164_v20 = vpop.f32.mrb[28].mxu0  ;;  %v6166_v21 = vpop.f32.mrb[28].mxu1 }
 0x173   : > { %6566 = vst [vmem:[#allocation10_spill] sm:$0xff] %v6164_v20  ;;  %6567 = vst [vmem:[#allocation11_spill] sm:$0xff] %v6166_v21  ;;  %v6168_v28 = vpop.f32.mrb[29].mxu0  ;;  %v6170_v29 = vpop.f32.mrb[29].mxu1 }
 0x174   : > { %6568 = vst [vmem:[#allocation12_spill] sm:$0xff] %v6168_v28  ;;  %6569 = vst [vmem:[#allocation13_spill] sm:$0xff] %v6170_v29  ;;  %v6172_v32 = vpop.f32.mrb[30].mxu0  ;;  %v6174_v33 = vpop.f32.mrb[30].mxu1 }
 0x175   : > { %6570 = vst [vmem:[#allocation14_spill] sm:$0xff] %v6172_v32  ;;  %6571 = vst [vmem:[#allocation15_spill] sm:$0xff] %v6174_v33  ;;  %v6176_v40 = vpop.f32.mrb[31].mxu0  ;;  %v6178_v41 = vpop.f32.mrb[31].mxu1 }
 0x176   : > { %6572 = vst [vmem:[#allocation16_spill] sm:$0xff] %v6176_v40  ;;  %6573 = vst [vmem:[#allocation17_spill] sm:$0xff] %v6178_v41 }
 0x17a   : > { %v6180_v9 = vpop.f32.mrb[32].mxu0  ;;  %v6182_v16 = vpop.f32.mrb[32].mxu1 }
 0x17b   : > { %6574 = vst [vmem:[#allocation18_spill] sm:$0xff] %v6180_v9  ;;  %6575 = vst [vmem:[#allocation19_spill] sm:$0xff] %v6182_v16  ;;  %v6184_v17 = vpop.f32.mrb[33].mxu0  ;;  %v6186_v20 = vpop.f32.mrb[33].mxu1 }
 0x17c   : > { %6576 = vst [vmem:[#allocation20_spill] sm:$0xff] %v6184_v17  ;;  %6577 = vst [vmem:[#allocation21_spill] sm:$0xff] %v6186_v20  ;;  %v6188_v21 = vpop.f32.mrb[34].mxu0  ;;  %v6190_v28 = vpop.f32.mrb[34].mxu1 }
 0x17d   : > { %6578 = vst [vmem:[#allocation22_spill] sm:$0xff] %v6188_v21  ;;  %6579 = vst [vmem:[#allocation23_spill] sm:$0xff] %v6190_v28  ;;  %v6192_v29 = vpop.f32.mrb[35].mxu0  ;;  %v6194_v32 = vpop.f32.mrb[35].mxu1 }
 0x17e   : > { %6580 = vst [vmem:[#allocation24_spill] sm:$0xff] %v6192_v29  ;;  %6581 = vst [vmem:[#allocation25_spill] sm:$0xff] %v6194_v32 }
 0x182   : > { %v6196_v33 = vpop.f32.mrb[36].mxu0  ;;  %v6198_v40 = vpop.f32.mrb[36].mxu1 }
 0x183   : > { %6582 = vst [vmem:[#allocation26_spill] sm:$0xff] %v6196_v33  ;;  %6583 = vst [vmem:[#allocation27_spill] sm:$0xff] %v6198_v40  ;;  %v6200_v41 = vpop.f32.mrb[37].mxu0  ;;  %v6202_v9 = vpop.f32.mrb[37].mxu1 }
 0x184   : > { %6584 = vst [vmem:[#allocation28_spill] sm:$0xff] %v6200_v41  ;;  %6585 = vst [vmem:[#allocation29_spill] sm:$0xff] %v6202_v9  ;;  %v6204_v16 = vpop.f32.mrb[38].mxu0  ;;  %v6206_v17 = vpop.f32.mrb[38].mxu1 }
 0x185   : > { %6586 = vst [vmem:[#allocation30_spill] sm:$0xff] %v6204_v16  ;;  %6587 = vst [vmem:[#allocation31_spill] sm:$0xff] %v6206_v17  ;;  %v6208_v20 = vpop.f32.mrb[39].mxu0  ;;  %v6210_v21 = vpop.f32.mrb[39].mxu1 }
 0x186   : > { %6588 = vst [vmem:[#allocation32_spill] sm:$0xff] %v6208_v20  ;;  %6589 = vst [vmem:[#allocation33_spill] sm:$0xff] %v6210_v21 }
 0x18a   : > { %v6212_v28 = vpop.f32.mrb[40].mxu0  ;;  %v6214_v29 = vpop.f32.mrb[40].mxu1 }
 0x18b   : > { %6590 = vst [vmem:[#allocation34_spill] sm:$0xff] %v6212_v28  ;;  %6591 = vst [vmem:[#allocation35_spill] sm:$0xff] %v6214_v29  ;;  %v6216_v32 = vpop.f32.mrb[41].mxu0  ;;  %v6218_v33 = vpop.f32.mrb[41].mxu1 }
 0x18c   : > { %6592 = vst [vmem:[#allocation36_spill] sm:$0xff] %v6216_v32  ;;  %6593 = vst [vmem:[#allocation37_spill] sm:$0xff] %v6218_v33  ;;  %v6220_v40 = vpop.f32.mrb[42].mxu0  ;;  %v6222_v41 = vpop.f32.mrb[42].mxu1 }
 0x18d   : > { %6594 = vst [vmem:[#allocation38_spill] sm:$0xff] %v6220_v40  ;;  %6595 = vst [vmem:[#allocation39_spill] sm:$0xff] %v6222_v41  ;;  %v6224_v9 = vpop.f32.mrb[43].mxu0  ;;  %v6226_v16 = vpop.f32.mrb[43].mxu1 }
 0x18e   : > { %6596 = vst [vmem:[#allocation40_spill] sm:$0xff] %v6224_v9  ;;  %6597 = vst [vmem:[#allocation41_spill] sm:$0xff] %v6226_v16 }
 0x192   : > { %v6228_v17 = vpop.f32.mrb[44].mxu0  ;;  %v6230_v20 = vpop.f32.mrb[44].mxu1 }
 0x193   : > { %6598 = vst [vmem:[#allocation42_spill] sm:$0xff] %v6228_v17  ;;  %6599 = vst [vmem:[#allocation43_spill] sm:$0xff] %v6230_v20  ;;  %v6232_v21 = vpop.f32.mrb[45].mxu0  ;;  %v6234_v28 = vpop.f32.mrb[45].mxu1 }
 0x194   : > { %6600 = vst [vmem:[#allocation44_spill] sm:$0xff] %v6232_v21  ;;  %6601 = vst [vmem:[#allocation45_spill] sm:$0xff] %v6234_v28  ;;  %v6236_v29 = vpop.f32.mrb[46].mxu0  ;;  %v6238_v32 = vpop.f32.mrb[46].mxu1 }
 0x195   : > { %6602 = vst [vmem:[#allocation46_spill] sm:$0xff] %v6236_v29  ;;  %6603 = vst [vmem:[#allocation47_spill] sm:$0xff] %v6238_v32  ;;  %v6240_v33 = vpop.f32.mrb[47].mxu0  ;;  %v6242_v40 = vpop.f32.mrb[47].mxu1 }
 0x196   : > { %6604 = vst [vmem:[#allocation48_spill] sm:$0xff] %v6240_v33  ;;  %6605 = vst [vmem:[#allocation49_spill] sm:$0xff] %v6242_v40 }
 0x19a   : > { %v6244_v41 = vpop.f32.mrb[48].mxu0  ;;  %v6246_v9 = vpop.f32.mrb[48].mxu1 }
 0x19b   : > { %6606 = vst [vmem:[#allocation50_spill] sm:$0xff] %v6244_v41  ;;  %6607 = vst [vmem:[#allocation51_spill] sm:$0xff] %v6246_v9  ;;  %v6248_v16 = vpop.f32.mrb[49].mxu0  ;;  %v6250_v17 = vpop.f32.mrb[49].mxu1 }
 0x19c   : > { %6608 = vst [vmem:[#allocation52_spill] sm:$0xff] %v6248_v16  ;;  %6609 = vst [vmem:[#allocation53_spill] sm:$0xff] %v6250_v17  ;;  %v6252_v20 = vpop.f32.mrb[50].mxu0  ;;  %v6254_v21 = vpop.f32.mrb[50].mxu1 }
 0x19d   : > { %6610 = vst [vmem:[#allocation54_spill] sm:$0xff] %v6252_v20  ;;  %6611 = vst [vmem:[#allocation55_spill] sm:$0xff] %v6254_v21  ;;  %v6256_v28 = vpop.f32.mrb[51].mxu0  ;;  %v6258_v29 = vpop.f32.mrb[51].mxu1 }
 0x19e   : > { %6612 = vst [vmem:[#allocation56_spill] sm:$0xff] %v6256_v28  ;;  %6613 = vst [vmem:[#allocation57_spill] sm:$0xff] %v6258_v29 }
 0x1a2   : > { %v6260_v32 = vpop.f32.mrb[52].mxu0  ;;  %v6262_v33 = vpop.f32.mrb[52].mxu1 }
 0x1a3   : > { %6614 = vst [vmem:[#allocation58_spill] sm:$0xff] %v6260_v32  ;;  %6615 = vst [vmem:[#allocation59_spill] sm:$0xff] %v6262_v33  ;;  %v6264_v40 = vpop.f32.mrb[53].mxu0  ;;  %v6266_v41 = vpop.f32.mrb[53].mxu1 }
 0x1a4   : > { %6616 = vst [vmem:[#allocation60_spill] sm:$0xff] %v6264_v40  ;;  %6617 = vst [vmem:[#allocation61_spill] sm:$0xff] %v6266_v41  ;;  %v6268_v9 = vpop.f32.mrb[54].mxu0  ;;  %v6270_v16 = vpop.f32.mrb[54].mxu1 }
 0x1a5   : > { %6618 = vst [vmem:[#allocation62_spill] sm:$0xff] %v6268_v9  ;;  %6619 = vst [vmem:[#allocation63_spill] sm:$0xff] %v6270_v16  ;;  %v6272_v17 = vpop.f32.mrb[55].mxu0  ;;  %v6274_v20 = vpop.f32.mrb[55].mxu1 }
 0x1a6   : > { %6620 = vst [vmem:[#allocation64_spill] sm:$0xff] %v6272_v17  ;;  %6621 = vst [vmem:[#allocation65_spill] sm:$0xff] %v6274_v20 }
 0x1aa   : > { %v6276_v21 = vpop.f32.mrb[56].mxu0  ;;  %v6278_v29 = vpop.f32.mrb[56].mxu1 }
 0x1ab   : > { %6622 = vst [vmem:[#allocation66_spill] sm:$0xff] %v6276_v21  ;;  %6623 = vst [vmem:[#allocation67_spill] sm:$0xff] %v6278_v29  ;;  %v6280_v32 = vpop.f32.mrb[57].mxu0  ;;  %v6282_v33 = vpop.f32.mrb[57].mxu1 }
 0x1ac   : > { %6624 = vst [vmem:[#allocation68_spill] sm:$0xff] %v6280_v32  ;;  %6625 = vst [vmem:[#allocation69_spill] sm:$0xff] %v6282_v33  ;;  %v6284_v40 = vpop.f32.mrb[58].mxu0  ;;  %v6286_v41 = vpop.f32.mrb[58].mxu1 }
 0x1ad   : > { %6626 = vst [vmem:[#allocation70_spill] sm:$0xff] %v6284_v40  ;;  %6627 = vst [vmem:[#allocation71_spill] sm:$0xff] %v6286_v41  ;;  %v6288_v9 = vpop.f32.mrb[59].mxu0  ;;  %v6290_v16 = vpop.f32.mrb[59].mxu1 }
 0x1ae   : > { %6628 = vst [vmem:[#allocation72_spill] sm:$0xff] %v6288_v9  ;;  %6629 = vst [vmem:[#allocation73_spill] sm:$0xff] %v6290_v16 }
 0x1b2   : > { %v6292_v17 = vpop.f32.mrb[60].mxu0  ;;  %v6294_v20 = vpop.f32.mrb[60].mxu1 }
 0x1b3   : > { %6630 = vst [vmem:[#allocation74_spill] sm:$0xff] %v6292_v17  ;;  %6631 = vst [vmem:[#allocation75_spill] sm:$0xff] %v6294_v20  ;;  %v6296_v21 = vpop.f32.mrb[61].mxu0  ;;  %v6298_v28 = vpop.f32.mrb[61].mxu1 }
 0x1b4   : > { %6632 = vst [vmem:[#allocation76_spill] sm:$0xff] %v6296_v21  ;;  %6633 = vst [vmem:[#allocation77_spill] sm:$0xff] %v6298_v28  ;;  %v6300_v29 = vpop.f32.mrb[62].mxu0  ;;  %v6302_v32 = vpop.f32.mrb[62].mxu1 }
 0x1b5   : > { %6634 = vst [vmem:[#allocation78_spill] sm:$0xff] %v6300_v29  ;;  %6635 = vst [vmem:[#allocation79_spill] sm:$0xff] %v6302_v32  ;;  %v6304_v33 = vpop.f32.mrb[63].mxu0  ;;  %v6306_v40 = vpop.f32.mrb[63].mxu1  ;;  %v6315_v29 = vld [vmem:[%s6557_s2] ss:$0 sm:$0xff] }
 0x1b6   : > { %6636 = vst [vmem:[#allocation80_spill] sm:$0xff] %v6304_v33  ;;  %6637 = vst [vmem:[#allocation81_spill] sm:$0xff] %v6306_v40 }
 0x1ba   : > { %v5097_v16 = vpop.f32.mrb[64].mxu0  ;;  %v5225_v9 = vpop.f32.mrb[64].mxu1 }
 0x1bb   : > { %v3598_v17 = vmax.f32 %v6016_v52, %v5097_v16  ;;  %v3662_v20 = vmax.f32 %v6018_v53, %v5225_v9  ;;  %v2829_v21 = vpop.f32.mrb[65].mxu0  ;;  %v3341_v41 = vpop.f32.mrb[65].mxu1 }
 0x1bc   : > { %v3596_v33 = vmax.f32 %v6020_v54, %v2829_v21  ;;  %v3660_v40 = vmax.f32 %v6022_v55, %v3341_v41  ;;  %v5098_v32 = vpop.f32.mrb[66].mxu0  ;;  %v5226_v28 = vpop.f32.mrb[66].mxu1 }
 0x1bd   : > { %v3726_v8 = vmax.f32 %v3598_v17, %v3662_v20  ;;  %v3599_v5 = vmax.f32 %v6026_v58, %v5098_v32  ;;  %v3663_v52 = vmax.f32 %v6028_v59, %v5226_v28  ;;  %v2832_v53 = vpop.f32.mrb[67].mxu0  ;;  %v3344_v9 = vpop.f32.mrb[67].mxu1 }
 0x1be   : > { %v3724_v16 = vmax.f32 %v3596_v33, %v3660_v40  ;;  %v3597_v4 = vmax.f32 %v6032_v62, %v2832_v53  ;;  %v3661_v61 = vmax.f32 %v6034_v63, %v3344_v9 }
 0x1bf   : > { %v3797_v54 = vadd.f32 %v6315_v29, %v3726_v8  ;;  %v3727_v21 = vmax.f32 %v3599_v5, %v3663_v52 }
 0x1c0   : > { %v3795_v55 = vadd.f32 %v6315_v29, %v3724_v16  ;;  %v3725_v41 = vmax.f32 %v3597_v4, %v3661_v61 }
 0x1c1   : > { %v3798_v58 = vadd.f32 %v6315_v29, %v3727_v21  ;;  %v3861_v28 = vmax.f32 %v3797_v54, 0.0 }
 0x1c2   : > { %v3796_v17 = vadd.f32 %v6315_v29, %v3725_v41  ;;  %v5101_v20 = vpop.f32.mrb[68].mxu0  ;;  %v5229_v59 = vpop.f32.mrb[68].mxu1  ;;  %v3859_v8 = vmax.f32 %v3795_v55, 0.0 }
 0x1c3   : > { %v3862_v32 = vmax.f32 %v3798_v58, 0.0  ;;  %v3602_v33 = vmax.f32 %v6040_v0, %v5101_v20  ;;  %v3666_v62 = vmax.f32 %v6042_v1, %v5229_v59  ;;  %v2845_v63 = vpop.f32.mrb[69].mxu0  ;;  %v3357_v40 = vpop.f32.mrb[69].mxu1 }
 0x1c4   : > { %v3860_v61 = vmax.f32 %v3796_v17, 0.0  ;;  %v3600_v4 = vmax.f32 %v6044_v2, %v2845_v63  ;;  %v3664_v5 = vmax.f32 %v6046_v3, %v3357_v40  ;;  %v5102_v52 = vpop.f32.mrb[70].mxu0  ;;  %v5230_v53 = vpop.f32.mrb[70].mxu1 }
 0x1c5   : > { %v4714_v0 = vpack.c.bf16 %v3862_v32, %v3861_v28  ;;  %v3730_v9 = vmax.f32 %v3602_v33, %v3666_v62  ;;  %v3603_v1 = vmax.f32 %v6050_v6, %v5102_v52  ;;  %v3667_v16 = vmax.f32 %v6052_v7, %v5230_v53  ;;  %v2848_v54 = vpop.f32.mrb[71].mxu0  ;;  %v3360_v21 = vpop.f32.mrb[71].mxu1 }
 0x1c6   : > { %v4709_v55 = vpack.c.bf16 %v3860_v61, %v3859_v8  ;;  %v3728_v41 = vmax.f32 %v3600_v4, %v3664_v5  ;;  %v3601_v58 = vmax.f32 %v6056_v10, %v2848_v54  ;;  %v3665_v17 = vmax.f32 %v6058_v11, %v3360_v21 }
 0x1c7   : > { %4866 = vst [vmem:[%s6333_s14 + $0x8] sm:$0xff] %v4714_v0   ;;  %v3801_v2 = vadd.f32 %v6315_v29, %v3730_v9  ;;  %v3731_v3 = vmax.f32 %v3603_v1, %v3667_v16 }
 0x1c8   : > { %4710 = vst [vmem:[%s6333_s14] sm:$0xff] %v4709_v55   ;;  %v3799_v20 = vadd.f32 %v6315_v29, %v3728_v41  ;;  %v3729_v59 = vmax.f32 %v3601_v58, %v3665_v17 }
 0x1c9   : > { %v3802_v6 = vadd.f32 %v6315_v29, %v3731_v3  ;;  %v3865_v33 = vmax.f32 %v3801_v2, 0.0 }
 0x1ca   : > { %v3800_v7 = vadd.f32 %v6315_v29, %v3729_v59  ;;  %v5105_v28 = vpop.f32.mrb[72].mxu0  ;;  %v5233_v32 = vpop.f32.mrb[72].mxu1  ;;  %v3863_v8 = vmax.f32 %v3799_v20, 0.0 }
 0x1cb   : > { %v3866_v62 = vmax.f32 %v3802_v6, 0.0  ;;  %v3606_v10 = vmax.f32 %v6064_v12, %v5105_v28  ;;  %v3670_v11 = vmax.f32 %v6066_v13, %v5233_v32  ;;  %v2861_v63 = vpop.f32.mrb[73].mxu0  ;;  %v3373_v40 = vpop.f32.mrb[73].mxu1 }
 0x1cc   : > { %v3864_v61 = vmax.f32 %v3800_v7, 0.0  ;;  %v3604_v4 = vmax.f32 %v6068_v14, %v2861_v63  ;;  %v3668_v5 = vmax.f32 %v6070_v15, %v3373_v40  ;;  %v5106_v52 = vpop.f32.mrb[74].mxu0  ;;  %v5234_v53 = vpop.f32.mrb[74].mxu1 }
 0x1cd   : > { %v4724_v0 = vpack.c.bf16 %v3866_v62, %v3865_v33  ;;  %v3734_v9 = vmax.f32 %v3606_v10, %v3670_v11  ;;  %v3607_v1 = vmax.f32 %v6074_v18, %v5106_v52  ;;  %v3671_v12 = vmax.f32 %v6076_v19, %v5234_v53  ;;  %v2864_v16 = vpop.f32.mrb[75].mxu0  ;;  %v3376_v13 = vpop.f32.mrb[75].mxu1 }
 0x1ce   : > { %v4719_v54 = vpack.c.bf16 %v3864_v61, %v3863_v8  ;;  %v3732_v21 = vmax.f32 %v3604_v4, %v3668_v5  ;;  %v3605_v55 = vmax.f32 %v6080_v22, %v2864_v16  ;;  %v3669_v41 = vmax.f32 %v6082_v23, %v3376_v13 }
 0x1cf   : > { %4868 = vst [vmem:[%s6333_s14 + $0x18] sm:$0xff] %v4724_v0   ;;  %v3805_v14 = vadd.f32 %v6315_v29, %v3734_v9  ;;  %v3735_v15 = vmax.f32 %v3607_v1, %v3671_v12 }
 0x1d0   : > { %4867 = vst [vmem:[%s6333_s14 + $0x10] sm:$0xff] %v4719_v54   ;;  %v3803_v58 = vadd.f32 %v6315_v29, %v3732_v21  ;;  %v3733_v17 = vmax.f32 %v3605_v55, %v3669_v41 }
 0x1d1   : > { %v3806_v18 = vadd.f32 %v6315_v29, %v3735_v15  ;;  %v3869_v20 = vmax.f32 %v3805_v14, 0.0 }
 0x1d2   : > { %v3804_v19 = vadd.f32 %v6315_v29, %v3733_v17  ;;  %v5109_v2 = vpop.f32.mrb[76].mxu0  ;;  %v5237_v3 = vpop.f32.mrb[76].mxu1  ;;  %v3867_v28 = vmax.f32 %v3803_v58, 0.0 }
 0x1d3   : > { %v3870_v59 = vmax.f32 %v3806_v18, 0.0  ;;  %v3610_v22 = vmax.f32 %v6088_v24, %v5109_v2  ;;  %v3674_v23 = vmax.f32 %v6090_v25, %v5237_v3  ;;  %v2877_v6 = vpop.f32.mrb[77].mxu0  ;;  %v3389_v7 = vpop.f32.mrb[77].mxu1 }
 0x1d4   : > { %v3868_v32 = vmax.f32 %v3804_v19, 0.0  ;;  %v3608_v33 = vmax.f32 %v6092_v26, %v2877_v6  ;;  %v3672_v62 = vmax.f32 %v6094_v27, %v3389_v7  ;;  %v5110_v10 = vpop.f32.mrb[78].mxu0  ;;  %v5238_v11 = vpop.f32.mrb[78].mxu1 }
 0x1d5   : > { %v4734_v63 = vpack.c.bf16 %v3870_v59, %v3869_v20  ;;  %v3738_v40 = vmax.f32 %v3610_v22, %v3674_v23  ;;  %v3611_v8 = vmax.f32 %v6098_v30, %v5110_v10  ;;  %v3675_v24 = vmax.f32 %v6100_v31, %v5238_v11  ;;  %v2880_v61 = vpop.f32.mrb[79].mxu0  ;;  %v3392_v25 = vpop.f32.mrb[79].mxu1 }
 0x1d6   : > { %v4729_v4 = vpack.c.bf16 %v3868_v32, %v3867_v28  ;;  %v3736_v5 = vmax.f32 %v3608_v33, %v3672_v62  ;;  %v3609_v52 = vmax.f32 %v6104_v34, %v2880_v61  ;;  %v3673_v53 = vmax.f32 %v6106_v35, %v3392_v25 }
 0x1d7   : > { %4870 = vst [vmem:[%s6333_s14 + $0x28] sm:$0xff] %v4734_v63   ;;  %v3809_v26 = vadd.f32 %v6315_v29, %v3738_v40  ;;  %v3739_v27 = vmax.f32 %v3611_v8, %v3675_v24 }
 0x1d8   : > { %4869 = vst [vmem:[%s6333_s14 + $0x20] sm:$0xff] %v4729_v4   ;;  %v3807_v0 = vadd.f32 %v6315_v29, %v3736_v5  ;;  %v3737_v9 = vmax.f32 %v3609_v52, %v3673_v53 }
 0x1d9   : > { %v3810_v30 = vadd.f32 %v6315_v29, %v3739_v27  ;;  %v3873_v16 = vmax.f32 %v3809_v26, 0.0 }
 0x1da   : > { %v3808_v31 = vadd.f32 %v6315_v29, %v3737_v9  ;;  %v5113_v1 = vpop.f32.mrb[80].mxu0  ;;  %v5241_v12 = vpop.f32.mrb[80].mxu1  ;;  %v3871_v55 = vmax.f32 %v3807_v0, 0.0 }
 0x1db   : > { %v3874_v13 = vmax.f32 %v3810_v30, 0.0  ;;  %v3614_v34 = vmax.f32 %v6112_v36, %v5113_v1  ;;  %v3678_v35 = vmax.f32 %v6114_v37, %v5241_v12  ;;  %v2893_v54 = vpop.f32.mrb[81].mxu0  ;;  %v3405_v21 = vpop.f32.mrb[81].mxu1 }
 0x1dc   : > { %v3872_v41 = vmax.f32 %v3808_v31, 0.0  ;;  %v3612_v14 = vmax.f32 %v6116_v38, %v2893_v54  ;;  %v3676_v15 = vmax.f32 %v6118_v39, %v3405_v21  ;;  %v5114_v58 = vpop.f32.mrb[82].mxu0  ;;  %v5242_v17 = vpop.f32.mrb[82].mxu1 }
 0x1dd   : > { %v4744_v18 = vpack.c.bf16 %v3874_v13, %v3873_v16  ;;  %v3742_v19 = vmax.f32 %v3614_v34, %v3678_v35  ;;  %v3615_v2 = vmax.f32 %v6122_v42, %v5114_v58  ;;  %v3679_v36 = vmax.f32 %v6124_v43, %v5242_v17  ;;  %v2896_v3 = vpop.f32.mrb[83].mxu0  ;;  %v3408_v37 = vpop.f32.mrb[83].mxu1  ;;  %v6638_v34 = vld [vmem:[#allocation3_spill] sm:$0xff] }
 0x1de   : > { %v4739_v20 = vpack.c.bf16 %v3872_v41, %v3871_v55  ;;  %v3740_v59 = vmax.f32 %v3612_v14, %v3676_v15  ;;  %v3613_v22 = vmax.f32 %v6126_v44, %v2896_v3  ;;  %v3677_v23 = vmax.f32 %v6128_v45, %v3408_v37  ;;  %v6639_v41 = vld [vmem:[#allocation4_spill] sm:$0xff]  ;;  %v6640_v15 = vld [vmem:[#allocation5_spill] sm:$0xff]  ;;  %v6642_v37 = vld [vmem:[#allocation7_spill] sm:$0xff] }
 0x1df   : > { %4872 = vst [vmem:[%s6333_s14 + $0x38] sm:$0xff] %v4744_v18   ;;  %v3813_v38 = vadd.f32 %v6315_v29, %v3742_v19  ;;  %v3743_v39 = vmax.f32 %v3615_v2, %v3679_v36  ;;  %v6641_v36 = vld [vmem:[#allocation6_spill] sm:$0xff] }
 0x1e0   : > { %4871 = vst [vmem:[%s6333_s14 + $0x30] sm:$0xff] %v4739_v20   ;;  %v3811_v6 = vadd.f32 %v6315_v29, %v3740_v59  ;;  %v3741_v7 = vmax.f32 %v3613_v22, %v3677_v23 }
 0x1e1   : > { %v3814_v42 = vadd.f32 %v6315_v29, %v3743_v39  ;;  %v3877_v33 = vmax.f32 %v3813_v38, 0.0  ;;  %v6643_v38 = vld [vmem:[#allocation8_spill] sm:$0xff] }
 0x1e2   : > { %v3812_v43 = vadd.f32 %v6315_v29, %v3741_v7  ;;  %v5117_v28 = vpop.f32.mrb[84].mxu0  ;;  %v5245_v32 = vpop.f32.mrb[84].mxu1  ;;  %v3875_v63 = vmax.f32 %v3811_v6, 0.0  ;;  %v6644_v6 = vld [vmem:[#allocation9_spill] sm:$0xff] }
 0x1e3   : > { %v3878_v62 = vmax.f32 %v3814_v42, 0.0  ;;  %v3618_v44 = vmax.f32 %v6132_v46, %v5117_v28  ;;  %v3682_v45 = vmax.f32 %v6134_v47, %v5245_v32  ;;  %v2909_v10 = vpop.f32.mrb[85].mxu0  ;;  %v3421_v11 = vpop.f32.mrb[85].mxu1 }
 0x1e4   : > { %v3876_v40 = vmax.f32 %v3812_v43, 0.0  ;;  %v3616_v8 = vmax.f32 %v6136_v48, %v2909_v10  ;;  %v3680_v24 = vmax.f32 %v6138_v49, %v3421_v11  ;;  %v5118_v61 = vpop.f32.mrb[86].mxu0  ;;  %v5246_v25 = vpop.f32.mrb[86].mxu1 }
 0x1e5   : > { %v4754_v4 = vpack.c.bf16 %v3878_v62, %v3877_v33  ;;  %v3746_v5 = vmax.f32 %v3618_v44, %v3682_v45  ;;  %v3619_v52 = vmax.f32 %v6140_v50, %v5118_v61  ;;  %v3683_v46 = vmax.f32 %v6142_v51, %v5246_v25  ;;  %v2912_v53 = vpop.f32.mrb[87].mxu0  ;;  %v3424_v47 = vpop.f32.mrb[87].mxu1 }
 0x1e6   : > { %v4749_v26 = vpack.c.bf16 %v3876_v40, %v3875_v63  ;;  %v3744_v27 = vmax.f32 %v3616_v8, %v3680_v24  ;;  %v3617_v0 = vmax.f32 %v6144_v56, %v2912_v53  ;;  %v3681_v9 = vmax.f32 %v6146_v57, %v3424_v47  ;;  %v6645_v63 = vld [vmem:[#allocation10_spill] sm:$0xff]  ;;  %v6646_v8 = vld [vmem:[#allocation11_spill] sm:$0xff]  ;;  %v6648_v53 = vld [vmem:[#allocation13_spill] sm:$0xff] }
 0x1e7   : > { %4874 = vst [vmem:[%s6333_s14 + $0x48] sm:$0xff] %v4754_v4   ;;  %v3817_v48 = vadd.f32 %v6315_v29, %v3746_v5  ;;  %v3747_v49 = vmax.f32 %v3619_v52, %v3683_v46  ;;  %v6647_v52 = vld [vmem:[#allocation12_spill] sm:$0xff] }
 0x1e8   : > { %4873 = vst [vmem:[%s6333_s14 + $0x40] sm:$0xff] %v4749_v26   ;;  %v3815_v30 = vadd.f32 %v6315_v29, %v3744_v27  ;;  %v3745_v31 = vmax.f32 %v3617_v0, %v3681_v9 }
 0x1e9   : > { %v3818_v50 = vadd.f32 %v6315_v29, %v3747_v49  ;;  %v3881_v16 = vmax.f32 %v3817_v48, 0.0  ;;  %v6649_v48 = vld [vmem:[#allocation14_spill] sm:$0xff] }
 0x1ea   : > { %v3816_v51 = vadd.f32 %v6315_v29, %v3745_v31  ;;  %v5121_v1 = vpop.f32.mrb[88].mxu0  ;;  %v5249_v12 = vpop.f32.mrb[88].mxu1  ;;  %v3879_v21 = vmax.f32 %v3815_v30, 0.0  ;;  %v6650_v30 = vld [vmem:[#allocation15_spill] sm:$0xff] }
 0x1eb   : > { %v3882_v13 = vmax.f32 %v3818_v50, 0.0  ;;  %v3622_v56 = vmax.f32 %v6148_v60, %v5121_v1  ;;  %v3686_v57 = vmax.f32 %v6638_v34, %v5249_v12  ;;  %v2925_v35 = vpop.f32.mrb[89].mxu0  ;;  %v3437_v54 = vpop.f32.mrb[89].mxu1 }
 0x1ec   : > { %v3880_v55 = vmax.f32 %v3816_v51, 0.0  ;;  %v3620_v14 = vmax.f32 %v6639_v41, %v2925_v35  ;;  %v3684_v58 = vmax.f32 %v6640_v15, %v3437_v54  ;;  %v5122_v17 = vpop.f32.mrb[90].mxu0  ;;  %v5250_v18 = vpop.f32.mrb[90].mxu1 }
 0x1ed   : > { %v4764_v19 = vpack.c.bf16 %v3882_v13, %v3881_v16  ;;  %v3750_v2 = vmax.f32 %v3622_v56, %v3686_v57  ;;  %v3623_v3 = vmax.f32 %v6641_v36, %v5122_v17  ;;  %v3687_v60 = vmax.f32 %v6642_v37, %v5250_v18  ;;  %v2928_v20 = vpop.f32.mrb[91].mxu0  ;;  %v3440_v59 = vpop.f32.mrb[91].mxu1  ;;  %v6651_v16 = vld [vmem:[#allocation16_spill] sm:$0xff]  ;;  %v6652_v56 = vld [vmem:[#allocation17_spill] sm:$0xff]  ;;  %v6653_v18 = vld [vmem:[#allocation18_spill] sm:$0xff] }
 0x1ee   : > { %v4759_v22 = vpack.c.bf16 %v3880_v55, %v3879_v21  ;;  %v3748_v23 = vmax.f32 %v3620_v14, %v3684_v58  ;;  %v3621_v39 = vmax.f32 %v6643_v38, %v2928_v20  ;;  %v3685_v7 = vmax.f32 %v6644_v6, %v3440_v59  ;;  %v6655_v59 = vld [vmem:[#allocation20_spill] sm:$0xff] }
 0x1ef   : > { %4876 = vst [vmem:[%s6333_s14 + $0x58] sm:$0xff] %v4764_v19   ;;  %v3821_v42 = vadd.f32 %v6315_v29, %v3750_v2  ;;  %v3751_v43 = vmax.f32 %v3623_v3, %v3687_v60  ;;  %v6654_v2 = vld [vmem:[#allocation19_spill] sm:$0xff] }
 0x1f0   : > { %4875 = vst [vmem:[%s6333_s14 + $0x50] sm:$0xff] %v4759_v22   ;;  %v3819_v28 = vadd.f32 %v6315_v29, %v3748_v23  ;;  %v3749_v32 = vmax.f32 %v3621_v39, %v3685_v7  ;;  %v6656_v23 = vld [vmem:[#allocation21_spill] sm:$0xff] }
 0x1f1   : > { %v3822_v33 = vadd.f32 %v6315_v29, %v3751_v43  ;;  %v3885_v10 = vmax.f32 %v3821_v42, 0.0  ;;  %v6657_v43 = vld [vmem:[#allocation22_spill] sm:$0xff] }
 0x1f2   : > { %v3820_v62 = vadd.f32 %v6315_v29, %v3749_v32  ;;  %v5125_v44 = vpop.f32.mrb[92].mxu0  ;;  %v5253_v45 = vpop.f32.mrb[92].mxu1  ;;  %v3883_v4 = vmax.f32 %v3819_v28, 0.0  ;;  %v6658_v32 = vld [vmem:[#allocation23_spill] sm:$0xff] }
 0x1f3   : > { %v3886_v11 = vmax.f32 %v3822_v33, 0.0  ;;  %v3626_v40 = vmax.f32 %v6645_v63, %v5125_v44  ;;  %v3690_v24 = vmax.f32 %v6646_v8, %v5253_v45  ;;  %v2941_v61 = vpop.f32.mrb[93].mxu0  ;;  %v3453_v25 = vpop.f32.mrb[93].mxu1 }
 0x1f4   : > { %v3884_v5 = vmax.f32 %v3820_v62, 0.0  ;;  %v3624_v46 = vmax.f32 %v6647_v52, %v2941_v61  ;;  %v3688_v47 = vmax.f32 %v6648_v53, %v3453_v25  ;;  %v5126_v26 = vpop.f32.mrb[94].mxu0  ;;  %v5254_v27 = vpop.f32.mrb[94].mxu1 }
 0x1f5   : > { %v4774_v0 = vpack.c.bf16 %v3886_v11, %v3885_v10  ;;  %v3754_v9 = vmax.f32 %v3626_v40, %v3690_v24  ;;  %v3627_v49 = vmax.f32 %v6649_v48, %v5126_v26  ;;  %v3691_v31 = vmax.f32 %v6650_v30, %v5254_v27  ;;  %v2944_v50 = vpop.f32.mrb[95].mxu0  ;;  %v3456_v51 = vpop.f32.mrb[95].mxu1  ;;  %v6659_v11 = vld [vmem:[#allocation24_spill] sm:$0xff]  ;;  %v6660_v40 = vld [vmem:[#allocation25_spill] sm:$0xff]  ;;  %v6661_v27 = vld [vmem:[#allocation26_spill] sm:$0xff] }
 0x1f6   : > { %v4769_v1 = vpack.c.bf16 %v3884_v5, %v3883_v4  ;;  %v3752_v12 = vmax.f32 %v3624_v46, %v3688_v47  ;;  %v3625_v13 = vmax.f32 %v6651_v16, %v2944_v50  ;;  %v3689_v34 = vmax.f32 %v6652_v56, %v3456_v51  ;;  %v6663_v51 = vld [vmem:[#allocation28_spill] sm:$0xff] }
 0x1f7   : > { %4878 = vst [vmem:[%s6333_s14 + $0x68] sm:$0xff] %v4774_v0   ;;  %v3825_v57 = vadd.f32 %v6315_v29, %v3754_v9  ;;  %v3755_v35 = vmax.f32 %v3627_v49, %v3691_v31  ;;  %v6662_v9 = vld [vmem:[#allocation27_spill] sm:$0xff] }
 0x1f8   : > { %4877 = vst [vmem:[%s6333_s14 + $0x60] sm:$0xff] %v4769_v1   ;;  %v3823_v54 = vadd.f32 %v6315_v29, %v3752_v12  ;;  %v3753_v21 = vmax.f32 %v3625_v13, %v3689_v34  ;;  %v6664_v12 = vld [vmem:[#allocation29_spill] sm:$0xff] }
 0x1f9   : > { %v3826_v55 = vadd.f32 %v6315_v29, %v3755_v35  ;;  %v3889_v58 = vmax.f32 %v3825_v57, 0.0  ;;  %v6665_v35 = vld [vmem:[#allocation30_spill] sm:$0xff] }
 0x1fa   : > { %v3824_v41 = vadd.f32 %v6315_v29, %v3753_v21  ;;  %v5129_v14 = vpop.f32.mrb[96].mxu0  ;;  %v5257_v15 = vpop.f32.mrb[96].mxu1  ;;  %v3887_v60 = vmax.f32 %v3823_v54, 0.0  ;;  %v6666_v21 = vld [vmem:[#allocation31_spill] sm:$0xff] }
 0x1fb   : > { %v3890_v17 = vmax.f32 %v3826_v55, 0.0  ;;  %v3630_v19 = vmax.f32 %v6653_v18, %v5129_v14  ;;  %v3694_v36 = vmax.f32 %v6654_v2, %v5257_v15  ;;  %v2957_v3 = vpop.f32.mrb[97].mxu0  ;;  %v3469_v37 = vpop.f32.mrb[97].mxu1 }
 0x1fc   : > { %v3888_v20 = vmax.f32 %v3824_v41, 0.0  ;;  %v3628_v22 = vmax.f32 %v6655_v59, %v2957_v3  ;;  %v3692_v38 = vmax.f32 %v6656_v23, %v3469_v37  ;;  %v5130_v39 = vpop.f32.mrb[98].mxu0  ;;  %v5258_v6 = vpop.f32.mrb[98].mxu1 }
 0x1fd   : > { %v4784_v7 = vpack.c.bf16 %v3890_v17, %v3889_v58  ;;  %v3758_v42 = vmax.f32 %v3630_v19, %v3694_v36  ;;  %v3631_v28 = vmax.f32 %v6657_v43, %v5130_v39  ;;  %v3695_v33 = vmax.f32 %v6658_v32, %v5258_v6  ;;  %v2960_v62 = vpop.f32.mrb[99].mxu0  ;;  %v3472_v44 = vpop.f32.mrb[99].mxu1  ;;  %v6667_v17 = vld [vmem:[#allocation32_spill] sm:$0xff]  ;;  %v6668_v19 = vld [vmem:[#allocation33_spill] sm:$0xff]  ;;  %v6669_v6 = vld [vmem:[#allocation34_spill] sm:$0xff] }
 0x1fe   : > { %v4779_v45 = vpack.c.bf16 %v3888_v20, %v3887_v60  ;;  %v3756_v10 = vmax.f32 %v3628_v22, %v3692_v38  ;;  %v3629_v63 = vmax.f32 %v6659_v11, %v2960_v62  ;;  %v3693_v8 = vmax.f32 %v6660_v40, %v3472_v44  ;;  %v6671_v44 = vld [vmem:[#allocation36_spill] sm:$0xff] }
 0x1ff   : > { %4880 = vst [vmem:[%s6333_s14 + $0x78] sm:$0xff] %v4784_v7   ;;  %v3829_v24 = vadd.f32 %v6315_v29, %v3758_v42  ;;  %v3759_v61 = vmax.f32 %v3631_v28, %v3695_v33  ;;  %v6670_v42 = vld [vmem:[#allocation35_spill] sm:$0xff] }
 0x200   : > { %4879 = vst [vmem:[%s6333_s14 + $0x70] sm:$0xff] %v4779_v45   ;;  %v3827_v25 = vadd.f32 %v6315_v29, %v3756_v10  ;;  %v3757_v4 = vmax.f32 %v3629_v63, %v3693_v8  ;;  %v6672_v10 = vld [vmem:[#allocation37_spill] sm:$0xff] }
 0x201   : > { %v3830_v5 = vadd.f32 %v6315_v29, %v3759_v61  ;;  %v3893_v47 = vmax.f32 %v3829_v24, 0.0  ;;  %v6673_v61 = vld [vmem:[#allocation38_spill] sm:$0xff] }
 0x202   : > { %v3828_v52 = vadd.f32 %v6315_v29, %v3757_v4  ;;  %v5133_v46 = vpop.f32.mrb[100].mxu0  ;;  %v5261_v53 = vpop.f32.mrb[100].mxu1  ;;  %v3891_v31 = vmax.f32 %v3827_v25, 0.0  ;;  %v6674_v4 = vld [vmem:[#allocation39_spill] sm:$0xff] }
 0x203   : > { %v3894_v26 = vmax.f32 %v3830_v5, 0.0  ;;  %v3634_v0 = vmax.f32 %v6661_v27, %v5133_v46  ;;  %v3698_v48 = vmax.f32 %v6662_v9, %v5261_v53  ;;  %v2973_v49 = vpop.f32.mrb[101].mxu0  ;;  %v3485_v30 = vpop.f32.mrb[101].mxu1 }
 0x204   : > { %v3892_v50 = vmax.f32 %v3828_v52, 0.0  ;;  %v3632_v1 = vmax.f32 %v6663_v51, %v2973_v49  ;;  %v3696_v16 = vmax.f32 %v6664_v12, %v3485_v30  ;;  %v5134_v13 = vpop.f32.mrb[102].mxu0  ;;  %v5262_v56 = vpop.f32.mrb[102].mxu1 }
 0x205   : > { %v4794_v34 = vpack.c.bf16 %v3894_v26, %v3893_v47  ;;  %v3762_v57 = vmax.f32 %v3634_v0, %v3698_v48  ;;  %v3635_v54 = vmax.f32 %v6665_v35, %v5134_v13  ;;  %v3699_v55 = vmax.f32 %v6666_v21, %v5262_v56  ;;  %v2976_v41 = vpop.f32.mrb[103].mxu0  ;;  %v3488_v14 = vpop.f32.mrb[103].mxu1  ;;  %v6675_v26 = vld [vmem:[#allocation40_spill] sm:$0xff]  ;;  %v6676_v0 = vld [vmem:[#allocation41_spill] sm:$0xff]  ;;  %v6677_v56 = vld [vmem:[#allocation42_spill] sm:$0xff] }
 0x206   : > { %v4789_v15 = vpack.c.bf16 %v3892_v50, %v3891_v31  ;;  %v3760_v58 = vmax.f32 %v3632_v1, %v3696_v16  ;;  %v3633_v18 = vmax.f32 %v6667_v17, %v2976_v41  ;;  %v3697_v2 = vmax.f32 %v6668_v19, %v3488_v14  ;;  %v6679_v14 = vld [vmem:[#allocation44_spill] sm:$0xff] }
 0x207   : > { %4882 = vst [vmem:[%s6333_s14 + $0x88] sm:$0xff] %v4794_v34   ;;  %v3833_v36 = vadd.f32 %v6315_v29, %v3762_v57  ;;  %v3763_v3 = vmax.f32 %v3635_v54, %v3699_v55  ;;  %v6678_v57 = vld [vmem:[#allocation43_spill] sm:$0xff] }
 0x208   : > { %4881 = vst [vmem:[%s6333_s14 + $0x80] sm:$0xff] %v4789_v15   ;;  %v3831_v37 = vadd.f32 %v6315_v29, %v3760_v58  ;;  %v3761_v60 = vmax.f32 %v3633_v18, %v3697_v2  ;;  %v6680_v58 = vld [vmem:[#allocation45_spill] sm:$0xff] }
 0x209   : > { %v3834_v20 = vadd.f32 %v6315_v29, %v3763_v3  ;;  %v3897_v38 = vmax.f32 %v3833_v36, 0.0  ;;  %v6681_v3 = vld [vmem:[#allocation46_spill] sm:$0xff] }
 0x20a   : > { %v3832_v59 = vadd.f32 %v6315_v29, %v3761_v60  ;;  %v5137_v22 = vpop.f32.mrb[104].mxu0  ;;  %v5265_v23 = vpop.f32.mrb[104].mxu1  ;;  %v3895_v33 = vmax.f32 %v3831_v37, 0.0  ;;  %v6682_v60 = vld [vmem:[#allocation47_spill] sm:$0xff] }
 0x20b   : > { %v3898_v39 = vmax.f32 %v3834_v20, 0.0  ;;  %v3638_v7 = vmax.f32 %v6669_v6, %v5137_v22  ;;  %v3702_v43 = vmax.f32 %v6670_v42, %v5265_v23  ;;  %v2989_v28 = vpop.f32.mrb[105].mxu0  ;;  %v3501_v32 = vpop.f32.mrb[105].mxu1 }
 0x20c   : > { %v3896_v62 = vmax.f32 %v3832_v59, 0.0  ;;  %v3636_v45 = vmax.f32 %v6671_v44, %v2989_v28  ;;  %v3700_v11 = vmax.f32 %v6672_v10, %v3501_v32  ;;  %v5138_v63 = vpop.f32.mrb[106].mxu0  ;;  %v5266_v40 = vpop.f32.mrb[106].mxu1 }
 0x20d   : > { %v4804_v8 = vpack.c.bf16 %v3898_v39, %v3897_v38  ;;  %v3766_v24 = vmax.f32 %v3638_v7, %v3702_v43  ;;  %v3639_v25 = vmax.f32 %v6673_v61, %v5138_v63  ;;  %v3703_v5 = vmax.f32 %v6674_v4, %v5266_v40  ;;  %v2992_v52 = vpop.f32.mrb[107].mxu0  ;;  %v3504_v46 = vpop.f32.mrb[107].mxu1  ;;  %v6683_v39 = vld [vmem:[#allocation48_spill] sm:$0xff]  ;;  %v6684_v7 = vld [vmem:[#allocation49_spill] sm:$0xff]  ;;  %v6685_v40 = vld [vmem:[#allocation50_spill] sm:$0xff] }
 0x20e   : > { %v4799_v53 = vpack.c.bf16 %v3896_v62, %v3895_v33  ;;  %v3764_v47 = vmax.f32 %v3636_v45, %v3700_v11  ;;  %v3637_v27 = vmax.f32 %v6675_v26, %v2992_v52  ;;  %v3701_v9 = vmax.f32 %v6676_v0, %v3504_v46  ;;  %v6687_v46 = vld [vmem:[#allocation52_spill] sm:$0xff] }
 0x20f   : > { %4884 = vst [vmem:[%s6333_s14 + $0x98] sm:$0xff] %v4804_v8   ;;  %v3837_v48 = vadd.f32 %v6315_v29, %v3766_v24  ;;  %v3767_v49 = vmax.f32 %v3639_v25, %v3703_v5  ;;  %v6686_v24 = vld [vmem:[#allocation51_spill] sm:$0xff] }
 0x210   : > { %4883 = vst [vmem:[%s6333_s14 + $0x90] sm:$0xff] %v4799_v53   ;;  %v3835_v30 = vadd.f32 %v6315_v29, %v3764_v47  ;;  %v3765_v31 = vmax.f32 %v3637_v27, %v3701_v9  ;;  %v6688_v47 = vld [vmem:[#allocation53_spill] sm:$0xff] }
 0x211   : > { %v3838_v50 = vadd.f32 %v6315_v29, %v3767_v49  ;;  %v3901_v16 = vmax.f32 %v3837_v48, 0.0  ;;  %v6689_v49 = vld [vmem:[#allocation54_spill] sm:$0xff] }
 0x212   : > { %v3836_v51 = vadd.f32 %v6315_v29, %v3765_v31  ;;  %v5141_v1 = vpop.f32.mrb[108].mxu0  ;;  %v5269_v12 = vpop.f32.mrb[108].mxu1  ;;  %v3899_v55 = vmax.f32 %v3835_v30, 0.0  ;;  %v6690_v31 = vld [vmem:[#allocation55_spill] sm:$0xff] }
 0x213   : > { %v3902_v13 = vmax.f32 %v3838_v50, 0.0  ;;  %v3642_v34 = vmax.f32 %v6677_v56, %v5141_v1  ;;  %v3706_v35 = vmax.f32 %v6678_v57, %v5269_v12  ;;  %v3005_v54 = vpop.f32.mrb[109].mxu0  ;;  %v3517_v21 = vpop.f32.mrb[109].mxu1 }
 0x214   : > { %v3900_v41 = vmax.f32 %v3836_v51, 0.0  ;;  %v3640_v15 = vmax.f32 %v6679_v14, %v3005_v54  ;;  %v3704_v17 = vmax.f32 %v6680_v58, %v3517_v21  ;;  %v5142_v18 = vpop.f32.mrb[110].mxu0  ;;  %v5270_v19 = vpop.f32.mrb[110].mxu1 }
 0x215   : > { %v4814_v2 = vpack.c.bf16 %v3902_v13, %v3901_v16  ;;  %v3770_v36 = vmax.f32 %v3642_v34, %v3706_v35  ;;  %v3643_v37 = vmax.f32 %v6681_v3, %v5142_v18  ;;  %v3707_v20 = vmax.f32 %v6682_v60, %v5270_v19  ;;  %v3008_v59 = vpop.f32.mrb[111].mxu0  ;;  %v3520_v22 = vpop.f32.mrb[111].mxu1  ;;  %v6691_v13 = vld [vmem:[#allocation56_spill] sm:$0xff]  ;;  %v6692_v34 = vld [vmem:[#allocation57_spill] sm:$0xff]  ;;  %v6693_v19 = vld [vmem:[#allocation58_spill] sm:$0xff] }
 0x216   : > { %v4809_v23 = vpack.c.bf16 %v3900_v41, %v3899_v55  ;;  %v3768_v38 = vmax.f32 %v3640_v15, %v3704_v17  ;;  %v3641_v6 = vmax.f32 %v6683_v39, %v3008_v59  ;;  %v3705_v42 = vmax.f32 %v6684_v7, %v3520_v22  ;;  %v6695_v22 = vld [vmem:[#allocation60_spill] sm:$0xff] }
 0x217   : > { %4886 = vst [vmem:[%s6333_s14 + $0xa8] sm:$0xff] %v4814_v2   ;;  %v3841_v43 = vadd.f32 %v6315_v29, %v3770_v36  ;;  %v3771_v28 = vmax.f32 %v3643_v37, %v3707_v20  ;;  %v6694_v36 = vld [vmem:[#allocation59_spill] sm:$0xff] }
 0x218   : > { %4885 = vst [vmem:[%s6333_s14 + $0xa0] sm:$0xff] %v4809_v23   ;;  %v3839_v32 = vadd.f32 %v6315_v29, %v3768_v38  ;;  %v3769_v33 = vmax.f32 %v3641_v6, %v3705_v42  ;;  %v6696_v38 = vld [vmem:[#allocation61_spill] sm:$0xff] }
 0x219   : > { %v3842_v62 = vadd.f32 %v6315_v29, %v3771_v28  ;;  %v3905_v11 = vmax.f32 %v3841_v43, 0.0  ;;  %v6697_v28 = vld [vmem:[#allocation62_spill] sm:$0xff] }
 0x21a   : > { %v3840_v44 = vadd.f32 %v6315_v29, %v3769_v33  ;;  %v5145_v45 = vpop.f32.mrb[112].mxu0  ;;  %v5273_v10 = vpop.f32.mrb[112].mxu1  ;;  %v3903_v5 = vmax.f32 %v3839_v32, 0.0  ;;  %v6698_v33 = vld [vmem:[#allocation63_spill] sm:$0xff] }
 0x21b   : > { %v3906_v63 = vmax.f32 %v3842_v62, 0.0  ;;  %v3646_v8 = vmax.f32 %v6685_v40, %v5145_v45  ;;  %v3710_v61 = vmax.f32 %v6686_v24, %v5273_v10  ;;  %v3021_v25 = vpop.f32.mrb[113].mxu0  ;;  %v3533_v4 = vpop.f32.mrb[113].mxu1 }
 0x21c   : > { %v3904_v52 = vmax.f32 %v3840_v44, 0.0  ;;  %v3644_v53 = vmax.f32 %v6687_v46, %v3021_v25  ;;  %v3708_v26 = vmax.f32 %v6688_v47, %v3533_v4  ;;  %v5146_v27 = vpop.f32.mrb[114].mxu0  ;;  %v5274_v0 = vpop.f32.mrb[114].mxu1 }
 0x21d   : > { %v4824_v9 = vpack.c.bf16 %v3906_v63, %v3905_v11  ;;  %v3774_v48 = vmax.f32 %v3646_v8, %v3710_v61  ;;  %v3647_v30 = vmax.f32 %v6689_v49, %v5146_v27  ;;  %v3711_v50 = vmax.f32 %v6690_v31, %v5274_v0  ;;  %v3024_v51 = vpop.f32.mrb[115].mxu0  ;;  %v3536_v1 = vpop.f32.mrb[115].mxu1  ;;  %v6699_v63 = vld [vmem:[#allocation64_spill] sm:$0xff]  ;;  %v6700_v8 = vld [vmem:[#allocation65_spill] sm:$0xff]  ;;  %v6701_v0 = vld [vmem:[#allocation66_spill] sm:$0xff] }
 0x21e   : > { %v4819_v12 = vpack.c.bf16 %v3904_v52, %v3903_v5  ;;  %v3772_v16 = vmax.f32 %v3644_v53, %v3708_v26  ;;  %v3645_v56 = vmax.f32 %v6691_v13, %v3024_v51  ;;  %v3709_v57 = vmax.f32 %v6692_v34, %v3536_v1  ;;  %v6703_v1 = vld [vmem:[#allocation68_spill] sm:$0xff] }
 0x21f   : > { %4888 = vst [vmem:[%s6333_s14 + $0xb8] sm:$0xff] %v4824_v9   ;;  %v3845_v35 = vadd.f32 %v6315_v29, %v3774_v48  ;;  %v3775_v54 = vmax.f32 %v3647_v30, %v3711_v50  ;;  %v6702_v48 = vld [vmem:[#allocation67_spill] sm:$0xff] }
 0x220   : > { %4887 = vst [vmem:[%s6333_s14 + $0xb0] sm:$0xff] %v4819_v12   ;;  %v3843_v21 = vadd.f32 %v6315_v29, %v3772_v16  ;;  %v3773_v55 = vmax.f32 %v3645_v56, %v3709_v57  ;;  %v6704_v16 = vld [vmem:[#allocation69_spill] sm:$0xff] }
 0x221   : > { %v3846_v41 = vadd.f32 %v6315_v29, %v3775_v54  ;;  %v3909_v17 = vmax.f32 %v3845_v35, 0.0  ;;  %v6705_v54 = vld [vmem:[#allocation70_spill] sm:$0xff] }
 0x222   : > { %v3844_v14 = vadd.f32 %v6315_v29, %v3773_v55  ;;  %v5149_v15 = vpop.f32.mrb[116].mxu0  ;;  %v5277_v58 = vpop.f32.mrb[116].mxu1  ;;  %v3907_v20 = vmax.f32 %v3843_v21, 0.0  ;;  %v6706_v55 = vld [vmem:[#allocation71_spill] sm:$0xff] }
 0x223   : > { %v3910_v18 = vmax.f32 %v3846_v41, 0.0  ;;  %v3650_v2 = vmax.f32 %v6693_v19, %v5149_v15  ;;  %v3714_v3 = vmax.f32 %v6694_v36, %v5277_v58  ;;  %v3037_v37 = vpop.f32.mrb[117].mxu0  ;;  %v3549_v60 = vpop.f32.mrb[117].mxu1 }
 0x224   : > { %v3908_v59 = vmax.f32 %v3844_v14, 0.0  ;;  %v3648_v23 = vmax.f32 %v6695_v22, %v3037_v37  ;;  %v3712_v39 = vmax.f32 %v6696_v38, %v3549_v60  ;;  %v5150_v6 = vpop.f32.mrb[118].mxu0  ;;  %v5278_v7 = vpop.f32.mrb[118].mxu1 }
 0x225   : > { %v4834_v42 = vpack.c.bf16 %v3910_v18, %v3909_v17  ;;  %v3778_v43 = vmax.f32 %v3650_v2, %v3714_v3  ;;  %v3651_v32 = vmax.f32 %v6697_v28, %v5150_v6  ;;  %v3715_v62 = vmax.f32 %v6698_v33, %v5278_v7  ;;  %v3040_v44 = vpop.f32.mrb[119].mxu0  ;;  %v3552_v45 = vpop.f32.mrb[119].mxu1  ;;  %v6707_v18 = vld [vmem:[#allocation72_spill] sm:$0xff]  ;;  %v6708_v2 = vld [vmem:[#allocation73_spill] sm:$0xff]  ;;  %v6709_v7 = vld [vmem:[#allocation74_spill] sm:$0xff] }
 0x226   : > { %v4829_v10 = vpack.c.bf16 %v3908_v59, %v3907_v20  ;;  %v3776_v11 = vmax.f32 %v3648_v23, %v3712_v39  ;;  %v3649_v40 = vmax.f32 %v6699_v63, %v3040_v44  ;;  %v3713_v24 = vmax.f32 %v6700_v8, %v3552_v45  ;;  %v6711_v45 = vld [vmem:[#allocation76_spill] sm:$0xff] }
 0x227   : > { %4890 = vst [vmem:[%s6333_s14 + $0xc8] sm:$0xff] %v4834_v42   ;;  %v3849_v61 = vadd.f32 %v6315_v29, %v3778_v43  ;;  %v3779_v25 = vmax.f32 %v3651_v32, %v3715_v62  ;;  %v6710_v43 = vld [vmem:[#allocation75_spill] sm:$0xff] }
 0x228   : > { %4889 = vst [vmem:[%s6333_s14 + $0xc0] sm:$0xff] %v4829_v10   ;;  %v3847_v4 = vadd.f32 %v6315_v29, %v3776_v11  ;;  %v3777_v5 = vmax.f32 %v3649_v40, %v3713_v24  ;;  %v6712_v11 = vld [vmem:[#allocation77_spill] sm:$0xff] }
 0x229   : > { %v3850_v52 = vadd.f32 %v6315_v29, %v3779_v25  ;;  %v3913_v26 = vmax.f32 %v3849_v61, 0.0  ;;  %v6713_v25 = vld [vmem:[#allocation78_spill] sm:$0xff] }
 0x22a   : > { %v3848_v46 = vadd.f32 %v6315_v29, %v3777_v5  ;;  %v5153_v53 = vpop.f32.mrb[120].mxu0  ;;  %v5281_v47 = vpop.f32.mrb[120].mxu1  ;;  %v3911_v50 = vmax.f32 %v3847_v4, 0.0  ;;  %v6714_v5 = vld [vmem:[#allocation79_spill] sm:$0xff] }
 0x22b   : > { %v3914_v27 = vmax.f32 %v3850_v52, 0.0  ;;  %v3654_v9 = vmax.f32 %v6701_v0, %v5153_v53  ;;  %v3718_v49 = vmax.f32 %v6702_v48, %v5281_v47  ;;  %v3053_v30 = vpop.f32.mrb[121].mxu0  ;;  %v3565_v31 = vpop.f32.mrb[121].mxu1 }
 0x22c   : > { %v3912_v51 = vmax.f32 %v3848_v46, 0.0  ;;  %v3652_v12 = vmax.f32 %v6703_v1, %v3053_v30  ;;  %v3716_v13 = vmax.f32 %v6704_v16, %v3565_v31  ;;  %v5154_v56 = vpop.f32.mrb[122].mxu0  ;;  %v5282_v34 = vpop.f32.mrb[122].mxu1 }
 0x22d   : > { %v4844_v57 = vpack.c.bf16 %v3914_v27, %v3913_v26  ;;  %v3782_v35 = vmax.f32 %v3654_v9, %v3718_v49  ;;  %v3655_v21 = vmax.f32 %v6705_v54, %v5154_v56  ;;  %v3719_v41 = vmax.f32 %v6706_v55, %v5282_v34  ;;  %v3056_v14 = vpop.f32.mrb[123].mxu0  ;;  %v3568_v15 = vpop.f32.mrb[123].mxu1  ;;  %v6715_v27 = vld [vmem:[#allocation80_spill] sm:$0xff]  ;;  %v6716_v9 = vld [vmem:[#allocation81_spill] sm:$0xff] }
 0x22e   : > { %v4839_v58 = vpack.c.bf16 %v3912_v51, %v3911_v50  ;;  %v3780_v17 = vmax.f32 %v3652_v12, %v3716_v13  ;;  %v3653_v19 = vmax.f32 %v6707_v18, %v3056_v14  ;;  %v3717_v36 = vmax.f32 %v6708_v2, %v3568_v15 }
 0x22f   : > { %4892 = vst [vmem:[%s6333_s14 + $0xd8] sm:$0xff] %v4844_v57   ;;  %v3853_v3 = vadd.f32 %v6315_v29, %v3782_v35  ;;  %v3783_v37 = vmax.f32 %v3655_v21, %v3719_v41 }
 0x230   : > { %4891 = vst [vmem:[%s6333_s14 + $0xd0] sm:$0xff] %v4839_v58   ;;  %v3851_v60 = vadd.f32 %v6315_v29, %v3780_v17  ;;  %v3781_v20 = vmax.f32 %v3653_v19, %v3717_v36 }
 0x231   : > { %v3854_v59 = vadd.f32 %v6315_v29, %v3783_v37  ;;  %v3917_v39 = vmax.f32 %v3853_v3, 0.0 }
 0x232   : > { %v3852_v22 = vadd.f32 %v6315_v29, %v3781_v20  ;;  %v5157_v23 = vpop.f32.mrb[124].mxu0  ;;  %v5285_v38 = vpop.f32.mrb[124].mxu1  ;;  %v3915_v62 = vmax.f32 %v3851_v60, 0.0 }
 0x233   : > { %v3918_v6 = vmax.f32 %v3854_v59, 0.0  ;;  %v3658_v42 = vmax.f32 %v6709_v7, %v5157_v23  ;;  %v3722_v28 = vmax.f32 %v6710_v43, %v5285_v38  ;;  %v3069_v32 = vpop.f32.mrb[125].mxu0  ;;  %v3581_v33 = vpop.f32.mrb[125].mxu1 }
 0x234   : > { %v3916_v44 = vmax.f32 %v3852_v22, 0.0  ;;  %v3656_v10 = vmax.f32 %v6711_v45, %v3069_v32  ;;  %v3720_v63 = vmax.f32 %v6712_v11, %v3581_v33  ;;  %v5158_v40 = vpop.f32.mrb[126].mxu0  ;;  %v5286_v8 = vpop.f32.mrb[126].mxu1 }
 0x235   : > { %v4854_v24 = vpack.c.bf16 %v3918_v6, %v3917_v39  ;;  %v3786_v61 = vmax.f32 %v3658_v42, %v3722_v28  ;;  %v3659_v4 = vmax.f32 %v6713_v25, %v5158_v40  ;;  %v3723_v52 = vmax.f32 %v6714_v5, %v5286_v8  ;;  %v3072_v46 = vpop.f32.mrb[127].mxu0  ;;  %v3584_v53 = vpop.f32.mrb[127].mxu1 }
 0x236   : > { %v4849_v47 = vpack.c.bf16 %v3916_v44, %v3915_v62  ;;  %v3784_v26 = vmax.f32 %v3656_v10, %v3720_v63  ;;  %v3657_v0 = vmax.f32 %v6715_v27, %v3072_v46  ;;  %v3721_v48 = vmax.f32 %v6716_v9, %v3584_v53 }
 0x237   : > { %4894 = vst [vmem:[%s6333_s14 + $0xe8] sm:$0xff] %v4854_v24   ;;  %v3857_v49 = vadd.f32 %v6315_v29, %v3786_v61  ;;  %v3787_v30 = vmax.f32 %v3659_v4, %v3723_v52 }
 0x238   : > { %4893 = vst [vmem:[%s6333_s14 + $0xe0] sm:$0xff] %v4849_v47   ;;  %v3855_v31 = vadd.f32 %v6315_v29, %v3784_v26  ;;  %v3785_v50 = vmax.f32 %v3657_v0, %v3721_v48 }
 0x239   : > { %v3858_v51 = vadd.f32 %v6315_v29, %v3787_v30  ;;  %v3921_v12 = vmax.f32 %v3857_v49, 0.0 }
 0x23a   : > { %v3856_v1 = vadd.f32 %v6315_v29, %v3785_v50  ;;  %v3919_v13 = vmax.f32 %v3855_v31, 0.0 }
 0x23b   : > { %v3922_v16 = vmax.f32 %v3858_v51, 0.0 }
 0x23c   : > { %v3920_v56 = vmax.f32 %v3856_v1, 0.0 }
 0x23d   : > { %v4864_v34 = vpack.c.bf16 %v3922_v16, %v3921_v12 }
 0x23e   : > { %v4859_v57 = vpack.c.bf16 %v3920_v56, %v3919_v13 }
 0x23f   : > { %4896 = vst [vmem:[%s6333_s14 + $0xf8] sm:$0xff] %v4864_v34  }
 0x240   : > { %4895 = vst [vmem:[%s6333_s14 + $0xf0] sm:$0xff] %v4859_v57  }
 0x241 PF: > { %p10_p9 = scmp.ge.s32.totalorder %s5508_s16, 4   ;;  %s6717_s12 = smov %s5464_s13 }
 0x242   : > { %s6718_s13 = smov %s5517_s19  ;;  %s6719_s14 = smov %s5508_s16 }
 0x243   :  { %12 = sbr.rel (!%p10_p9) target bundleno = 2 (0x2), region = 108 }

// kernel: convolutional_net_forward.4
= control target key start
LH: loop header
LB: loop body
LE: loop exit
PB: predicated region body
PF: predicated region fallthrough
CT: control target
= control target key end

     0   :  { %v3594_v0 = vmov 0   ;;  %vm1411_vm0 = vcmask 130048   ;;  %s4773_s1 = inlined_call_operand.vmem [shape: bf16[400,128], index: 1, kind: input, shape index: {}]   ;;  %s4774_s0 = inlined_call_operand.vmem [shape: bf16[4,208,400], index: 0, kind: input, shape index: {}]   ;;  %s4775_s2 = inlined_call_operand.vmem [shape: f32[1,128], index: 2, kind: input, shape index: {}]   ;;  %s4776_s3 = inlined_call_operand.vmem [shape: bf16[208,128], index: 3, kind: output, shape index: {}]  }
   0x1   :  { %1568 = vmatprep.subr.bf16.mxu1 %v3594_v0  ;;  %v3257_v1 = vld [vmem:[%s4773_s1] sm:$0xff]   ;;  %2017 = vmatprep.subr.bf16.mxu0 %v3594_v0  ;;  %v3258_v2 = vld [vmem:[%s4773_s1 + $0x8] sm:$0xff]   ;;  %v3259_v3 = vld [vmem:[%s4773_s1 + $0x10] sm:$0xff]  }
   0x2   :  { %1569 = vmatpush1.bf16.msra.mxu1 %v3257_v1  ;;  %v3264_v4 = vld [vmem:[%s4773_s1 + $0x80] sm:$0xff]   ;;  %v3266_v5 = vld [vmem:[%s4773_s1 + $0x88] sm:$0xff]   ;;  %v3260_v6 = vld [vmem:[%s4773_s1 + $0x18] sm:$0xff]  }
   0x3   :  { %1570 = vmatprep.subr.bf16.mxu1 %v3594_v0  ;;  %2018 = vmatpush1.bf16.msra.mxu0 %v3264_v4  ;;  %v3268_v7 = vld [vmem:[%s4773_s1 + $0x90] sm:$0xff]   ;;  %v3261_v8 = vld [vmem:[%s4773_s1 + $0x20] sm:$0xff]   ;;  %v3270_v9 = vld [vmem:[%s4773_s1 + $0x98] sm:$0xff]  }
   0x4   :  { %2019 = vmatprep.subr.bf16.mxu0 %v3594_v0  ;;  %v3262_v10 = vld [vmem:[%s4773_s1 + $0x28] sm:$0xff]   ;;  %v3272_v11 = vld [vmem:[%s4773_s1 + $0xa0] sm:$0xff]   ;;  %v3263_v12 = vld [vmem:[%s4773_s1 + $0x30] sm:$0xff]  }
   0x5   :  { %v3274_v13 = vld [vmem:[%s4773_s1 + $0xa8] sm:$0xff]   ;;  %v3265_v15 = vld [vmem:[%s4773_s1 + $0x38] sm:$0xff]   ;;  %v3287_v16 = vld [vmem:[%s4774_s0 + $0x4] ss:$16 sps:$4 sm:$0xff]  }
   0x6   :  { %1571 = vmatpush1.bf16.msra.mxu1 %v3258_v2  ;;  %v3283_v14 = vld [vmem:[%s4774_s0 + $0xc] ss:$16 sps:$4 sm:$0xff]   ;;  %v3276_v17 = vld [vmem:[%s4773_s1 + $0xb0] sm:$0xff]   ;;  %1600 = vmatprep.mubr.bf16.mxu1 %v3287_v16  ;;  %v3267_v18 = vld [vmem:[%s4773_s1 + $0x40] sm:$0xff]  }
   0x7   :  { %1572 = vmatprep.subr.bf16.mxu1 %v3594_v0  ;;  %2020 = vmatpush1.bf16.msra.mxu0 %v3266_v5  ;;  %v3278_v19 = vld [vmem:[%s4773_s1 + $0xb8] sm:$0xff]   ;;  %v3269_v20 = vld [vmem:[%s4773_s1 + $0x48] sm:$0xff]   ;;  %v3280_v21 = vld [vmem:[%s4773_s1 + $0xc0] sm:$0xff]  }
   0x8   :  { %2021 = vmatprep.subr.bf16.mxu0 %v3594_v0  ;;  %2970 = vmatprep.mubr.msk.bf16.mxu0 %vm1411_vm0, %v3283_v14  ;;  %v3271_v22 = vld [vmem:[%s4773_s1 + $0x50] sm:$0xff]   ;;  %v3281_v23 = vld [vmem:[%s4774_s0 + $0x8] ss:$16 sps:$4 sm:$0xff]   ;;  %v3288_v24 = vld [vmem:[%s4774_s0 + $0x2c] ss:$16 sps:$4 sm:$0xff]  }
   0x9   :  { %v3273_v25 = vld [vmem:[%s4773_s1 + $0x58] sm:$0xff]   ;;  %v3275_v26 = vld [vmem:[%s4773_s1 + $0x60] sm:$0xff]   ;;  %v3277_v29 = vld [vmem:[%s4773_s1 + $0x68] sm:$0xff]  }
   0xa   :  { %1573 = vmatpush1.bf16.msra.mxu1 %v3259_v3  ;;  %v3290_v27 = vld [vmem:[%s4774_s0 + $0x28] ss:$16 sps:$4 sm:$0xff]   ;;  %v3294_v28 = vld [vmem:[%s4774_s0 + $0x4c] ss:$16 sps:$4 sm:$0xff]   ;;  %v3279_v30 = vld [vmem:[%s4773_s1 + $0x70] sm:$0xff]  }
   0xb   :  { %1574 = vmatprep.subr.bf16.mxu1 %v3594_v0  ;;  %2022 = vmatpush1.bf16.msra.mxu0 %v3268_v7  ;;  %v3296_v31 = vld [vmem:[%s4774_s0 + $0x48] ss:$16 sps:$4 sm:$0xff]   ;;  %v3300_v32 = vld [vmem:[%s4774_s0 + $0x6c] ss:$16 sps:$4 sm:$0xff]   ;;  %v3285_v34 = vld [vmem:[%s4774_s0] ss:$16 sps:$4 sm:$0xff]  }
   0xc   :  { %2023 = vmatprep.subr.bf16.mxu0 %v3594_v0  ;;  %v3284_v33 = vld [vmem:[%s4773_s1 + $0x78] sm:$0xff]   ;;  %v3291_v35 = vld [vmem:[%s4774_s0 + $0x24] ss:$16 sps:$4 sm:$0xff]   ;;  %v3293_v38 = vld [vmem:[%s4774_s0 + $0x20] ss:$16 sps:$4 sm:$0xff]  }
   0xd   :  { %v3302_v36 = vld [vmem:[%s4774_s0 + $0x68] ss:$16 sps:$4 sm:$0xff]   ;;  %v3306_v37 = vld [vmem:[%s4774_s0 + $0x8c] ss:$16 sps:$4 sm:$0xff]   ;;  %v3297_v39 = vld [vmem:[%s4774_s0 + $0x44] ss:$16 sps:$4 sm:$0xff]  }
   0xe   :  { %1575 = vmatpush1.bf16.msra.mxu1 %v3260_v6  ;;  %v3308_v40 = vld [vmem:[%s4774_s0 + $0x88] ss:$16 sps:$4 sm:$0xff]   ;;  %v3312_v41 = vld [vmem:[%s4774_s0 + $0xac] ss:$16 sps:$4 sm:$0xff]   ;;  %v3299_v42 = vld [vmem:[%s4774_s0 + $0x40] ss:$16 sps:$4 sm:$0xff]  }
   0xf   :  { %1576 = vmatprep.subr.bf16.mxu1 %v3594_v0  ;;  %2024 = vmatpush1.bf16.msra.mxu0 %v3270_v9  ;;  %v3303_v43 = vld [vmem:[%s4774_s0 + $0x64] ss:$16 sps:$4 sm:$0xff]   ;;  %v3314_v44 = vld [vmem:[%s4774_s0 + $0xa8] ss:$16 sps:$4 sm:$0xff]   ;;  %v3318_v45 = vld [vmem:[%s4774_s0 + $0xcc] ss:$16 sps:$4 sm:$0xff]  }
  0x10   :  { %2025 = vmatprep.subr.bf16.mxu0 %v3594_v0  ;;  %v3305_v46 = vld [vmem:[%s4774_s0 + $0x60] ss:$16 sps:$4 sm:$0xff]   ;;  %v3309_v47 = vld [vmem:[%s4774_s0 + $0x84] ss:$16 sps:$4 sm:$0xff]   ;;  %v3320_v48 = vld [vmem:[%s4774_s0 + $0xc8] ss:$16 sps:$4 sm:$0xff]  }
  0x11   :  { %v3324_v49 = vld [vmem:[%s4774_s0 + $0xec] ss:$16 sps:$4 sm:$0xff]   ;;  %v3311_v50 = vld [vmem:[%s4774_s0 + $0x80] ss:$16 sps:$4 sm:$0xff]   ;;  %v3315_v51 = vld [vmem:[%s4774_s0 + $0xa4] ss:$16 sps:$4 sm:$0xff]  }
  0x12   :  { %1577 = vmatpush1.bf16.msra.mxu1 %v3261_v8  ;;  %v3326_v52 = vld [vmem:[%s4774_s0 + $0xe8] ss:$16 sps:$4 sm:$0xff]   ;;  %v3330_v53 = vld [vmem:[%s4774_s0 + $0x10c] ss:$16 sps:$4 sm:$0xff]   ;;  %v3317_v54 = vld [vmem:[%s4774_s0 + $0xa0] ss:$16 sps:$4 sm:$0xff]  }
  0x13   :  { %1578 = vmatprep.subr.bf16.mxu1 %v3594_v0  ;;  %2026 = vmatpush1.bf16.msra.mxu0 %v3272_v11  ;;  %v3321_v55 = vld [vmem:[%s4774_s0 + $0xc4] ss:$16 sps:$4 sm:$0xff]   ;;  %v3332_v56 = vld [vmem:[%s4774_s0 + $0x108] ss:$16 sps:$4 sm:$0xff]   ;;  %v3336_v57 = vld [vmem:[%s4774_s0 + $0x12c] ss:$16 sps:$4 sm:$0xff]  }
  0x14   :  { %2027 = vmatprep.subr.bf16.mxu0 %v3594_v0  ;;  %v3323_v58 = vld [vmem:[%s4774_s0 + $0xc0] ss:$16 sps:$4 sm:$0xff]   ;;  %v3327_v59 = vld [vmem:[%s4774_s0 + $0xe4] ss:$16 sps:$4 sm:$0xff]   ;;  %v3338_v60 = vld [vmem:[%s4774_s0 + $0x128] ss:$16 sps:$4 sm:$0xff]  }
  0x15   :  { %v3342_v61 = vld [vmem:[%s4774_s0 + $0x14c] ss:$16 sps:$4 sm:$0xff]   ;;  %v3329_v62 = vld [vmem:[%s4774_s0 + $0xe0] ss:$16 sps:$4 sm:$0xff]   ;;  %v3333_v63 = vld [vmem:[%s4774_s0 + $0x104] ss:$16 sps:$4 sm:$0xff]  }
  0x16   :  { %1579 = vmatpush1.bf16.msra.mxu1 %v3262_v10  ;;  %v3348_v1 = vld [vmem:[%s4774_s0 + $0x16c] ss:$16 sps:$4 sm:$0xff]   ;;  %v3335_v2 = vld [vmem:[%s4774_s0 + $0x100] ss:$16 sps:$4 sm:$0xff]   ;;  %v3339_v3 = vld [vmem:[%s4774_s0 + $0x124] ss:$16 sps:$4 sm:$0xff]  }
  0x17   :  { %1580 = vmatprep.subr.bf16.mxu1 %v3594_v0  ;;  %2028 = vmatpush1.bf16.msra.mxu0 %v3274_v13  ;;  %v3350_v4 = vld [vmem:[%s4774_s0 + $0x168] ss:$16 sps:$4 sm:$0xff]   ;;  %v3354_v5 = vld [vmem:[%s4774_s0 + $0x18c] ss:$16 sps:$4 sm:$0xff]   ;;  %v3341_v6 = vld [vmem:[%s4774_s0 + $0x120] ss:$16 sps:$4 sm:$0xff]  }
  0x18   :  { %2029 = vmatprep.subr.bf16.mxu0 %v3594_v0  ;;  %v3345_v7 = vld [vmem:[%s4774_s0 + $0x144] ss:$16 sps:$4 sm:$0xff]   ;;  %v3356_v8 = vld [vmem:[%s4774_s0 + $0x188] ss:$16 sps:$4 sm:$0xff]   ;;  %v3360_v9 = vld [vmem:[%s4774_s0 + $0x1ac] ss:$16 sps:$4 sm:$0xff]  }
  0x19   :  { %v3347_v10 = vld [vmem:[%s4774_s0 + $0x140] ss:$16 sps:$4 sm:$0xff]   ;;  %v3351_v11 = vld [vmem:[%s4774_s0 + $0x164] ss:$16 sps:$4 sm:$0xff]   ;;  %v3366_v13 = vld [vmem:[%s4774_s0 + $0x1cc] ss:$16 sps:$4 sm:$0xff]  }
  0x1a   :  { %1581 = vmatpush1.bf16.msra.mxu1 %v3263_v12  ;;  %v3362_v12 = vld [vmem:[%s4774_s0 + $0x1a8] ss:$16 sps:$4 sm:$0xff]   ;;  %v3353_v14 = vld [vmem:[%s4774_s0 + $0x160] ss:$16 sps:$4 sm:$0xff]  }
  0x1b   :  { %1582 = vmatprep.subr.bf16.mxu1 %v3594_v0  ;;  %2030 = vmatpush1.bf16.msra.mxu0 %v3276_v17  ;;  %v3368_v16 = vld [vmem:[%s4774_s0 + $0x1c8] ss:$16 sps:$4 sm:$0xff]   ;;  %v3372_v17 = vld [vmem:[%s4774_s0 + $0x1ec] ss:$16 sps:$4 sm:$0xff]  }
  0x1c   :  { %2031 = vmatprep.subr.bf16.mxu0 %v3594_v0 }
  0x1e   :  { %1583 = vmatpush1.bf16.msra.mxu1 %v3265_v15  ;;  %v3357_v15 = vld [vmem:[%s4774_s0 + $0x184] ss:$16 sps:$4 sm:$0xff]  }
  0x1f   :  { %1584 = vmatprep.subr.bf16.mxu1 %v3594_v0  ;;  %2032 = vmatpush1.bf16.msra.mxu0 %v3278_v19  ;;  %v3363_v19 = vld [vmem:[%s4774_s0 + $0x1a4] ss:$16 sps:$4 sm:$0xff]  }
  0x20   :  { %2033 = vmatprep.subr.bf16.mxu0 %v3594_v0 }
  0x22   :  { %1585 = vmatpush1.bf16.msra.mxu1 %v3267_v18  ;;  %v3359_v18 = vld [vmem:[%s4774_s0 + $0x180] ss:$16 sps:$4 sm:$0xff]  }
  0x23   :  { %1586 = vmatprep.subr.bf16.mxu1 %v3594_v0  ;;  %2034 = vmatpush1.bf16.msra.mxu0 %v3280_v21  ;;  %v3378_v21 = vld [vmem:[%s4774_s0 + $0x20c] ss:$16 sps:$4 sm:$0xff]  }
  0x26   :  { %1587 = vmatpush1.bf16.msra.mxu1 %v3269_v20  ;;  %2050 = vmatmul.mubr.bf16.vlgmr.msra.gmra.mrb[0].mxu0 %v3281_v23  ;;  %v3374_v20 = vld [vmem:[%s4774_s0 + $0x1e8] ss:$16 sps:$4 sm:$0xff]   ;;  %v3369_v23 = vld [vmem:[%s4774_s0 + $0x1c4] ss:$16 sps:$4 sm:$0xff]  }
  0x27   :  { %1588 = vmatprep.subr.bf16.mxu1 %v3594_v0  ;;  %2971 = vmatprep.mubr.msk.bf16.mxu0 %vm1411_vm0, %v3288_v24  ;;  %v3380_v24 = vld [vmem:[%s4774_s0 + $0x208] ss:$16 sps:$4 sm:$0xff]  }
  0x2a   :  { %1589 = vmatpush1.bf16.msra.mxu1 %v3271_v22  ;;  %v3365_v22 = vld [vmem:[%s4774_s0 + $0x1a0] ss:$16 sps:$4 sm:$0xff]  }
  0x2b   :  { %1590 = vmatprep.subr.bf16.mxu1 %v3594_v0 }
  0x2e   :  { %1591 = vmatpush1.bf16.msra.mxu1 %v3273_v25  ;;  %2058 = vmatmul.mubr.bf16.gmra.mrb[4].mxu0 %v3290_v27  ;;  %v3384_v25 = vld [vmem:[%s4774_s0 + $0x22c] ss:$16 sps:$4 sm:$0xff]   ;;  %v3375_v27 = vld [vmem:[%s4774_s0 + $0x1e4] ss:$16 sps:$4 sm:$0xff]  }
  0x2f   :  { %1592 = vmatprep.subr.bf16.mxu1 %v3594_v0  ;;  %2972 = vmatprep.mubr.msk.bf16.mxu0 %vm1411_vm0, %v3294_v28  ;;  %v3386_v28 = vld [vmem:[%s4774_s0 + $0x228] ss:$16 sps:$4 sm:$0xff]  }
  0x32   :  { %1593 = vmatpush1.bf16.msra.mxu1 %v3275_v26  ;;  %v3371_v26 = vld [vmem:[%s4774_s0 + $0x1c0] ss:$16 sps:$4 sm:$0xff]  }
  0x33   :  { %1594 = vmatprep.subr.bf16.mxu1 %v3594_v0 }
  0x36   :  { %1595 = vmatpush1.bf16.msra.mxu1 %v3277_v29  ;;  %2066 = vmatmul.mubr.bf16.gmra.mrb[8].mxu0 %v3296_v31  ;;  %v3390_v29 = vld [vmem:[%s4774_s0 + $0x24c] ss:$16 sps:$4 sm:$0xff]   ;;  %v3381_v31 = vld [vmem:[%s4774_s0 + $0x204] ss:$16 sps:$4 sm:$0xff]  }
  0x37   :  { %1596 = vmatprep.subr.bf16.mxu1 %v3594_v0  ;;  %2973 = vmatprep.mubr.msk.bf16.mxu0 %vm1411_vm0, %v3300_v32  ;;  %v3392_v32 = vld [vmem:[%s4774_s0 + $0x248] ss:$16 sps:$4 sm:$0xff]  }
  0x3a   :  { %1597 = vmatpush1.bf16.msra.mxu1 %v3279_v30  ;;  %v3377_v30 = vld [vmem:[%s4774_s0 + $0x1e0] ss:$16 sps:$4 sm:$0xff]  }
  0x3b   :  { %1598 = vmatprep.subr.bf16.mxu1 %v3594_v0  ;;  %v3344_v0 = vld [vmem:[%s4774_s0 + $0x148] ss:$16 sps:$4 sm:$0xff]  }
  0x3e   :  { %1599 = vmatpush1.bf16.msra.mxu1 %v3284_v33  ;;  %2074 = vmatmul.mubr.bf16.gmra.mrb[12].mxu0 %v3302_v36  ;;  %v3396_v33 = vld [vmem:[%s4774_s0 + $0x26c] ss:$16 sps:$4 sm:$0xff]   ;;  %v3398_v36 = vld [vmem:[%s4774_s0 + $0x268] ss:$16 sps:$4 sm:$0xff]  }
  0x3f   :  { %2974 = vmatprep.mubr.msk.bf16.mxu0 %vm1411_vm0, %v3306_v37  ;;  %v3402_v37 = vld [vmem:[%s4774_s0 + $0x28c] ss:$16 sps:$4 sm:$0xff]  }
  0x41   :  { %1601 = vmatmul.mubr.bf16.vlgmr.msra.gmra.mrb[0].mxu1 %v3285_v34  ;;  %v3383_v34 = vld [vmem:[%s4774_s0 + $0x200] ss:$16 sps:$4 sm:$0xff]  }
  0x42   :  { %1608 = vmatprep.mubr.bf16.mxu1 %v3291_v35  ;;  %v3387_v35 = vld [vmem:[%s4774_s0 + $0x224] ss:$16 sps:$4 sm:$0xff]  }
  0x46   :  { %2082 = vmatmul.mubr.bf16.gmra.mrb[16].mxu0 %v3308_v40  ;;  %v3404_v40 = vld [vmem:[%s4774_s0 + $0x288] ss:$16 sps:$4 sm:$0xff]  }
  0x47   :  { %2975 = vmatprep.mubr.msk.bf16.mxu0 %vm1411_vm0, %v3312_v41  ;;  %v3408_v41 = vld [vmem:[%s4774_s0 + $0x2ac] ss:$16 sps:$4 sm:$0xff]  }
  0x49   :  { %1609 = vmatmul.mubr.bf16.gmra.mrb[4].mxu1 %v3293_v38  ;;  %v3389_v38 = vld [vmem:[%s4774_s0 + $0x220] ss:$16 sps:$4 sm:$0xff]  }
  0x4a   :  { %1616 = vmatprep.mubr.bf16.mxu1 %v3297_v39  ;;  %v3393_v39 = vld [vmem:[%s4774_s0 + $0x244] ss:$16 sps:$4 sm:$0xff]  }
  0x4e   :  { %2090 = vmatmul.mubr.bf16.gmra.mrb[20].mxu0 %v3314_v44  ;;  %v3410_v44 = vld [vmem:[%s4774_s0 + $0x2a8] ss:$16 sps:$4 sm:$0xff]  }
  0x4f   :  { %2976 = vmatprep.mubr.msk.bf16.mxu0 %vm1411_vm0, %v3318_v45  ;;  %v3414_v45 = vld [vmem:[%s4774_s0 + $0x2cc] ss:$16 sps:$4 sm:$0xff]  }
  0x51   :  { %1617 = vmatmul.mubr.bf16.gmra.mrb[8].mxu1 %v3299_v42  ;;  %v3395_v42 = vld [vmem:[%s4774_s0 + $0x240] ss:$16 sps:$4 sm:$0xff]  }
  0x52   :  { %1624 = vmatprep.mubr.bf16.mxu1 %v3303_v43  ;;  %v3399_v43 = vld [vmem:[%s4774_s0 + $0x264] ss:$16 sps:$4 sm:$0xff]  }
  0x56   :  { %2098 = vmatmul.mubr.bf16.gmra.mrb[24].mxu0 %v3320_v48  ;;  %v3416_v48 = vld [vmem:[%s4774_s0 + $0x2c8] ss:$16 sps:$4 sm:$0xff]  }
  0x57   :  { %2977 = vmatprep.mubr.msk.bf16.mxu0 %vm1411_vm0, %v3324_v49  ;;  %v3420_v49 = vld [vmem:[%s4774_s0 + $0x2ec] ss:$16 sps:$4 sm:$0xff]  }
  0x59   :  { %1625 = vmatmul.mubr.bf16.gmra.mrb[12].mxu1 %v3305_v46  ;;  %v3401_v46 = vld [vmem:[%s4774_s0 + $0x260] ss:$16 sps:$4 sm:$0xff]  }
  0x5a   :  { %1632 = vmatprep.mubr.bf16.mxu1 %v3309_v47  ;;  %v3405_v47 = vld [vmem:[%s4774_s0 + $0x284] ss:$16 sps:$4 sm:$0xff]  }
  0x5e   :  { %2106 = vmatmul.mubr.bf16.gmra.mrb[28].mxu0 %v3326_v52  ;;  %v3422_v52 = vld [vmem:[%s4774_s0 + $0x2e8] ss:$16 sps:$4 sm:$0xff]  }
  0x5f   :  { %2978 = vmatprep.mubr.msk.bf16.mxu0 %vm1411_vm0, %v3330_v53  ;;  %v3426_v53 = vld [vmem:[%s4774_s0 + $0x30c] ss:$16 sps:$4 sm:$0xff]  }
  0x61   :  { %1633 = vmatmul.mubr.bf16.gmra.mrb[16].mxu1 %v3311_v50  ;;  %v3407_v50 = vld [vmem:[%s4774_s0 + $0x280] ss:$16 sps:$4 sm:$0xff]  }
  0x62   :  { %1640 = vmatprep.mubr.bf16.mxu1 %v3315_v51  ;;  %v3411_v51 = vld [vmem:[%s4774_s0 + $0x2a4] ss:$16 sps:$4 sm:$0xff]  }
  0x66   :  { %2114 = vmatmul.mubr.bf16.gmra.mrb[32].mxu0 %v3332_v56  ;;  %v3428_v56 = vld [vmem:[%s4774_s0 + $0x308] ss:$16 sps:$4 sm:$0xff]  }
  0x67   :  { %2979 = vmatprep.mubr.msk.bf16.mxu0 %vm1411_vm0, %v3336_v57  ;;  %v3432_v57 = vld [vmem:[%s4774_s0 + $0x32c] ss:$16 sps:$4 sm:$0xff]  }
  0x69   :  { %1641 = vmatmul.mubr.bf16.gmra.mrb[20].mxu1 %v3317_v54  ;;  %v3413_v54 = vld [vmem:[%s4774_s0 + $0x2a0] ss:$16 sps:$4 sm:$0xff]  }
  0x6a   :  { %1648 = vmatprep.mubr.bf16.mxu1 %v3321_v55  ;;  %v3417_v55 = vld [vmem:[%s4774_s0 + $0x2c4] ss:$16 sps:$4 sm:$0xff]  }
  0x6e   :  { %2122 = vmatmul.mubr.bf16.gmra.mrb[36].mxu0 %v3338_v60  ;;  %v3434_v60 = vld [vmem:[%s4774_s0 + $0x328] ss:$16 sps:$4 sm:$0xff]  }
  0x6f   :  { %2980 = vmatprep.mubr.msk.bf16.mxu0 %vm1411_vm0, %v3342_v61  ;;  %v3438_v61 = vld [vmem:[%s4774_s0 + $0x34c] ss:$16 sps:$4 sm:$0xff]  }
  0x71   :  { %1649 = vmatmul.mubr.bf16.gmra.mrb[24].mxu1 %v3323_v58  ;;  %v3419_v58 = vld [vmem:[%s4774_s0 + $0x2c0] ss:$16 sps:$4 sm:$0xff]  }
  0x72   :  { %1656 = vmatprep.mubr.bf16.mxu1 %v3327_v59  ;;  %v3423_v59 = vld [vmem:[%s4774_s0 + $0x2e4] ss:$16 sps:$4 sm:$0xff]  }
  0x76   :  { %2130 = vmatmul.mubr.bf16.gmra.mrb[40].mxu0 %v3344_v0  ;;  %v3440_v0 = vld [vmem:[%s4774_s0 + $0x348] ss:$16 sps:$4 sm:$0xff]  }
  0x77   :  { %2981 = vmatprep.mubr.msk.bf16.mxu0 %vm1411_vm0, %v3348_v1  ;;  %v3444_v1 = vld [vmem:[%s4774_s0 + $0x36c] ss:$16 sps:$4 sm:$0xff]  }
  0x79   :  { %1657 = vmatmul.mubr.bf16.gmra.mrb[28].mxu1 %v3329_v62  ;;  %v3425_v62 = vld [vmem:[%s4774_s0 + $0x2e0] ss:$16 sps:$4 sm:$0xff]  }
  0x7a   :  { %1664 = vmatprep.mubr.bf16.mxu1 %v3333_v63  ;;  %v3429_v63 = vld [vmem:[%s4774_s0 + $0x304] ss:$16 sps:$4 sm:$0xff]  }
  0x7e   :  { %2138 = vmatmul.mubr.bf16.gmra.mrb[44].mxu0 %v3350_v4 }
  0x7f   :  { %2982 = vmatprep.mubr.msk.bf16.mxu0 %vm1411_vm0, %v3354_v5 }
  0x81   :  { %1665 = vmatmul.mubr.bf16.gmra.mrb[32].mxu1 %v3335_v2  ;;  %v3431_v2 = vld [vmem:[%s4774_s0 + $0x300] ss:$16 sps:$4 sm:$0xff]  }
  0x82   :  { %1672 = vmatprep.mubr.bf16.mxu1 %v3339_v3  ;;  %v3435_v3 = vld [vmem:[%s4774_s0 + $0x324] ss:$16 sps:$4 sm:$0xff]  }
  0x86   :  { %2146 = vmatmul.mubr.bf16.gmra.mrb[48].mxu0 %v3356_v8  ;;  %v3450_v8 = vld [vmem:[%s4774_s0 + $0x38c] ss:$16 sps:$4 sm:$0xff]  }
  0x87   :  { %2983 = vmatprep.mubr.msk.bf16.mxu0 %vm1411_vm0, %v3360_v9 }
  0x89   :  { %1673 = vmatmul.mubr.bf16.gmra.mrb[36].mxu1 %v3341_v6  ;;  %v3446_v6 = vld [vmem:[%s4774_s0 + $0x368] ss:$16 sps:$4 sm:$0xff]  }
  0x8a   :  { %1680 = vmatprep.mubr.bf16.mxu1 %v3345_v7 }
  0x8e   :  { %2154 = vmatmul.mubr.bf16.gmra.mrb[52].mxu0 %v3362_v12 }
  0x8f   :  { %2984 = vmatprep.mubr.msk.bf16.mxu0 %vm1411_vm0, %v3366_v13 }
  0x91   :  { %1681 = vmatmul.mubr.bf16.gmra.mrb[40].mxu1 %v3347_v10  ;;  %v3437_v10 = vld [vmem:[%s4774_s0 + $0x320] ss:$16 sps:$4 sm:$0xff]  }
  0x92   :  { %1688 = vmatprep.mubr.bf16.mxu1 %v3351_v11  ;;  %v3441_v11 = vld [vmem:[%s4774_s0 + $0x344] ss:$16 sps:$4 sm:$0xff]  }
  0x96   :  { %2162 = vmatmul.mubr.bf16.gmra.mrb[56].mxu0 %v3368_v16  ;;  %v3456_v16 = vld [vmem:[%s4774_s0 + $0x3ac] ss:$16 sps:$4 sm:$0xff]  }
  0x97   :  { %2985 = vmatprep.mubr.msk.bf16.mxu0 %vm1411_vm0, %v3372_v17 }
  0x99   :  { %1689 = vmatmul.mubr.bf16.gmra.mrb[44].mxu1 %v3353_v14  ;;  %v3452_v14 = vld [vmem:[%s4774_s0 + $0x388] ss:$16 sps:$4 sm:$0xff]  }
  0x9a   :  { %1696 = vmatprep.mubr.bf16.mxu1 %v3357_v15 }
  0x9e   :  { %2170 = vmatmul.mubr.bf16.gmra.mrb[60].mxu0 %v3374_v20 }
  0x9f   :  { %2986 = vmatprep.mubr.msk.bf16.mxu0 %vm1411_vm0, %v3378_v21 }
  0xa1   :  { %1697 = vmatmul.mubr.bf16.gmra.mrb[48].mxu1 %v3359_v18  ;;  %v3443_v18 = vld [vmem:[%s4774_s0 + $0x340] ss:$16 sps:$4 sm:$0xff]  }
  0xa2   :  { %1704 = vmatprep.mubr.bf16.mxu1 %v3363_v19  ;;  %v3447_v19 = vld [vmem:[%s4774_s0 + $0x364] ss:$16 sps:$4 sm:$0xff]  }
  0xa6   :  { %2178 = vmatmul.mubr.bf16.gmra.mrb[64].mxu0 %v3380_v24  ;;  %v3462_v24 = vld [vmem:[%s4774_s0 + $0x3cc] ss:$16 sps:$4 sm:$0xff]  }
  0xa7   :  { %2987 = vmatprep.mubr.msk.bf16.mxu0 %vm1411_vm0, %v3384_v25 }
  0xa9   :  { %1705 = vmatmul.mubr.bf16.gmra.mrb[52].mxu1 %v3365_v22  ;;  %v3458_v22 = vld [vmem:[%s4774_s0 + $0x3a8] ss:$16 sps:$4 sm:$0xff]  }
  0xaa   :  { %1712 = vmatprep.mubr.bf16.mxu1 %v3369_v23 }
  0xae   :  { %2186 = vmatmul.mubr.bf16.gmra.mrb[68].mxu0 %v3386_v28 }
  0xaf   :  { %2988 = vmatprep.mubr.msk.bf16.mxu0 %vm1411_vm0, %v3390_v29  ;;  %v3449_v29 = vld [vmem:[%s4774_s0 + $0x360] ss:$16 sps:$4 sm:$0xff]  }
  0xb1   :  { %1713 = vmatmul.mubr.bf16.gmra.mrb[56].mxu1 %v3371_v26 }
  0xb2   :  { %1720 = vmatprep.mubr.bf16.mxu1 %v3375_v27 }
  0xb6   :  { %2194 = vmatmul.mubr.bf16.gmra.mrb[72].mxu0 %v3392_v32 }
  0xb7   :  { %2989 = vmatprep.mubr.msk.bf16.mxu0 %vm1411_vm0, %v3396_v33 }
  0xb9   :  { %1721 = vmatmul.mubr.bf16.gmra.mrb[60].mxu1 %v3377_v30 }
  0xba   :  { %1728 = vmatprep.mubr.bf16.mxu1 %v3381_v31  ;;  %v3453_v31 = vld [vmem:[%s4774_s0 + $0x384] ss:$16 sps:$4 sm:$0xff]  }
  0xbe   :  { %2202 = vmatmul.mubr.bf16.gmra.mrb[76].mxu0 %v3398_v36  ;;  %v3464_v36 = vld [vmem:[%s4774_s0 + $0x3c8] ss:$16 sps:$4 sm:$0xff]  }
  0xbf   :  { %2990 = vmatprep.mubr.msk.bf16.mxu0 %vm1411_vm0, %v3402_v37 }
  0xc1   :  { %1729 = vmatmul.mubr.bf16.gmra.mrb[64].mxu1 %v3383_v34 }
  0xc2   :  { %1736 = vmatprep.mubr.bf16.mxu1 %v3387_v35 }
  0xc6   :  { %2210 = vmatmul.mubr.bf16.gmra.mrb[80].mxu0 %v3404_v40 }
  0xc7   :  { %2991 = vmatprep.mubr.msk.bf16.mxu0 %vm1411_vm0, %v3408_v41 }
  0xc9   :  { %1737 = vmatmul.mubr.bf16.gmra.mrb[68].mxu1 %v3389_v38  ;;  %v3468_v38 = vld [vmem:[%s4774_s0 + $0x3ec] ss:$16 sps:$4 sm:$0xff]  }
  0xca   :  { %1744 = vmatprep.mubr.bf16.mxu1 %v3393_v39 }
  0xce   :  { %2218 = vmatmul.mubr.bf16.gmra.mrb[84].mxu0 %v3410_v44 }
  0xcf   :  { %2992 = vmatprep.mubr.msk.bf16.mxu0 %vm1411_vm0, %v3414_v45  ;;  %v3459_v45 = vld [vmem:[%s4774_s0 + $0x3a4] ss:$16 sps:$4 sm:$0xff]  }
  0xd1   :  { %1745 = vmatmul.mubr.bf16.gmra.mrb[72].mxu1 %v3395_v42 }
  0xd2   :  { %1752 = vmatprep.mubr.bf16.mxu1 %v3399_v43  ;;  %v3455_v43 = vld [vmem:[%s4774_s0 + $0x380] ss:$16 sps:$4 sm:$0xff]  }
  0xd6   :  { %2226 = vmatmul.mubr.bf16.gmra.mrb[88].mxu0 %v3416_v48 }
  0xd7   :  { %2993 = vmatprep.mubr.msk.bf16.mxu0 %vm1411_vm0, %v3420_v49 }
  0xd9   :  { %1753 = vmatmul.mubr.bf16.gmra.mrb[76].mxu1 %v3401_v46 }
  0xda   :  { %1760 = vmatprep.mubr.bf16.mxu1 %v3405_v47 }
  0xde   :  { %2234 = vmatmul.mubr.bf16.gmra.mrb[92].mxu0 %v3422_v52  ;;  %v3474_v52 = vld [vmem:[%s4774_s0 + $0x40c] ss:$16 sps:$4 sm:$0xff]  }
  0xdf   :  { %2994 = vmatprep.mubr.msk.bf16.mxu0 %vm1411_vm0, %v3426_v53 }
  0xe1   :  { %1761 = vmatmul.mubr.bf16.gmra.mrb[80].mxu1 %v3407_v50  ;;  %v3470_v50 = vld [vmem:[%s4774_s0 + $0x3e8] ss:$16 sps:$4 sm:$0xff]  }
  0xe2   :  { %1768 = vmatprep.mubr.bf16.mxu1 %v3411_v51 }
  0xe6   :  { %2242 = vmatmul.mubr.bf16.gmra.mrb[96].mxu0 %v3428_v56 }
  0xe7   :  { %2995 = vmatprep.mubr.msk.bf16.mxu0 %vm1411_vm0, %v3432_v57  ;;  %v3461_v57 = vld [vmem:[%s4774_s0 + $0x3a0] ss:$16 sps:$4 sm:$0xff]  }
  0xe9   :  { %1769 = vmatmul.mubr.bf16.gmra.mrb[84].mxu1 %v3413_v54 }
  0xea   :  { %1776 = vmatprep.mubr.bf16.mxu1 %v3417_v55 }
  0xee   :  { %2250 = vmatmul.mubr.bf16.gmra.mrb[100].mxu0 %v3434_v60 }
  0xef   :  { %2996 = vmatprep.mubr.msk.bf16.mxu0 %vm1411_vm0, %v3438_v61 }
  0xf1   :  { %1777 = vmatmul.mubr.bf16.gmra.mrb[88].mxu1 %v3419_v58 }
  0xf2   :  { %1784 = vmatprep.mubr.bf16.mxu1 %v3423_v59  ;;  %v3465_v59 = vld [vmem:[%s4774_s0 + $0x3c4] ss:$16 sps:$4 sm:$0xff]  }
  0xf6   :  { %2258 = vmatmul.mubr.bf16.gmra.mrb[104].mxu0 %v3440_v0  ;;  %v3476_v0 = vld [vmem:[%s4774_s0 + $0x408] ss:$16 sps:$4 sm:$0xff]  }
  0xf7   :  { %2997 = vmatprep.mubr.msk.bf16.mxu0 %vm1411_vm0, %v3444_v1 }
  0xf9   :  { %1785 = vmatmul.mubr.bf16.gmra.mrb[92].mxu1 %v3425_v62  ;;  %v2051_v4 = vpop.f32.mrb[0].mxu0 }
  0xfa   :  { %1792 = vmatprep.mubr.bf16.mxu1 %v3429_v63  ;;  %v2053_v5 = vpop.f32.mrb[1].mxu0 }
  0xfb   :  { %v2054_v7 = vpop.f32.mrb[2].mxu0 }
  0xfc   :  { %v2056_v9 = vpop.f32.mrb[3].mxu0 }
  0xfd   :  { %v3471_v9 = vld [vmem:[%s4774_s0 + $0x3e4] ss:$16 sps:$4 sm:$0xff]  }
  0xfe   :  { %2266 = vmatmul.mubr.bf16.gmra.mrb[108].mxu0 %v3446_v6 }
  0xff   :  { %2998 = vmatprep.mubr.msk.bf16.mxu0 %vm1411_vm0, %v3450_v8 }
 0x101   :  { %1793 = vmatmul.mubr.bf16.gmra.mrb[96].mxu1 %v3431_v2  ;;  %v2059_v12 = vpop.f32.mrb[4].mxu0  ;;  %v3480_v2 = vld [vmem:[%s4774_s0 + $0x42c] ss:$16 sps:$4 sm:$0xff]  }
 0x102   :  { %1800 = vmatprep.mubr.bf16.mxu1 %v3435_v3  ;;  %v2061_v13 = vpop.f32.mrb[5].mxu0 }
 0x103   :  { %v2062_v15 = vpop.f32.mrb[6].mxu0 }
 0x104   :  { %v2064_v17 = vpop.f32.mrb[7].mxu0 }
 0x106   :  { %2274 = vmatmul.mubr.bf16.gmra.mrb[112].mxu0 %v3452_v14  ;;  %v3482_v14 = vld [vmem:[%s4774_s0 + $0x428] ss:$16 sps:$4 sm:$0xff]  }
 0x107   :  { %2999 = vmatprep.mubr.msk.bf16.mxu0 %vm1411_vm0, %v3456_v16  ;;  %v3486_v16 = vld [vmem:[%s4774_s0 + $0x44c] ss:$16 sps:$4 sm:$0xff]  }
 0x109   :  { %1801 = vmatmul.mubr.bf16.gmra.mrb[100].mxu1 %v3437_v10  ;;  %v2067_v20 = vpop.f32.mrb[8].mxu0 }
 0x10a   :  { %1808 = vmatprep.mubr.bf16.mxu1 %v3441_v11  ;;  %v2069_v21 = vpop.f32.mrb[9].mxu0 }
 0x10b   :  { %v2070_v23 = vpop.f32.mrb[10].mxu0  ;;  %v3473_v21 = vld [vmem:[%s4774_s0 + $0x3e0] ss:$16 sps:$4 sm:$0xff]  }
 0x10c   :  { %v2072_v25 = vpop.f32.mrb[11].mxu0 }
 0x10e   :  { %2282 = vmatmul.mubr.bf16.gmra.mrb[116].mxu0 %v3458_v22 }
 0x10f   :  { %3000 = vmatprep.mubr.msk.bf16.mxu0 %vm1411_vm0, %v3462_v24 }
 0x111   :  { %1809 = vmatmul.mubr.bf16.gmra.mrb[104].mxu1 %v3443_v18  ;;  %v2075_v34 = vpop.f32.mrb[12].mxu0 }
 0x112   :  { %1816 = vmatprep.mubr.bf16.mxu1 %v3447_v19  ;;  %v2077_v35 = vpop.f32.mrb[13].mxu0 }
 0x113   :  { %v2078_v37 = vpop.f32.mrb[14].mxu0 }
 0x114   :  { %v1602_v26 = vpop.f32.mrb[0].mxu1  ;;  %v2080_v39 = vpop.f32.mrb[15].mxu0 }
 0x115   :  { %v4093_v27 = vadd.f32 %v2051_v4, %v1602_v26  ;;  %v1604_v28 = vpop.f32.mrb[1].mxu1  ;;  %v3483_v39 = vld [vmem:[%s4774_s0 + $0x424] ss:$16 sps:$4 sm:$0xff]  }
 0x116   :  { %v1605_v30 = vpop.f32.mrb[2].mxu1  ;;  %2290 = vmatmul.mubr.bf16.gmra.mrb[120].mxu0 %v3464_v36 }
 0x117   :  { %v4102_v32 = vadd.f32 %v2054_v7, %v1605_v30  ;;  %v1607_v33 = vpop.f32.mrb[3].mxu1  ;;  %3001 = vmatprep.mubr.msk.bf16.mxu0 %vm1411_vm0, %v3468_v38  ;;  %v3467_v7 = vld [vmem:[%s4774_s0 + $0x3c0] ss:$16 sps:$4 sm:$0xff]  }
 0x119   :  { %1817 = vmatmul.mubr.bf16.gmra.mrb[108].mxu1 %v3449_v29  ;;  %v2083_v48 = vpop.f32.mrb[16].mxu0  ;;  %v3488_v29 = vld [vmem:[%s4774_s0 + $0x448] ss:$16 sps:$4 sm:$0xff]  }
 0x11a   :  { %1824 = vmatprep.mubr.bf16.mxu1 %v3453_v31  ;;  %v2085_v49 = vpop.f32.mrb[17].mxu0  ;;  %v3492_v31 = vld [vmem:[%s4774_s0 + $0x46c] ss:$16 sps:$4 sm:$0xff]  }
 0x11b   :  { %v2086_v51 = vpop.f32.mrb[18].mxu0 }
 0x11c   :  { %v1610_v40 = vpop.f32.mrb[4].mxu1  ;;  %v2088_v53 = vpop.f32.mrb[19].mxu0 }
 0x11d   :  { %v4110_v41 = vadd.f32 %v2059_v12, %v1610_v40  ;;  %v1612_v42 = vpop.f32.mrb[5].mxu1  ;;  %v3485_v53 = vld [vmem:[%s4774_s0 + $0x420] ss:$16 sps:$4 sm:$0xff]  }
 0x11e   :  { %v1613_v44 = vpop.f32.mrb[6].mxu1  ;;  %2298 = vmatmul.mubr.bf16.gmra.mrb[124].mxu0 %v3470_v50 }
 0x11f   :  { %v4119_v46 = vadd.f32 %v2062_v15, %v1613_v44  ;;  %v1615_v47 = vpop.f32.mrb[7].mxu1  ;;  %3002 = vmatprep.mubr.msk.bf16.mxu0 %vm1411_vm0, %v3474_v52 }
 0x121   :  { %1825 = vmatmul.mubr.bf16.gmra.mrb[112].mxu1 %v3455_v43  ;;  %v2091_v62 = vpop.f32.mrb[20].mxu0 }
 0x122   :  { %1832 = vmatprep.mubr.bf16.mxu1 %v3459_v45  ;;  %v2093_v63 = vpop.f32.mrb[21].mxu0  ;;  %v3494_v45 = vld [vmem:[%s4774_s0 + $0x468] ss:$16 sps:$4 sm:$0xff]  }
 0x123   :  { %v2094_v1 = vpop.f32.mrb[22].mxu0 }
 0x124   :  { %v1618_v54 = vpop.f32.mrb[8].mxu1  ;;  %v2096_v3 = vpop.f32.mrb[23].mxu0 }
 0x125   :  { %v4127_v55 = vadd.f32 %v2067_v20, %v1618_v54  ;;  %v1620_v56 = vpop.f32.mrb[9].mxu1 }
 0x126   :  { %v1621_v58 = vpop.f32.mrb[10].mxu1  ;;  %2306 = vmatmul.mubr.bf16.gmra.mrb[128].mxu0 %v3476_v0  ;;  %v3489_v56 = vld [vmem:[%s4774_s0 + $0x444] ss:$16 sps:$4 sm:$0xff]   ;;  %v3504_v0 = vld [vmem:[%s4774_s0 + $0x4ac] ss:$16 sps:$4 sm:$0xff]  }
 0x127   :  { %v4136_v60 = vadd.f32 %v2070_v23, %v1621_v58  ;;  %v1623_v61 = vpop.f32.mrb[11].mxu1  ;;  %3003 = vmatprep.mubr.msk.bf16.mxu0 %vm1411_vm0, %v3480_v2  ;;  %v3477_v23 = vld [vmem:[%s4774_s0 + $0x404] ss:$16 sps:$4 sm:$0xff]  }
 0x129   :  { %1833 = vmatmul.mubr.bf16.gmra.mrb[116].mxu1 %v3461_v57  ;;  %v2099_v12 = vpop.f32.mrb[24].mxu0 }
 0x12a   :  { %1840 = vmatprep.mubr.bf16.mxu1 %v3465_v59  ;;  %v2101_v13 = vpop.f32.mrb[25].mxu0 }
 0x12b   :  { %v2102_v15 = vpop.f32.mrb[26].mxu0 }
 0x12c   :  { %v1626_v4 = vpop.f32.mrb[12].mxu1  ;;  %v2104_v17 = vpop.f32.mrb[27].mxu0 }
 0x12d   :  { %v4144_v5 = vadd.f32 %v2075_v34, %v1626_v4  ;;  %v1628_v6 = vpop.f32.mrb[13].mxu1 }
 0x12e   :  { %v1629_v8 = vpop.f32.mrb[14].mxu1  ;;  %2314 = vmatmul.mubr.bf16.gmra.mrb[132].mxu0 %v3482_v14  ;;  %v3491_v6 = vld [vmem:[%s4774_s0 + $0x440] ss:$16 sps:$4 sm:$0xff]   ;;  %v3506_v14 = vld [vmem:[%s4774_s0 + $0x4a8] ss:$16 sps:$4 sm:$0xff]  }
 0x12f   :  { %v4153_v10 = vadd.f32 %v2078_v37, %v1629_v8  ;;  %v1631_v11 = vpop.f32.mrb[15].mxu1  ;;  %3004 = vmatprep.mubr.msk.bf16.mxu0 %vm1411_vm0, %v3486_v16  ;;  %v3479_v37 = vld [vmem:[%s4774_s0 + $0x400] ss:$16 sps:$4 sm:$0xff]   ;;  %v3495_v8 = vld [vmem:[%s4774_s0 + $0x464] ss:$16 sps:$4 sm:$0xff]  }
 0x130   :  { %v3510_v16 = vld [vmem:[%s4774_s0 + $0x4cc] ss:$16 sps:$4 sm:$0xff]  }
 0x131   :  { %1841 = vmatmul.mubr.bf16.gmra.mrb[120].mxu1 %v3467_v7  ;;  %v2107_v26 = vpop.f32.mrb[28].mxu0 }
 0x132   :  { %1848 = vmatprep.mubr.bf16.mxu1 %v3471_v9  ;;  %v2109_v28 = vpop.f32.mrb[29].mxu0 }
 0x133   :  { %v2110_v30 = vpop.f32.mrb[30].mxu0 }
 0x134   :  { %v1634_v18 = vpop.f32.mrb[16].mxu1  ;;  %v2112_v33 = vpop.f32.mrb[31].mxu0 }
 0x135   :  { %v4161_v19 = vadd.f32 %v2083_v48, %v1634_v18  ;;  %v1636_v20 = vpop.f32.mrb[17].mxu1  ;;  %v3498_v48 = vld [vmem:[%s4774_s0 + $0x48c] ss:$16 sps:$4 sm:$0xff]  }
 0x136   :  { %v1637_v22 = vpop.f32.mrb[18].mxu1  ;;  %2322 = vmatmul.mubr.bf16.gmra.mrb[136].mxu0 %v3488_v29 }
 0x137   :  { %v4170_v24 = vadd.f32 %v2086_v51, %v1637_v22  ;;  %v1639_v25 = vpop.f32.mrb[19].mxu1  ;;  %3005 = vmatprep.mubr.msk.bf16.mxu0 %vm1411_vm0, %v3492_v31  ;;  %v3497_v22 = vld [vmem:[%s4774_s0 + $0x460] ss:$16 sps:$4 sm:$0xff]   ;;  %v3512_v31 = vld [vmem:[%s4774_s0 + $0x4c8] ss:$16 sps:$4 sm:$0xff]  }
 0x138   :  { %v3501_v25 = vld [vmem:[%s4774_s0 + $0x484] ss:$16 sps:$4 sm:$0xff]  }
 0x139   :  { %1849 = vmatmul.mubr.bf16.gmra.mrb[124].mxu1 %v3473_v21  ;;  %v2115_v43 = vpop.f32.mrb[32].mxu0 }
 0x13a   :  { %1856 = vmatprep.mubr.bf16.mxu1 %v3477_v23  ;;  %v2117_v44 = vpop.f32.mrb[33].mxu0 }
 0x13b   :  { %v2118_v47 = vpop.f32.mrb[34].mxu0  ;;  %v3507_v44 = vld [vmem:[%s4774_s0 + $0x4a4] ss:$16 sps:$4 sm:$0xff]  }
 0x13c   :  { %v1642_v34 = vpop.f32.mrb[20].mxu1  ;;  %v2120_v49 = vpop.f32.mrb[35].mxu0 }
 0x13d   :  { %v4178_v35 = vadd.f32 %v2091_v62, %v1642_v34  ;;  %v1644_v36 = vpop.f32.mrb[21].mxu1  ;;  %v3500_v62 = vld [vmem:[%s4774_s0 + $0x488] ss:$16 sps:$4 sm:$0xff]   ;;  %v3516_v34 = vld [vmem:[%s4774_s0 + $0x4ec] ss:$16 sps:$4 sm:$0xff]  }
 0x13e   :  { %v1645_v38 = vpop.f32.mrb[22].mxu1  ;;  %2330 = vmatmul.mubr.bf16.gmra.mrb[140].mxu0 %v3494_v45 }
 0x13f   :  { %v4187_v40 = vadd.f32 %v2094_v1, %v1645_v38  ;;  %v1647_v42 = vpop.f32.mrb[23].mxu1  ;;  %3006 = vmatprep.mubr.msk.bf16.mxu0 %vm1411_vm0, %v3498_v48 }
 0x140   :  { %v3503_v42 = vld [vmem:[%s4774_s0 + $0x480] ss:$16 sps:$4 sm:$0xff]  }
 0x141   :  { %1857 = vmatmul.mubr.bf16.gmra.mrb[128].mxu1 %v3479_v37  ;;  %v2123_v59 = vpop.f32.mrb[36].mxu0 }
 0x142   :  { %1864 = vmatprep.mubr.bf16.mxu1 %v3483_v39  ;;  %v2125_v61 = vpop.f32.mrb[37].mxu0 }
 0x143   :  { %v2126_v63 = vpop.f32.mrb[38].mxu0  ;;  %v3509_v61 = vld [vmem:[%s4774_s0 + $0x4a0] ss:$16 sps:$4 sm:$0xff]  }
 0x144   :  { %v1650_v50 = vpop.f32.mrb[24].mxu1  ;;  %v2128_v1 = vpop.f32.mrb[39].mxu0 }
 0x145   :  { %v4195_v51 = vadd.f32 %v2099_v12, %v1650_v50  ;;  %v1652_v52 = vpop.f32.mrb[25].mxu1  ;;  %v3518_v50 = vld [vmem:[%s4774_s0 + $0x4e8] ss:$16 sps:$4 sm:$0xff]  }
 0x146   :  { %v1653_v54 = vpop.f32.mrb[26].mxu1  ;;  %2338 = vmatmul.mubr.bf16.gmra.mrb[144].mxu0 %v3500_v62 }
 0x147   :  { %v4204_v57 = vadd.f32 %v2102_v15, %v1653_v54  ;;  %v1655_v58 = vpop.f32.mrb[27].mxu1  ;;  %3007 = vmatprep.mubr.msk.bf16.mxu0 %vm1411_vm0, %v3504_v0 }
 0x149   :  { %4803 = vst [vmem:[#allocation2_spill] sm:$0xff] %v4204_v57  ;;  %1865 = vmatmul.mubr.bf16.gmra.mrb[132].mxu1 %v3485_v53  ;;  %v2131_v12 = vpop.f32.mrb[40].mxu0  ;;  %v3522_v53 = vld [vmem:[%s4774_s0 + $0x50c] ss:$16 sps:$4 sm:$0xff]  }
 0x14a   :  { %1872 = vmatprep.mubr.bf16.mxu1 %v3489_v56  ;;  %v2133_v13 = vpop.f32.mrb[41].mxu0 }
 0x14b   :  { %v2134_v15 = vpop.f32.mrb[42].mxu0 }
 0x14c   :  { %v1658_v2 = vpop.f32.mrb[28].mxu1  ;;  %v2136_v17 = vpop.f32.mrb[43].mxu0 }
 0x14d   :  { %v4212_v3 = vadd.f32 %v2107_v26, %v1658_v2  ;;  %v1660_v4 = vpop.f32.mrb[29].mxu1  ;;  %v3519_v17 = vld [vmem:[%s4774_s0 + $0x4e4] ss:$16 sps:$4 sm:$0xff]  }
 0x14e   :  { %v1661_v7 = vpop.f32.mrb[30].mxu1  ;;  %2346 = vmatmul.mubr.bf16.gmra.mrb[148].mxu0 %v3506_v14 }
 0x14f   :  { %4804 = vst [vmem:[#allocation3_spill] sm:$0xff] %v4212_v3  ;;  %v4221_v9 = vadd.f32 %v2110_v30, %v1661_v7  ;;  %v1663_v11 = vpop.f32.mrb[31].mxu1  ;;  %3008 = vmatprep.mubr.msk.bf16.mxu0 %vm1411_vm0, %v3510_v16 }
 0x151   :  { %4805 = vst [vmem:[#allocation4_spill] sm:$0xff] %v4221_v9  ;;  %1873 = vmatmul.mubr.bf16.gmra.mrb[136].mxu1 %v3491_v6  ;;  %v2139_v29 = vpop.f32.mrb[44].mxu0  ;;  %v3524_v6 = vld [vmem:[%s4774_s0 + $0x508] ss:$16 sps:$4 sm:$0xff]  }
 0x152   :  { %1880 = vmatprep.mubr.bf16.mxu1 %v3495_v8  ;;  %v2141_v30 = vpop.f32.mrb[45].mxu0  ;;  %v3528_v8 = vld [vmem:[%s4774_s0 + $0x52c] ss:$16 sps:$4 sm:$0xff]  }
 0x153   :  { %v2142_v33 = vpop.f32.mrb[46].mxu0 }
 0x154   :  { %v1666_v18 = vpop.f32.mrb[32].mxu1  ;;  %v2144_v36 = vpop.f32.mrb[47].mxu0 }
 0x155   :  { %v4229_v20 = vadd.f32 %v2115_v43, %v1666_v18  ;;  %v1668_v21 = vpop.f32.mrb[33].mxu1  ;;  %v3521_v36 = vld [vmem:[%s4774_s0 + $0x4e0] ss:$16 sps:$4 sm:$0xff]  }
 0x156   :  { %v1669_v23 = vpop.f32.mrb[34].mxu1  ;;  %2354 = vmatmul.mubr.bf16.gmra.mrb[152].mxu0 %v3512_v31 }
 0x157   :  { %4806 = vst [vmem:[#allocation5_spill] sm:$0xff] %v4229_v20  ;;  %v4238_v26 = vadd.f32 %v2118_v47, %v1669_v23  ;;  %v1671_v28 = vpop.f32.mrb[35].mxu1  ;;  %3009 = vmatprep.mubr.msk.bf16.mxu0 %vm1411_vm0, %v3516_v34 }
 0x159   :  { %4807 = vst [vmem:[#allocation6_spill] sm:$0xff] %v4238_v26  ;;  %1881 = vmatmul.mubr.bf16.gmra.mrb[140].mxu1 %v3497_v22  ;;  %v2147_v48 = vpop.f32.mrb[48].mxu0 }
 0x15a   :  { %1888 = vmatprep.mubr.bf16.mxu1 %v3501_v25  ;;  %v2149_v49 = vpop.f32.mrb[49].mxu0  ;;  %v3530_v25 = vld [vmem:[%s4774_s0 + $0x528] ss:$16 sps:$4 sm:$0xff]  }
 0x15b   :  { %v2150_v52 = vpop.f32.mrb[50].mxu0 }
 0x15c   :  { %v1674_v37 = vpop.f32.mrb[36].mxu1  ;;  %v2152_v54 = vpop.f32.mrb[51].mxu0 }
 0x15d   :  { %v4246_v38 = vadd.f32 %v2123_v59, %v1674_v37  ;;  %v1676_v39 = vpop.f32.mrb[37].mxu1 }
 0x15e   :  { %v1677_v43 = vpop.f32.mrb[38].mxu1  ;;  %2362 = vmatmul.mubr.bf16.gmra.mrb[156].mxu0 %v3518_v50  ;;  %v3525_v39 = vld [vmem:[%s4774_s0 + $0x504] ss:$16 sps:$4 sm:$0xff]   ;;  %v3540_v50 = vld [vmem:[%s4774_s0 + $0x56c] ss:$16 sps:$4 sm:$0xff]  }
 0x15f   :  { %4808 = vst [vmem:[#allocation7_spill] sm:$0xff] %v4246_v38  ;;  %v4255_v45 = vadd.f32 %v2126_v63, %v1677_v43  ;;  %v1679_v47 = vpop.f32.mrb[39].mxu1  ;;  %3010 = vmatprep.mubr.msk.bf16.mxu0 %vm1411_vm0, %v3522_v53  ;;  %v3513_v63 = vld [vmem:[%s4774_s0 + $0x4c4] ss:$16 sps:$4 sm:$0xff]  }
 0x161   :  { %4809 = vst [vmem:[#allocation8_spill] sm:$0xff] %v4255_v45  ;;  %1889 = vmatmul.mubr.bf16.gmra.mrb[144].mxu1 %v3503_v42  ;;  %v2155_v2 = vpop.f32.mrb[52].mxu0 }
 0x162   :  { %1896 = vmatprep.mubr.bf16.mxu1 %v3507_v44  ;;  %v2157_v4 = vpop.f32.mrb[53].mxu0 }
 0x163   :  { %v2158_v7 = vpop.f32.mrb[54].mxu0 }
 0x164   :  { %v1682_v56 = vpop.f32.mrb[40].mxu1  ;;  %v2160_v11 = vpop.f32.mrb[55].mxu0 }
 0x165   :  { %v4263_v58 = vadd.f32 %v2131_v12, %v1682_v56  ;;  %v1684_v59 = vpop.f32.mrb[41].mxu1 }
 0x166   :  { %v1685_v62 = vpop.f32.mrb[42].mxu1  ;;  %2370 = vmatmul.mubr.bf16.gmra.mrb[160].mxu0 %v3524_v6  ;;  %v3527_v59 = vld [vmem:[%s4774_s0 + $0x500] ss:$16 sps:$4 sm:$0xff]  }
 0x167   :  { %4810 = vst [vmem:[#allocation9_spill] sm:$0xff] %v4263_v58  ;;  %v4272_v0 = vadd.f32 %v2134_v15, %v1685_v62  ;;  %v1687_v1 = vpop.f32.mrb[43].mxu1  ;;  %v3515_v15 = vld [vmem:[%s4774_s0 + $0x4c0] ss:$16 sps:$4 sm:$0xff]   ;;  %3011 = vmatprep.mubr.msk.bf16.mxu0 %vm1411_vm0, %v3528_v8  ;;  %v3531_v62 = vld [vmem:[%s4774_s0 + $0x524] ss:$16 sps:$4 sm:$0xff]  }
 0x168   :  { %v3542_v8 = vld [vmem:[%s4774_s0 + $0x568] ss:$16 sps:$4 sm:$0xff]  }
 0x169   :  { %4811 = vst [vmem:[#allocation10_spill] sm:$0xff] %v4272_v0  ;;  %1897 = vmatmul.mubr.bf16.gmra.mrb[148].mxu1 %v3509_v61  ;;  %v2163_v22 = vpop.f32.mrb[56].mxu0 }
 0x16a   :  { %1904 = vmatprep.mubr.bf16.mxu1 %v3513_v63  ;;  %v2165_v23 = vpop.f32.mrb[57].mxu0 }
 0x16b   :  { %v2166_v28 = vpop.f32.mrb[58].mxu0 }
 0x16c   :  { %v1690_v12 = vpop.f32.mrb[44].mxu1  ;;  %v2168_v30 = vpop.f32.mrb[59].mxu0 }
 0x16d   :  { %v4280_v13 = vadd.f32 %v2139_v29, %v1690_v12  ;;  %v1692_v14 = vpop.f32.mrb[45].mxu1  ;;  %v3534_v29 = vld [vmem:[%s4774_s0 + $0x54c] ss:$16 sps:$4 sm:$0xff]  }
 0x16e   :  { %v1693_v16 = vpop.f32.mrb[46].mxu1  ;;  %2378 = vmatmul.mubr.bf16.gmra.mrb[164].mxu0 %v3530_v25  ;;  %v3546_v14 = vld [vmem:[%s4774_s0 + $0x58c] ss:$16 sps:$4 sm:$0xff]   ;;  %v3537_v25 = vld [vmem:[%s4774_s0 + $0x544] ss:$16 sps:$4 sm:$0xff]  }
 0x16f   :  { %4812 = vst [vmem:[#allocation11_spill] sm:$0xff] %v4280_v13  ;;  %v4289_v18 = vadd.f32 %v2142_v33, %v1693_v16  ;;  %v1695_v21 = vpop.f32.mrb[47].mxu1  ;;  %3012 = vmatprep.mubr.msk.bf16.mxu0 %vm1411_vm0, %v3534_v29 }
 0x170   :  { %v3533_v21 = vld [vmem:[%s4774_s0 + $0x520] ss:$16 sps:$4 sm:$0xff]  }
 0x171   :  { %4813 = vst [vmem:[#allocation12_spill] sm:$0xff] %v4289_v18  ;;  %1905 = vmatmul.mubr.bf16.gmra.mrb[152].mxu1 %v3515_v15  ;;  %v2171_v44 = vpop.f32.mrb[60].mxu0 }
 0x172   :  { %1912 = vmatprep.mubr.bf16.mxu1 %v3519_v17  ;;  %v2173_v47 = vpop.f32.mrb[61].mxu0 }
 0x173   :  { %v2174_v49 = vpop.f32.mrb[62].mxu0 }
 0x174   :  { %v1698_v31 = vpop.f32.mrb[48].mxu1  ;;  %v2176_v53 = vpop.f32.mrb[63].mxu0 }
 0x175   :  { %v4297_v34 = vadd.f32 %v2147_v48, %v1698_v31  ;;  %v1700_v33 = vpop.f32.mrb[49].mxu1  ;;  %v3536_v48 = vld [vmem:[%s4774_s0 + $0x548] ss:$16 sps:$4 sm:$0xff]   ;;  %v3539_v53 = vld [vmem:[%s4774_s0 + $0x540] ss:$16 sps:$4 sm:$0xff]  }
 0x176   :  { %v1701_v37 = vpop.f32.mrb[50].mxu1  ;;  %2386 = vmatmul.mubr.bf16.gmra.mrb[168].mxu0 %v3536_v48 }
 0x177   :  { %4814 = vst [vmem:[#allocation13_spill] sm:$0xff] %v4297_v34  ;;  %v4306_v42 = vadd.f32 %v2150_v52, %v1701_v37  ;;  %v1703_v43 = vpop.f32.mrb[51].mxu1  ;;  %3013 = vmatprep.mubr.msk.bf16.mxu0 %vm1411_vm0, %v3540_v50 }
 0x178   :  { %v3552_v43 = vld [vmem:[%s4774_s0 + $0x5ac] ss:$16 sps:$4 sm:$0xff]  }
 0x179   :  { %4815 = vst [vmem:[#allocation14_spill] sm:$0xff] %v4306_v42  ;;  %1913 = vmatmul.mubr.bf16.gmra.mrb[156].mxu1 %v3521_v36  ;;  %v3548_v36 = vld [vmem:[%s4774_s0 + $0x588] ss:$16 sps:$4 sm:$0xff]  }
 0x17a   :  { %1920 = vmatprep.mubr.bf16.mxu1 %v3525_v39 }
 0x17c   :  { %v1706_v54 = vpop.f32.mrb[52].mxu1 }
 0x17d   :  { %v4314_v56 = vadd.f32 %v2155_v2, %v1706_v54  ;;  %v1708_v52 = vpop.f32.mrb[53].mxu1  ;;  %v2179_v2 = vpop.f32.mrb[64].mxu0 }
 0x17e   :  { %v1709_v61 = vpop.f32.mrb[54].mxu1  ;;  %v2181_v6 = vpop.f32.mrb[65].mxu0  ;;  %2394 = vmatmul.mubr.bf16.gmra.mrb[172].mxu0 %v3542_v8  ;;  %v3543_v52 = vld [vmem:[%s4774_s0 + $0x564] ss:$16 sps:$4 sm:$0xff]  }
 0x17f   :  { %v4325_v1 = vadd.f32 %v2158_v7, %v1709_v61  ;;  %v1711_v4 = vpop.f32.mrb[55].mxu1  ;;  %v2182_v12 = vpop.f32.mrb[66].mxu0  ;;  %3014 = vmatprep.mubr.msk.bf16.mxu0 %vm1411_vm0, %v3546_v14  ;;  %v3554_v6 = vld [vmem:[%s4774_s0 + $0x5a8] ss:$16 sps:$4 sm:$0xff]  }
 0x180   :  { %v2184_v15 = vpop.f32.mrb[67].mxu0 }
 0x181   :  { %1921 = vmatmul.mubr.bf16.gmra.mrb[160].mxu1 %v3527_v59  ;;  %v3558_v15 = vld [vmem:[%s4774_s0 + $0x5cc] ss:$16 sps:$4 sm:$0xff]  }
 0x182   :  { %1928 = vmatprep.mubr.bf16.mxu1 %v3531_v62 }
 0x184   :  { %v1714_v7 = vpop.f32.mrb[56].mxu1 }
 0x185   :  { %v4335_v16 = vadd.f32 %v2163_v22, %v1714_v7  ;;  %v1716_v17 = vpop.f32.mrb[57].mxu1  ;;  %v2187_v22 = vpop.f32.mrb[68].mxu0 }
 0x186   :  { %v1717_v23 = vpop.f32.mrb[58].mxu1  ;;  %v2189_v33 = vpop.f32.mrb[69].mxu0  ;;  %2402 = vmatmul.mubr.bf16.gmra.mrb[176].mxu0 %v3548_v36 }
 0x187   :  { %v4346_v30 = vadd.f32 %v2166_v28, %v1717_v23  ;;  %v1719_v31 = vpop.f32.mrb[59].mxu1  ;;  %v2190_v39 = vpop.f32.mrb[70].mxu0  ;;  %3015 = vmatprep.mubr.msk.bf16.mxu0 %vm1411_vm0, %v3552_v43  ;;  %v3545_v23 = vld [vmem:[%s4774_s0 + $0x560] ss:$16 sps:$4 sm:$0xff]   ;;  %v3588_v33 = vld [vmem:[%s4774_s0 + $0x66c] ss:$16 sps:$4 sm:$0xff]  }
 0x188   :  { %v2192_v47 = vpop.f32.mrb[71].mxu0  ;;  %v3549_v31 = vld [vmem:[%s4774_s0 + $0x584] ss:$16 sps:$4 sm:$0xff]  }
 0x189   :  { %1929 = vmatmul.mubr.bf16.gmra.mrb[164].mxu1 %v3533_v21 }
 0x18a   :  { %1936 = vmatprep.mubr.bf16.mxu1 %v3537_v25 }
 0x18c   :  { %v1722_v28 = vpop.f32.mrb[60].mxu1 }
 0x18d   :  { %v4356_v48 = vadd.f32 %v2171_v44, %v1722_v28  ;;  %v1724_v50 = vpop.f32.mrb[61].mxu1  ;;  %v2195_v44 = vpop.f32.mrb[72].mxu0  ;;  %v3560_v28 = vld [vmem:[%s4774_s0 + $0x5c8] ss:$16 sps:$4 sm:$0xff]  }
 0x18e   :  { %v1725_v54 = vpop.f32.mrb[62].mxu1  ;;  %v2197_v4 = vpop.f32.mrb[73].mxu0  ;;  %2410 = vmatmul.mubr.bf16.gmra.mrb[180].mxu0 %v3554_v6  ;;  %v3551_v6 = vld [vmem:[%s4774_s0 + $0x580] ss:$16 sps:$4 sm:$0xff]  }
 0x18f   :  { %v4367_v61 = vadd.f32 %v2174_v49, %v1725_v54  ;;  %v1727_v62 = vpop.f32.mrb[63].mxu1  ;;  %v2198_v14 = vpop.f32.mrb[74].mxu0  ;;  %3016 = vmatprep.mubr.msk.bf16.mxu0 %vm1411_vm0, %v3558_v15  ;;  %v3564_v54 = vld [vmem:[%s4774_s0 + $0x5ec] ss:$16 sps:$4 sm:$0xff]  }
 0x190   :  { %v2200_v7 = vpop.f32.mrb[75].mxu0 }
 0x191   :  { %1937 = vmatmul.mubr.bf16.gmra.mrb[168].mxu1 %v3539_v53  ;;  %v3555_v7 = vld [vmem:[%s4774_s0 + $0x5a4] ss:$16 sps:$4 sm:$0xff]  }
 0x192   :  { %1944 = vmatprep.mubr.bf16.mxu1 %v3543_v52 }
 0x194   :  { %v1730_v49 = vpop.f32.mrb[64].mxu1 }
 0x195   :  { %v4377_v17 = vadd.f32 %v2179_v2, %v1730_v49  ;;  %v1732_v21 = vpop.f32.mrb[65].mxu1  ;;  %v2203_v2 = vpop.f32.mrb[76].mxu0  ;;  %v3582_v49 = vld [vmem:[%s4774_s0 + $0x64c] ss:$16 sps:$4 sm:$0xff]  }
 0x196   :  { %v1733_v25 = vpop.f32.mrb[66].mxu1  ;;  %v2205_v47 = vpop.f32.mrb[77].mxu0  ;;  %2418 = vmatmul.mubr.bf16.gmra.mrb[184].mxu0 %v3560_v28  ;;  %v3570_v28 = vld [vmem:[%s4774_s0 + $0x60c] ss:$16 sps:$4 sm:$0xff]  }
 0x197   :  { %v4388_v36 = vadd.f32 %v2182_v12, %v1733_v25  ;;  %v1735_v43 = vpop.f32.mrb[67].mxu1  ;;  %v2206_v53 = vpop.f32.mrb[78].mxu0  ;;  %3017 = vmatprep.mubr.msk.bf16.mxu0 %vm1411_vm0, %v3564_v54 }
 0x198   :  { %v2208_v52 = vpop.f32.mrb[79].mxu0 }
 0x199   :  { %1945 = vmatmul.mubr.bf16.gmra.mrb[172].mxu1 %v3545_v23 }
 0x19a   :  { %1952 = vmatprep.mubr.bf16.mxu1 %v3549_v31  ;;  %v3566_v31 = vld [vmem:[%s4774_s0 + $0x5e8] ss:$16 sps:$4 sm:$0xff]  }
 0x19c   :  { %v1738_v12 = vpop.f32.mrb[68].mxu1 }
 0x19d   :  { %v4398_v62 = vadd.f32 %v2187_v22, %v1738_v12  ;;  %v1740_v4 = vpop.f32.mrb[69].mxu1  ;;  %v2211_v22 = vpop.f32.mrb[80].mxu0 }
 0x19e   :  { %v1741_v15 = vpop.f32.mrb[70].mxu1  ;;  %v2213_v25 = vpop.f32.mrb[81].mxu0  ;;  %2426 = vmatmul.mubr.bf16.gmra.mrb[188].mxu0 %v3566_v31  ;;  %v3557_v4 = vld [vmem:[%s4774_s0 + $0x5a0] ss:$16 sps:$4 sm:$0xff]  }
 0x19f   :  { %v4409_v21 = vadd.f32 %v2190_v39, %v1741_v15  ;;  %v1743_v23 = vpop.f32.mrb[71].mxu1  ;;  %v2214_v47 = vpop.f32.mrb[82].mxu0  ;;  %3018 = vmatprep.mubr.msk.bf16.mxu0 %vm1411_vm0, %v3570_v28 }
 0x1a0   :  { %v2216_v54 = vpop.f32.mrb[83].mxu0 }
 0x1a1   :  { %1953 = vmatmul.mubr.bf16.gmra.mrb[176].mxu1 %v3551_v6  ;;  %v3561_v6 = vld [vmem:[%s4774_s0 + $0x5c4] ss:$16 sps:$4 sm:$0xff]   ;;  %v3572_v54 = vld [vmem:[%s4774_s0 + $0x608] ss:$16 sps:$4 sm:$0xff]  }
 0x1a2   :  { %1960 = vmatprep.mubr.bf16.mxu1 %v3555_v7 }
 0x1a4   :  { %v1746_v39 = vpop.f32.mrb[72].mxu1 }
 0x1a5   :  { %v4419_v52 = vadd.f32 %v2195_v44, %v1746_v39  ;;  %v1748_v12 = vpop.f32.mrb[73].mxu1  ;;  %v2219_v44 = vpop.f32.mrb[84].mxu0 }
 0x1a6   :  { %v1749_v15 = vpop.f32.mrb[74].mxu1  ;;  %v2221_v31 = vpop.f32.mrb[85].mxu0  ;;  %v3576_v12 = vld [vmem:[%s4774_s0 + $0x62c] ss:$16 sps:$4 sm:$0xff]   ;;  %2434 = vmatmul.mubr.bf16.gmra.mrb[192].mxu0 %v3572_v54 }
 0x1a7   :  { %v4430_v23 = vadd.f32 %v2198_v14, %v1749_v15  ;;  %v1751_v25 = vpop.f32.mrb[75].mxu1  ;;  %v2222_v39 = vpop.f32.mrb[86].mxu0  ;;  %v3563_v31 = vld [vmem:[%s4774_s0 + $0x5c0] ss:$16 sps:$4 sm:$0xff]   ;;  %3019 = vmatprep.mubr.msk.bf16.mxu0 %vm1411_vm0, %v3576_v12 }
 0x1a8   :  { %v2224_v7 = vpop.f32.mrb[87].mxu0 }
 0x1a9   :  { %1961 = vmatmul.mubr.bf16.gmra.mrb[180].mxu1 %v3557_v4  ;;  %v3567_v4 = vld [vmem:[%s4774_s0 + $0x5e4] ss:$16 sps:$4 sm:$0xff]  }
 0x1aa   :  { %1968 = vmatprep.mubr.bf16.mxu1 %v3561_v6 }
 0x1ac   :  { %v1754_v14 = vpop.f32.mrb[76].mxu1 }
 0x1ad   :  { %v4440_v15 = vadd.f32 %v2203_v2, %v1754_v14  ;;  %v1756_v25 = vpop.f32.mrb[77].mxu1  ;;  %v2227_v2 = vpop.f32.mrb[88].mxu0 }
 0x1ae   :  { %v1757_v28 = vpop.f32.mrb[78].mxu1  ;;  %v2229_v14 = vpop.f32.mrb[89].mxu0  ;;  %v3578_v25 = vld [vmem:[%s4774_s0 + $0x628] ss:$16 sps:$4 sm:$0xff]  }
 0x1af   :  { %v4451_v7 = vadd.f32 %v2206_v53, %v1757_v28  ;;  %v1759_v54 = vpop.f32.mrb[79].mxu1  ;;  %v2230_v43 = vpop.f32.mrb[90].mxu0  ;;  %2442 = vmatmul.mubr.bf16.gmra.mrb[196].mxu0 %v3578_v25  ;;  %v3569_v14 = vld [vmem:[%s4774_s0 + $0x5e0] ss:$16 sps:$4 sm:$0xff]  }
 0x1b0   :  { %v2232_v6 = vpop.f32.mrb[91].mxu0  ;;  %3020 = vmatprep.mubr.msk.bf16.mxu0 %vm1411_vm0, %v3582_v49 }
 0x1b1   :  { %4816 = vst [vmem:[#allocation15_spill] sm:$0xff] %v4451_v7  ;;  %1969 = vmatmul.mubr.bf16.gmra.mrb[184].mxu1 %v3563_v31  ;;  %v3573_v31 = vld [vmem:[%s4774_s0 + $0x604] ss:$16 sps:$4 sm:$0xff]  }
 0x1b2   :  { %1976 = vmatprep.mubr.bf16.mxu1 %v3567_v4 }
 0x1b4   :  { %v1762_v53 = vpop.f32.mrb[80].mxu1 }
 0x1b5   :  { %v4461_v28 = vadd.f32 %v2211_v22, %v1762_v53  ;;  %v1764_v54 = vpop.f32.mrb[81].mxu1  ;;  %v2235_v22 = vpop.f32.mrb[92].mxu0 }
 0x1b6   :  { %v1765_v12 = vpop.f32.mrb[82].mxu1  ;;  %v2237_v53 = vpop.f32.mrb[93].mxu0  ;;  %v3584_v54 = vld [vmem:[%s4774_s0 + $0x648] ss:$16 sps:$4 sm:$0xff]  }
 0x1b7   :  { %4817 = vst [vmem:[#allocation16_spill] sm:$0xff] %v4461_v28  ;;  %v4472_v6 = vadd.f32 %v2214_v47, %v1765_v12  ;;  %v1767_v25 = vpop.f32.mrb[83].mxu1  ;;  %v2238_v50 = vpop.f32.mrb[94].mxu0  ;;  %2450 = vmatmul.mubr.bf16.gmra.mrb[200].mxu0 %v3584_v54  ;;  %v3575_v53 = vld [vmem:[%s4774_s0 + $0x600] ss:$16 sps:$4 sm:$0xff]  }
 0x1b8   :  { %v2240_v4 = vpop.f32.mrb[95].mxu0  ;;  %3021 = vmatprep.mubr.msk.bf16.mxu0 %vm1411_vm0, %v3588_v33 }
 0x1b9   :  { %4818 = vst [vmem:[#allocation17_spill] sm:$0xff] %v4472_v6  ;;  %1977 = vmatmul.mubr.bf16.gmra.mrb[188].mxu1 %v3569_v14  ;;  %v3579_v14 = vld [vmem:[%s4774_s0 + $0x624] ss:$16 sps:$4 sm:$0xff]  }
 0x1ba   :  { %1984 = vmatprep.mubr.bf16.mxu1 %v3573_v31 }
 0x1bc   :  { %v1770_v47 = vpop.f32.mrb[84].mxu1 }
 0x1bd   :  { %v4482_v12 = vadd.f32 %v2219_v44, %v1770_v47  ;;  %v1772_v25 = vpop.f32.mrb[85].mxu1  ;;  %v2243_v44 = vpop.f32.mrb[96].mxu0 }
 0x1be   :  { %v1773_v49 = vpop.f32.mrb[86].mxu1  ;;  %v2245_v47 = vpop.f32.mrb[97].mxu0  ;;  %v3590_v25 = vld [vmem:[%s4774_s0 + $0x668] ss:$16 sps:$4 sm:$0xff]  }
 0x1bf   :  { %4819 = vst [vmem:[#allocation18_spill] sm:$0xff] %v4482_v12  ;;  %v4493_v4 = vadd.f32 %v2222_v39, %v1773_v49  ;;  %v1775_v54 = vpop.f32.mrb[87].mxu1  ;;  %v2246_v8 = vpop.f32.mrb[98].mxu0  ;;  %2458 = vmatmul.mubr.bf16.gmra.mrb[204].mxu0 %v3590_v25  ;;  %v3581_v49 = vld [vmem:[%s4774_s0 + $0x620] ss:$16 sps:$4 sm:$0xff]  }
 0x1c0   :  { %v2248_v59 = vpop.f32.mrb[99].mxu0  ;;  %v3585_v47 = vld [vmem:[%s4774_s0 + $0x644] ss:$16 sps:$4 sm:$0xff]  }
 0x1c1   :  { %4820 = vst [vmem:[#allocation19_spill] sm:$0xff] %v4493_v4  ;;  %1985 = vmatmul.mubr.bf16.gmra.mrb[192].mxu1 %v3575_v53  ;;  %v3587_v53 = vld [vmem:[%s4774_s0 + $0x640] ss:$16 sps:$4 sm:$0xff]  }
 0x1c2   :  { %1992 = vmatprep.mubr.bf16.mxu1 %v3579_v14  ;;  %v2251_v14 = vpop.f32.mrb[100].mxu0 }
 0x1c3   :  { %v2253_v25 = vpop.f32.mrb[101].mxu0 }
 0x1c4   :  { %v1778_v37 = vpop.f32.mrb[88].mxu1 }
 0x1c5   :  { %v4500_v29 = vadd.f32 %v2227_v2, %v1778_v37  ;;  %v1780_v39 = vpop.f32.mrb[89].mxu1  ;;  %v2254_v2 = vpop.f32.mrb[102].mxu0 }
 0x1c6   :  { %v1781_v54 = vpop.f32.mrb[90].mxu1  ;;  %v2256_v39 = vpop.f32.mrb[103].mxu0 }
 0x1c7   :  { %4821 = vst [vmem:[#allocation20_spill] sm:$0xff] %v4500_v29  ;;  %v4510_v33 = vadd.f32 %v2230_v43, %v1781_v54  ;;  %v1783_v59 = vpop.f32.mrb[91].mxu1  ;;  %v3591_v54 = vld [vmem:[%s4774_s0 + $0x664] ss:$16 sps:$4 sm:$0xff]  }
 0x1c8   :  { %v3593_v59 = vld [vmem:[%s4774_s0 + $0x660] ss:$16 sps:$4 sm:$0xff]  }
 0x1c9   :  { %4822 = vst [vmem:[#allocation21_spill] sm:$0xff] %v4510_v33  ;;  %1993 = vmatmul.mubr.bf16.gmra.mrb[196].mxu1 %v3581_v49  ;;  %v2259_v25 = vpop.f32.mrb[104].mxu0 }
 0x1ca   :  { %2000 = vmatprep.mubr.bf16.mxu1 %v3585_v47  ;;  %v2261_v39 = vpop.f32.mrb[105].mxu0 }
 0x1cc   :  { %v1786_v31 = vpop.f32.mrb[92].mxu1 }
 0x1cd   :  { %v4514_v11 = vadd.f32 %v2235_v22, %v1786_v31  ;;  %v1788_v63 = vpop.f32.mrb[93].mxu1  ;;  %v2262_v22 = vpop.f32.mrb[106].mxu0 }
 0x1ce   :  { %v1789_v43 = vpop.f32.mrb[94].mxu1  ;;  %v2264_v31 = vpop.f32.mrb[107].mxu0 }
 0x1cf   :  { %4823 = vst [vmem:[#allocation22_spill] sm:$0xff] %v4514_v11  ;;  %v4524_v49 = vadd.f32 %v2238_v50, %v1789_v43  ;;  %v1791_v47 = vpop.f32.mrb[95].mxu1 }
 0x1d1   :  { %4824 = vst [vmem:[#allocation23_spill] sm:$0xff] %v4524_v49  ;;  %2001 = vmatmul.mubr.bf16.gmra.mrb[200].mxu1 %v3587_v53  ;;  %v2267_v63 = vpop.f32.mrb[108].mxu0 }
 0x1d2   :  { %2008 = vmatprep.mubr.bf16.mxu1 %v3591_v54  ;;  %v2269_v53 = vpop.f32.mrb[109].mxu0 }
 0x1d4   :  { %v1794_v37 = vpop.f32.mrb[96].mxu1 }
 0x1d5   :  { %v4528_v33 = vadd.f32 %v2243_v44, %v1794_v37  ;;  %v1796_v45 = vpop.f32.mrb[97].mxu1  ;;  %v2270_v44 = vpop.f32.mrb[110].mxu0 }
 0x1d6   :  { %v1797_v50 = vpop.f32.mrb[98].mxu1  ;;  %v2272_v37 = vpop.f32.mrb[111].mxu0 }
 0x1d7   :  { %4825 = vst [vmem:[#allocation24_spill] sm:$0xff] %v4528_v33  ;;  %v4535_v47 = vadd.f32 %v2246_v8, %v1797_v50  ;;  %v1799_v39 = vpop.f32.mrb[99].mxu1 }
 0x1d9   :  { %4826 = vst [vmem:[#allocation25_spill] sm:$0xff] %v4535_v47  ;;  %2009 = vmatmul.mubr.bf16.gmra.mrb[204].mxu1 %v3593_v59  ;;  %v2275_v50 = vpop.f32.mrb[112].mxu0 }
 0x1da   :  { %v2277_v39 = vpop.f32.mrb[113].mxu0 }
 0x1db   :  { %v2278_v54 = vpop.f32.mrb[114].mxu0 }
 0x1dc   :  { %v1802_v45 = vpop.f32.mrb[100].mxu1  ;;  %v2280_v59 = vpop.f32.mrb[115].mxu0 }
 0x1dd   :  { %v4539_v31 = vadd.f32 %v2251_v14, %v1802_v45  ;;  %v1804_v49 = vpop.f32.mrb[101].mxu1 }
 0x1de   :  { %v1805_v0 = vpop.f32.mrb[102].mxu1 }
 0x1df   :  { %4827 = vst [vmem:[#allocation26_spill] sm:$0xff] %v4539_v31  ;;  %v4543_v43 = vadd.f32 %v2254_v2, %v1805_v0  ;;  %v1807_v8 = vpop.f32.mrb[103].mxu1 }
 0x1e1   :  { %4828 = vst [vmem:[#allocation27_spill] sm:$0xff] %v4543_v43  ;;  %v2283_v33 = vpop.f32.mrb[116].mxu0 }
 0x1e2   :  { %v2285_v11 = vpop.f32.mrb[117].mxu0 }
 0x1e3   :  { %v2286_v0 = vpop.f32.mrb[118].mxu0 }
 0x1e4   :  { %v1810_v47 = vpop.f32.mrb[104].mxu1  ;;  %v2288_v2 = vpop.f32.mrb[119].mxu0 }
 0x1e5   :  { %v4547_v37 = vadd.f32 %v2259_v25, %v1810_v47  ;;  %v1812_v14 = vpop.f32.mrb[105].mxu1 }
 0x1e6   :  { %v1813_v45 = vpop.f32.mrb[106].mxu1 }
 0x1e7   :  { %v4549_v49 = vadd.f32 %v2262_v22, %v1813_v45  ;;  %v1815_v18 = vpop.f32.mrb[107].mxu1 }
 0x1e9   :  { %v2291_v43 = vpop.f32.mrb[120].mxu0 }
 0x1ea   :  { %v2293_v25 = vpop.f32.mrb[121].mxu0 }
 0x1eb   :  { %v2294_v47 = vpop.f32.mrb[122].mxu0 }
 0x1ec   :  { %v1818_v8 = vpop.f32.mrb[108].mxu1  ;;  %v2296_v14 = vpop.f32.mrb[123].mxu0 }
 0x1ed   :  { %v4551_v31 = vadd.f32 %v2267_v63, %v1818_v8  ;;  %v1820_v39 = vpop.f32.mrb[109].mxu1 }
 0x1ee   :  { %v1821_v34 = vpop.f32.mrb[110].mxu1 }
 0x1ef   :  { %v4553_v53 = vadd.f32 %v2270_v44, %v1821_v34  ;;  %v1823_v59 = vpop.f32.mrb[111].mxu1 }
 0x1f1   :  { %v2299_v13 = vpop.f32.mrb[124].mxu0 }
 0x1f2   :  { %v2301_v63 = vpop.f32.mrb[125].mxu0 }
 0x1f3   :  { %v2302_v8 = vpop.f32.mrb[126].mxu0 }
 0x1f4   :  { %v1826_v42 = vpop.f32.mrb[112].mxu1  ;;  %v2304_v39 = vpop.f32.mrb[127].mxu0 }
 0x1f5   :  { %v4555_v22 = vadd.f32 %v2275_v50, %v1826_v42  ;;  %v1828_v18 = vpop.f32.mrb[113].mxu1 }
 0x1f6   :  { %v1829_v45 = vpop.f32.mrb[114].mxu1 }
 0x1f7   :  { %v4557_v11 = vadd.f32 %v2278_v54, %v1829_v45  ;;  %v1831_v2 = vpop.f32.mrb[115].mxu1 }
 0x1f9   :  { %v2307_v29 = vpop.f32.mrb[128].mxu0 }
 0x1fa   :  { %v2309_v42 = vpop.f32.mrb[129].mxu0 }
 0x1fb   :  { %v2310_v50 = vpop.f32.mrb[130].mxu0 }
 0x1fc   :  { %v1834_v58 = vpop.f32.mrb[116].mxu1  ;;  %v2312_v18 = vpop.f32.mrb[131].mxu0 }
 0x1fd   :  { %v4559_v34 = vadd.f32 %v2283_v33, %v1834_v58  ;;  %v1836_v44 = vpop.f32.mrb[117].mxu1 }
 0x1fe   :  { %v1837_v59 = vpop.f32.mrb[118].mxu1 }
 0x1ff   :  { %v4561_v25 = vadd.f32 %v2286_v0, %v1837_v59  ;;  %v1839_v14 = vpop.f32.mrb[119].mxu1 }
 0x201   :  { %v2315_v4 = vpop.f32.mrb[132].mxu0 }
 0x202   :  { %v2317_v58 = vpop.f32.mrb[133].mxu0 }
 0x203   :  { %v2318_v33 = vpop.f32.mrb[134].mxu0 }
 0x204   :  { %v1842_v38 = vpop.f32.mrb[120].mxu1  ;;  %v2320_v44 = vpop.f32.mrb[135].mxu0 }
 0x205   :  { %v4563_v54 = vadd.f32 %v2291_v43, %v1842_v38  ;;  %v1844_v45 = vpop.f32.mrb[121].mxu1 }
 0x206   :  { %v1845_v2 = vpop.f32.mrb[122].mxu1 }
 0x207   :  { %v4565_v63 = vadd.f32 %v2294_v47, %v1845_v2  ;;  %v1847_v39 = vpop.f32.mrb[123].mxu1 }
 0x209   :  { %v2323_v12 = vpop.f32.mrb[136].mxu0 }
 0x20a   :  { %v2325_v38 = vpop.f32.mrb[137].mxu0 }
 0x20b   :  { %v2326_v43 = vpop.f32.mrb[138].mxu0 }
 0x20c   :  { %v1850_v26 = vpop.f32.mrb[124].mxu1  ;;  %v2328_v45 = vpop.f32.mrb[139].mxu0 }
 0x20d   :  { %v4567_v0 = vadd.f32 %v2299_v13, %v1850_v26  ;;  %v1852_v59 = vpop.f32.mrb[125].mxu1 }
 0x20e   :  { %v1853_v14 = vpop.f32.mrb[126].mxu1 }
 0x20f   :  { %v4569_v42 = vadd.f32 %v2302_v8, %v1853_v14  ;;  %v1855_v18 = vpop.f32.mrb[127].mxu1 }
 0x211   :  { %v2331_v6 = vpop.f32.mrb[140].mxu0 }
 0x212   :  { %v2333_v26 = vpop.f32.mrb[141].mxu0 }
 0x213   :  { %v2334_v13 = vpop.f32.mrb[142].mxu0 }
 0x214   :  { %v1858_v20 = vpop.f32.mrb[128].mxu1  ;;  %v2336_v59 = vpop.f32.mrb[143].mxu0 }
 0x215   :  { %v4571_v47 = vadd.f32 %v2307_v29, %v1858_v20  ;;  %v1860_v2 = vpop.f32.mrb[129].mxu1 }
 0x216   :  { %v1861_v39 = vpop.f32.mrb[130].mxu1 }
 0x217   :  { %v4573_v58 = vadd.f32 %v2310_v50, %v1861_v39  ;;  %v1863_v44 = vpop.f32.mrb[131].mxu1 }
 0x219   :  { %v2339_v28 = vpop.f32.mrb[144].mxu0 }
 0x21a   :  { %v2341_v20 = vpop.f32.mrb[145].mxu0 }
 0x21b   :  { %v2342_v29 = vpop.f32.mrb[146].mxu0 }
 0x21c   :  { %v1866_v9 = vpop.f32.mrb[132].mxu1  ;;  %v2344_v2 = vpop.f32.mrb[147].mxu0 }
 0x21d   :  { %v4575_v8 = vadd.f32 %v2315_v4, %v1866_v9  ;;  %v1868_v14 = vpop.f32.mrb[133].mxu1 }
 0x21e   :  { %v1869_v18 = vpop.f32.mrb[134].mxu1 }
 0x21f   :  { %4829 = vst [vmem:[#allocation28_spill] sm:$0xff] %v4575_v8  ;;  %v4577_v38 = vadd.f32 %v2318_v33, %v1869_v18  ;;  %v1871_v45 = vpop.f32.mrb[135].mxu1 }
 0x221   :  { %4830 = vst [vmem:[#allocation29_spill] sm:$0xff] %v4577_v38  ;;  %v2347_v7 = vpop.f32.mrb[148].mxu0 }
 0x222   :  { %v2349_v9 = vpop.f32.mrb[149].mxu0 }
 0x223   :  { %v2350_v4 = vpop.f32.mrb[150].mxu0 }
 0x224   :  { %v1874_v3 = vpop.f32.mrb[136].mxu1  ;;  %v2352_v14 = vpop.f32.mrb[151].mxu0 }
 0x225   :  { %v4579_v50 = vadd.f32 %v2323_v12, %v1874_v3  ;;  %v1876_v39 = vpop.f32.mrb[137].mxu1 }
 0x226   :  { %v1877_v44 = vpop.f32.mrb[138].mxu1 }
 0x227   :  { %4831 = vst [vmem:[#allocation30_spill] sm:$0xff] %v4579_v50  ;;  %v4581_v26 = vadd.f32 %v2326_v43, %v1877_v44  ;;  %v1879_v59 = vpop.f32.mrb[139].mxu1 }
 0x229   :  { %4832 = vst [vmem:[#allocation31_spill] sm:$0xff] %v4581_v26  ;;  %v2355_v38 = vpop.f32.mrb[152].mxu0 }
 0x22a   :  { %v2357_v3 = vpop.f32.mrb[153].mxu0 }
 0x22b   :  { %v2358_v12 = vpop.f32.mrb[154].mxu0 }
 0x22c   :  { %v1882_v8 = vpop.f32.mrb[140].mxu1  ;;  %v2360_v39 = vpop.f32.mrb[155].mxu0 }
 0x22d   :  { %v4583_v33 = vadd.f32 %v2331_v6, %v1882_v8  ;;  %v1884_v18 = vpop.f32.mrb[141].mxu1 }
 0x22e   :  { %v1885_v45 = vpop.f32.mrb[142].mxu1 }
 0x22f   :  { %4833 = vst [vmem:[#allocation32_spill] sm:$0xff] %v4583_v33  ;;  %v4585_v20 = vadd.f32 %v2334_v13, %v1885_v45  ;;  %v1887_v2 = vpop.f32.mrb[143].mxu1 }
 0x231   :  { %4834 = vst [vmem:[#allocation33_spill] sm:$0xff] %v4585_v20  ;;  %v2363_v26 = vpop.f32.mrb[156].mxu0 }
 0x232   :  { %v2365_v6 = vpop.f32.mrb[157].mxu0 }
 0x233   :  { %v2366_v8 = vpop.f32.mrb[158].mxu0 }
 0x234   :  { %v1890_v50 = vpop.f32.mrb[144].mxu1  ;;  %v2368_v18 = vpop.f32.mrb[159].mxu0 }
 0x235   :  { %v4587_v43 = vadd.f32 %v2339_v28, %v1890_v50  ;;  %v1892_v44 = vpop.f32.mrb[145].mxu1 }
 0x236   :  { %v1893_v59 = vpop.f32.mrb[146].mxu1 }
 0x237   :  { %4835 = vst [vmem:[#allocation34_spill] sm:$0xff] %v4587_v43  ;;  %v4589_v9 = vadd.f32 %v2342_v29, %v1893_v59  ;;  %v1895_v14 = vpop.f32.mrb[147].mxu1 }
 0x239   :  { %4836 = vst [vmem:[#allocation35_spill] sm:$0xff] %v4589_v9  ;;  %v2371_v20 = vpop.f32.mrb[160].mxu0 }
 0x23a   :  { %v2373_v28 = vpop.f32.mrb[161].mxu0 }
 0x23b   :  { %v2374_v50 = vpop.f32.mrb[162].mxu0 }
 0x23c   :  { %v1898_v33 = vpop.f32.mrb[148].mxu1  ;;  %v2376_v44 = vpop.f32.mrb[163].mxu0 }
 0x23d   :  { %v4591_v13 = vadd.f32 %v2347_v7, %v1898_v33  ;;  %v1900_v45 = vpop.f32.mrb[149].mxu1 }
 0x23e   :  { %v1901_v2 = vpop.f32.mrb[150].mxu1 }
 0x23f   :  { %4837 = vst [vmem:[#allocation36_spill] sm:$0xff] %v4591_v13  ;;  %v4593_v3 = vadd.f32 %v2350_v4, %v1901_v2  ;;  %v1903_v39 = vpop.f32.mrb[151].mxu1 }
 0x241   :  { %4838 = vst [vmem:[#allocation37_spill] sm:$0xff] %v4593_v3  ;;  %v2379_v9 = vpop.f32.mrb[164].mxu0 }
 0x242   :  { %v2381_v7 = vpop.f32.mrb[165].mxu0 }
 0x243   :  { %v2382_v33 = vpop.f32.mrb[166].mxu0 }
 0x244   :  { %v1906_v43 = vpop.f32.mrb[152].mxu1  ;;  %v2384_v45 = vpop.f32.mrb[167].mxu0 }
 0x245   :  { %v4595_v29 = vadd.f32 %v2355_v38, %v1906_v43  ;;  %v1908_v59 = vpop.f32.mrb[153].mxu1  ;;  %v4603_v38 = vld [vmem:[%s4775_s2] ss:$0 sm:$0xff]  ;;  %v4839_v43 = vmax.f32 %v4093_v27, %v4314_v56 }
 0x246   :  { %v1909_v14 = vpop.f32.mrb[154].mxu1 }
 0x247   :  { %v4597_v6 = vadd.f32 %v2358_v12, %v1909_v14  ;;  %v1911_v18 = vpop.f32.mrb[155].mxu1 }
 0x249   :  { %v2387_v57 = vpop.f32.mrb[168].mxu0 }
 0x24a   :  { %v2389_v12 = vpop.f32.mrb[169].mxu0 }
 0x24c   :  { %v1914_v13 = vpop.f32.mrb[156].mxu1 }
 0x24d   :  { %v2364_v4 = vadd.f32 %v2363_v26, %v1914_v13  ;;  %v1916_v2 = vpop.f32.mrb[157].mxu1  ;;  %v2390_v26 = vpop.f32.mrb[170].mxu0 }
 0x24e   :  { %v1917_v39 = vpop.f32.mrb[158].mxu1  ;;  %v2392_v13 = vpop.f32.mrb[171].mxu0 }
 0x24f   :  { %v2492_v28 = vmax.f32 %v4547_v37, %v2364_v4  ;;  %v2367_v3 = vadd.f32 %v2366_v8, %v1917_v39  ;;  %v1919_v44 = vpop.f32.mrb[159].mxu1  ;;  %v4840_v37 = vmax.f32 %v4102_v32, %v4325_v1 }
 0x251   :  { %v2518_v59 = vmax.f32 %v4839_v43, %v2492_v28  ;;  %v2493_v14 = vmax.f32 %v4549_v49, %v2367_v3  ;;  %v2395_v3 = vpop.f32.mrb[172].mxu0 }
 0x252   :  { %v2397_v28 = vpop.f32.mrb[173].mxu0 }
 0x253   :  { %v2551_v18 = vadd.f32 %v4603_v38, %v2518_v59  ;;  %v2519_v8 = vmax.f32 %v4840_v37, %v2493_v14  ;;  %v4841_v59 = vmax.f32 %v4110_v41, %v4335_v16  ;;  %v2398_v14 = vpop.f32.mrb[174].mxu0 }
 0x254   :  { %v1922_v7 = vpop.f32.mrb[160].mxu1  ;;  %v2400_v13 = vpop.f32.mrb[175].mxu0 }
 0x255   :  { %v2552_v45 = vadd.f32 %v4603_v38, %v2519_v8  ;;  %v2372_v4 = vadd.f32 %v2371_v20, %v1922_v7  ;;  %v1924_v2 = vpop.f32.mrb[161].mxu1  ;;  %v2577_v44 = vmax.f32 %v2551_v18, 0.0 }
 0x256   :  { %v1925_v39 = vpop.f32.mrb[162].mxu1 }
 0x257   :  { %v2578_v12 = vmax.f32 %v2552_v45, 0.0  ;;  %v2494_v27 = vmax.f32 %v4551_v31, %v2372_v4  ;;  %v2375_v56 = vadd.f32 %v2374_v50, %v1925_v39  ;;  %v1927_v49 = vpop.f32.mrb[163].mxu1  ;;  %v4842_v31 = vmax.f32 %v4119_v46, %v4346_v30 }
 0x259   :  { %v3078_v43 = vpack.c.bf16 %v2578_v12, %v2577_v44  ;;  %v2520_v32 = vmax.f32 %v4841_v59, %v2494_v27  ;;  %v2495_v1 = vmax.f32 %v4553_v53, %v2375_v56  ;;  %v2403_v39 = vpop.f32.mrb[176].mxu0  ;;  %v4843_v27 = vmax.f32 %v4127_v55, %v4356_v48 }
 0x25a   :  { %v2405_v44 = vpop.f32.mrb[177].mxu0 }
 0x25b   :  { %3079 = vst [vmem:[%s4776_s3] sm:$0xff] %v3078_v43   ;;  %v2553_v20 = vadd.f32 %v4603_v38, %v2520_v32  ;;  %v2521_v50 = vmax.f32 %v4842_v31, %v2495_v1  ;;  %v2406_v56 = vpop.f32.mrb[178].mxu0 }
 0x25c   :  { %v1930_v18 = vpop.f32.mrb[164].mxu1  ;;  %v2408_v49 = vpop.f32.mrb[179].mxu0 }
 0x25d   :  { %v2554_v37 = vadd.f32 %v4603_v38, %v2521_v50  ;;  %v2380_v8 = vadd.f32 %v2379_v9, %v1930_v18  ;;  %v1932_v41 = vpop.f32.mrb[165].mxu1  ;;  %v2579_v7 = vmax.f32 %v2553_v20, 0.0 }
 0x25e   :  { %v1933_v16 = vpop.f32.mrb[166].mxu1 }
 0x25f   :  { %v2580_v53 = vmax.f32 %v2554_v37, 0.0  ;;  %v2496_v45 = vmax.f32 %v4555_v22, %v2380_v8  ;;  %v2383_v4 = vadd.f32 %v2382_v33, %v1933_v16  ;;  %v1935_v2 = vpop.f32.mrb[167].mxu1  ;;  %v4844_v22 = vmax.f32 %v4136_v60, %v4367_v61 }
 0x260   :  { %v4845_v37 = vmax.f32 %v4144_v5, %v4377_v17 }
 0x261   :  { %v3083_v12 = vpack.c.bf16 %v2580_v53, %v2579_v7  ;;  %v2522_v46 = vmax.f32 %v4843_v27, %v2496_v45  ;;  %v2497_v30 = vmax.f32 %v4557_v11, %v2383_v4  ;;  %v2411_v31 = vpop.f32.mrb[180].mxu0 }
 0x262   :  { %v2413_v50 = vpop.f32.mrb[181].mxu0 }
 0x263   :  { %3140 = vst [vmem:[%s4776_s3 + $0x8] sm:$0xff] %v3083_v12   ;;  %v2555_v9 = vadd.f32 %v4603_v38, %v2522_v46  ;;  %v2523_v33 = vmax.f32 %v4844_v22, %v2497_v30  ;;  %v2414_v8 = vpop.f32.mrb[182].mxu0  ;;  %v4847_v30 = vmax.f32 %v4161_v19, %v4398_v62 }
 0x264   :  { %v1938_v28 = vpop.f32.mrb[168].mxu1  ;;  %v2416_v41 = vpop.f32.mrb[183].mxu0 }
 0x265   :  { %v2556_v43 = vadd.f32 %v4603_v38, %v2523_v33  ;;  %v2388_v59 = vadd.f32 %v2387_v57, %v1938_v28  ;;  %v1940_v55 = vpop.f32.mrb[169].mxu1  ;;  %v2581_v32 = vmax.f32 %v2555_v9, 0.0 }
 0x266   :  { %v1941_v48 = vpop.f32.mrb[170].mxu1 }
 0x267   :  { %v2582_v11 = vmax.f32 %v2556_v43, 0.0  ;;  %v2498_v1 = vmax.f32 %v4559_v34, %v2388_v59  ;;  %v2391_v13 = vadd.f32 %v2390_v26, %v1941_v48  ;;  %v1943_v20 = vpop.f32.mrb[171].mxu1  ;;  %v4846_v34 = vmax.f32 %v4153_v10, %v4388_v36 }
 0x269   :  { %v3088_v18 = vpack.c.bf16 %v2582_v11, %v2581_v32  ;;  %v2524_v60 = vmax.f32 %v4845_v37, %v2498_v1  ;;  %v2499_v61 = vmax.f32 %v4561_v25, %v2391_v13  ;;  %v2419_v12 = vpop.f32.mrb[184].mxu0  ;;  %v4849_v13 = vmax.f32 %v4178_v35, %v4419_v52 }
 0x26a   :  { %v2421_v27 = vpop.f32.mrb[185].mxu0 }
 0x26b   :  { %3141 = vst [vmem:[%s4776_s3 + $0x10] sm:$0xff] %v3088_v18   ;;  %v2557_v57 = vadd.f32 %v4603_v38, %v2524_v60  ;;  %v2525_v26 = vmax.f32 %v4846_v34, %v2499_v61  ;;  %v2422_v49 = vpop.f32.mrb[186].mxu0 }
 0x26c   :  { %v1946_v16 = vpop.f32.mrb[172].mxu1  ;;  %v2424_v9 = vpop.f32.mrb[187].mxu0 }
 0x26d   :  { %v2558_v7 = vadd.f32 %v4603_v38, %v2525_v26  ;;  %v2396_v53 = vadd.f32 %v2395_v3, %v1946_v16  ;;  %v1948_v5 = vpop.f32.mrb[173].mxu1  ;;  %v2583_v45 = vmax.f32 %v2557_v57, 0.0 }
 0x26e   :  { %v1949_v17 = vpop.f32.mrb[174].mxu1 }
 0x26f   :  { %v2584_v25 = vmax.f32 %v2558_v7, 0.0  ;;  %v2500_v4 = vmax.f32 %v4563_v54, %v2396_v53  ;;  %v2399_v2 = vadd.f32 %v2398_v14, %v1949_v17  ;;  %v1951_v44 = vpop.f32.mrb[175].mxu1  ;;  %v4848_v54 = vmax.f32 %v4170_v24, %v4409_v21 }
 0x270   :  { %v4851_v53 = vmax.f32 %v4195_v51, %v4440_v15 }
 0x271   :  { %v3093_v46 = vpack.c.bf16 %v2584_v25, %v2583_v45  ;;  %v2526_v10 = vmax.f32 %v4847_v30, %v2500_v4  ;;  %v2501_v36 = vmax.f32 %v4565_v63, %v2399_v2  ;;  %v2427_v32 = vpop.f32.mrb[188].mxu0 }
 0x272   :  { %v2429_v11 = vpop.f32.mrb[189].mxu0 }
 0x273   :  { %3142 = vst [vmem:[%s4776_s3 + $0x18] sm:$0xff] %v3093_v46   ;;  %v2559_v3 = vadd.f32 %v4603_v38, %v2526_v10  ;;  %v2527_v14 = vmax.f32 %v4848_v54, %v2501_v36  ;;  %v2430_v20 = vpop.f32.mrb[190].mxu0  ;;  %v4855_v46 = vld [vmem:[#allocation28_spill] sm:$0xff] }
 0x274   :  { %v1954_v22 = vpop.f32.mrb[176].mxu1  ;;  %v2432_v50 = vpop.f32.mrb[191].mxu0 }
 0x275   :  { %v2560_v33 = vadd.f32 %v4603_v38, %v2527_v14  ;;  %v2404_v28 = vadd.f32 %v2403_v39, %v1954_v22  ;;  %v1956_v19 = vpop.f32.mrb[177].mxu1  ;;  %v2585_v43 = vmax.f32 %v2559_v3, 0.0  ;;  %v4856_v14 = vld [vmem:[#allocation3_spill] sm:$0xff]  ;;  %v4857_v22 = vld [vmem:[#allocation16_spill] sm:$0xff] }
 0x276   :  { %v1957_v62 = vpop.f32.mrb[178].mxu1  ;;  %v4859_v19 = vld [vmem:[#allocation29_spill] sm:$0xff] }
 0x277   :  { %v2586_v63 = vmax.f32 %v2560_v33, 0.0  ;;  %v2502_v59 = vmax.f32 %v4567_v0, %v2404_v28  ;;  %v2407_v55 = vadd.f32 %v2406_v56, %v1957_v62  ;;  %v1959_v48 = vpop.f32.mrb[179].mxu1  ;;  %v4850_v0 = vmax.f32 %v4187_v40, %v4430_v23 }
 0x278   :  { %v4858_v33 = vmax.f32 %v4856_v14, %v4857_v22  ;;  %v4875_v14 = vld [vmem:[#allocation33_spill] sm:$0xff] }
 0x279   :  { %v3098_v1 = vpack.c.bf16 %v2586_v63, %v2585_v43  ;;  %v2528_v24 = vmax.f32 %v4849_v13, %v2502_v59  ;;  %v2503_v21 = vmax.f32 %v4569_v42, %v2407_v55  ;;  %v2435_v26 = vpop.f32.mrb[192].mxu0  ;;  %v4860_v59 = vld [vmem:[#allocation4_spill] sm:$0xff] }
 0x27a   :  { %v2437_v16 = vpop.f32.mrb[193].mxu0 }
 0x27b   :  { %3143 = vst [vmem:[%s4776_s3 + $0x20] sm:$0xff] %v3098_v1   ;;  %v2561_v39 = vadd.f32 %v4603_v38, %v2528_v24  ;;  %v2529_v56 = vmax.f32 %v4850_v0, %v2503_v21  ;;  %v2438_v5 = vpop.f32.mrb[194].mxu0  ;;  %v4863_v0 = vld [vmem:[#allocation30_spill] sm:$0xff] }
 0x27c   :  { %v1962_v18 = vpop.f32.mrb[180].mxu1  ;;  %v2440_v17 = vpop.f32.mrb[195].mxu0 }
 0x27d   :  { %v2562_v37 = vadd.f32 %v4603_v38, %v2529_v56  ;;  %v2412_v60 = vadd.f32 %v2411_v31, %v1962_v18  ;;  %v1964_v35 = vpop.f32.mrb[181].mxu1  ;;  %v2587_v61 = vmax.f32 %v2561_v39, 0.0 }
 0x27e   :  { %v1965_v52 = vpop.f32.mrb[182].mxu1 }
 0x27f   :  { %v2588_v42 = vmax.f32 %v2562_v37, 0.0  ;;  %v2504_v41 = vmax.f32 %v4571_v47, %v2412_v60  ;;  %v2415_v57 = vadd.f32 %v2414_v8, %v1965_v52  ;;  %v1967_v34 = vpop.f32.mrb[183].mxu1  ;;  %v4852_v47 = vld [vmem:[#allocation2_spill] sm:$0xff]  ;;  %v4853_v8 = vld [vmem:[#allocation15_spill] sm:$0xff] }
 0x280   :  { %v4854_v45 = vmax.f32 %v4852_v47, %v4853_v8  ;;  %v4867_v34 = vld [vmem:[#allocation31_spill] sm:$0xff] }
 0x281   :  { %v3103_v7 = vpack.c.bf16 %v2588_v42, %v2587_v61  ;;  %v2530_v40 = vmax.f32 %v4851_v53, %v2504_v41  ;;  %v2505_v23 = vmax.f32 %v4573_v58, %v2415_v57  ;;  %v4864_v61 = vld [vmem:[#allocation5_spill] sm:$0xff]  ;;  %v4865_v42 = vld [vmem:[#allocation18_spill] sm:$0xff] }
 0x282   :  { %v2443_v9 = vpop.f32.mrb[196].mxu0  ;;  %v4866_v41 = vmax.f32 %v4864_v61, %v4865_v42  ;;  %v4884_v61 = vld [vmem:[#allocation10_spill] sm:$0xff]  ;;  %v4885_v42 = vld [vmem:[#allocation23_spill] sm:$0xff] }
 0x283   :  { %3144 = vst [vmem:[%s4776_s3 + $0x28] sm:$0xff] %v3103_v7   ;;  %v2563_v31 = vadd.f32 %v4603_v38, %v2530_v40  ;;  %v2531_v25 = vmax.f32 %v4854_v45, %v2505_v23  ;;  %v2445_v3 = vpop.f32.mrb[197].mxu0  ;;  %v4868_v40 = vld [vmem:[#allocation6_spill] sm:$0xff] }
 0x284   :  { %v1970_v4 = vpop.f32.mrb[184].mxu1  ;;  %v2446_v43 = vpop.f32.mrb[198].mxu0 }
 0x285   :  { %v2564_v2 = vadd.f32 %v4603_v38, %v2531_v25  ;;  %v2420_v44 = vadd.f32 %v2419_v12, %v1970_v4  ;;  %v1972_v51 = vpop.f32.mrb[185].mxu1  ;;  %v2589_v27 = vmax.f32 %v2563_v31, 0.0  ;;  %v2448_v63 = vpop.f32.mrb[199].mxu0 }
 0x286   :  { %v1973_v15 = vpop.f32.mrb[186].mxu1 }
 0x287   :  { %v2590_v58 = vmax.f32 %v2564_v2, 0.0  ;;  %v2506_v30 = vmax.f32 %v4855_v46, %v2420_v44  ;;  %v2423_v10 = vadd.f32 %v2422_v49, %v1973_v15  ;;  %v1975_v36 = vpop.f32.mrb[187].mxu1  ;;  %v4861_v49 = vld [vmem:[#allocation17_spill] sm:$0xff]  ;;  %v4871_v44 = vld [vmem:[#allocation32_spill] sm:$0xff] }
 0x288   :  { %v4862_v55 = vmax.f32 %v4860_v59, %v4861_v49  ;;  %v4873_v36 = vld [vmem:[#allocation20_spill] sm:$0xff] }
 0x289   :  { %v3108_v54 = vpack.c.bf16 %v2590_v58, %v2589_v27  ;;  %v2532_v28 = vmax.f32 %v4858_v33, %v2506_v30  ;;  %v2507_v62 = vmax.f32 %v4859_v19, %v2423_v10  ;;  %v4872_v10 = vld [vmem:[#allocation7_spill] sm:$0xff]  ;;  %v4876_v19 = vld [vmem:[#allocation8_spill] sm:$0xff] }
 0x28a   :  { %v2451_v60 = vpop.f32.mrb[200].mxu0  ;;  %v4874_v3 = vmax.f32 %v4872_v10, %v4873_v36 }
 0x28b   :  { %3145 = vst [vmem:[%s4776_s3 + $0x30] sm:$0xff] %v3108_v54   ;;  %v2565_v12 = vadd.f32 %v4603_v38, %v2532_v28  ;;  %v2533_v48 = vmax.f32 %v4862_v55, %v2507_v62  ;;  %v2453_v35 = vpop.f32.mrb[201].mxu0 }
 0x28c   :  { %v1978_v11 = vpop.f32.mrb[188].mxu1  ;;  %v2454_v7 = vpop.f32.mrb[202].mxu0  ;;  %v4883_v35 = vld [vmem:[#allocation35_spill] sm:$0xff] }
 0x28d   :  { %v2566_v1 = vadd.f32 %v4603_v38, %v2533_v48  ;;  %v2428_v13 = vadd.f32 %v2427_v32, %v1978_v11  ;;  %v1980_v24 = vpop.f32.mrb[189].mxu1  ;;  %v2591_v50 = vmax.f32 %v2565_v12, 0.0  ;;  %v2456_v53 = vpop.f32.mrb[203].mxu0 }
 0x28e   :  { %v1981_v21 = vpop.f32.mrb[190].mxu1 }
 0x28f   :  { %v2592_v39 = vmax.f32 %v2566_v1, 0.0  ;;  %v2508_v56 = vmax.f32 %v4863_v0, %v2428_v13  ;;  %v2431_v18 = vadd.f32 %v2430_v20, %v1981_v21  ;;  %v1983_v37 = vpop.f32.mrb[191].mxu1  ;;  %v4869_v20 = vld [vmem:[#allocation19_spill] sm:$0xff]  ;;  %v4879_v13 = vld [vmem:[#allocation34_spill] sm:$0xff]  ;;  %v4880_v0 = vld [vmem:[#allocation9_spill] sm:$0xff] }
 0x290   :  { %v4870_v23 = vmax.f32 %v4868_v40, %v4869_v20 }
 0x291   :  { %v3113_v52 = vpack.c.bf16 %v2592_v39, %v2591_v50  ;;  %v2534_v57 = vmax.f32 %v4866_v41, %v2508_v56  ;;  %v2509_v16 = vmax.f32 %v4867_v34, %v2431_v18  ;;  %v4881_v56 = vld [vmem:[#allocation22_spill] sm:$0xff]  ;;  %v4886_v41 = vmax.f32 %v4884_v61, %v4885_v42 }
 0x292   :  { %v2459_v58 = vpop.f32.mrb[204].mxu0  ;;  %v4882_v18 = vmax.f32 %v4880_v0, %v4881_v56 }
 0x293   :  { %3146 = vst [vmem:[%s4776_s3 + $0x38] sm:$0xff] %v3113_v52   ;;  %v2567_v32 = vadd.f32 %v4603_v38, %v2534_v57  ;;  %v2535_v17 = vmax.f32 %v4870_v23, %v2509_v16  ;;  %v2461_v46 = vpop.f32.mrb[205].mxu0  ;;  %v4887_v23 = vld [vmem:[#allocation36_spill] sm:$0xff] }
 0x294   :  { %v1986_v31 = vpop.f32.mrb[192].mxu1  ;;  %v2462_v33 = vpop.f32.mrb[206].mxu0 }
 0x295   :  { %v2568_v47 = vadd.f32 %v4603_v38, %v2535_v17  ;;  %v2436_v8 = vadd.f32 %v2435_v26, %v1986_v31  ;;  %v1988_v45 = vpop.f32.mrb[193].mxu1  ;;  %v2593_v4 = vmax.f32 %v2567_v32, 0.0  ;;  %v2464_v28 = vpop.f32.mrb[207].mxu0 }
 0x296   :  { %v1989_v25 = vpop.f32.mrb[194].mxu1  ;;  %v4888_v45 = vld [vmem:[#allocation11_spill] sm:$0xff] }
 0x297   :  { %v2594_v2 = vmax.f32 %v2568_v47, 0.0  ;;  %v2510_v51 = vmax.f32 %v4871_v44, %v2436_v8  ;;  %v2439_v15 = vadd.f32 %v2438_v5, %v1989_v25  ;;  %v1991_v27 = vpop.f32.mrb[195].mxu1  ;;  %v4877_v5 = vld [vmem:[#allocation21_spill] sm:$0xff]  ;;  %v4889_v25 = vld [vmem:[#allocation24_spill] sm:$0xff] }
 0x298   :  { %v4878_v62 = vmax.f32 %v4876_v19, %v4877_v5  ;;  %v4891_v44 = vld [vmem:[#allocation37_spill] sm:$0xff] }
 0x299   :  { %v3118_v30 = vpack.c.bf16 %v2594_v2, %v2593_v4  ;;  %v2536_v54 = vmax.f32 %v4874_v3, %v2510_v51  ;;  %v2511_v22 = vmax.f32 %v4875_v14, %v2439_v15  ;;  %v4890_v4 = vmax.f32 %v4888_v45, %v4889_v25  ;;  %v4892_v15 = vld [vmem:[#allocation12_spill] sm:$0xff]  ;;  %v4893_v27 = vld [vmem:[#allocation25_spill] sm:$0xff] }
 0x29a   :  { %v4894_v46 = vmax.f32 %v4892_v15, %v4893_v27 }
 0x29b   :  { %3147 = vst [vmem:[%s4776_s3 + $0x40] sm:$0xff] %v3118_v30   ;;  %v2569_v26 = vadd.f32 %v4603_v38, %v2536_v54  ;;  %v2537_v63 = vmax.f32 %v4878_v62, %v2511_v22  ;;  %v4895_v62 = vld [vmem:[#allocation13_spill] sm:$0xff] }
 0x29c   :  { %v1994_v12 = vpop.f32.mrb[196].mxu1 }
 0x29d   :  { %v2570_v59 = vadd.f32 %v4603_v38, %v2537_v63  ;;  %v2444_v49 = vadd.f32 %v2443_v9, %v1994_v12  ;;  %v1996_v55 = vpop.f32.mrb[197].mxu1  ;;  %v2595_v11 = vmax.f32 %v2569_v26, 0.0  ;;  %v4896_v63 = vld [vmem:[#allocation26_spill] sm:$0xff] }
 0x29e   :  { %v1997_v48 = vpop.f32.mrb[198].mxu1  ;;  %v4897_v12 = vmax.f32 %v4895_v62, %v4896_v63  ;;  %v4898_v55 = vld [vmem:[#allocation14_spill] sm:$0xff] }
 0x29f   :  { %v2596_v1 = vmax.f32 %v2570_v59, 0.0  ;;  %v2512_v24 = vmax.f32 %v4879_v13, %v2444_v49  ;;  %v2447_v21 = vadd.f32 %v2446_v43, %v1997_v48  ;;  %v1999_v50 = vpop.f32.mrb[199].mxu1  ;;  %v4899_v48 = vld [vmem:[#allocation27_spill] sm:$0xff] }
 0x2a1   :  { %v3123_v39 = vpack.c.bf16 %v2596_v1, %v2595_v11  ;;  %v2538_v37 = vmax.f32 %v4882_v18, %v2512_v24  ;;  %v2513_v52 = vmax.f32 %v4883_v35, %v2447_v21  ;;  %v4900_v11 = vmax.f32 %v4898_v55, %v4899_v48 }
 0x2a3   :  { %3148 = vst [vmem:[%s4776_s3 + $0x48] sm:$0xff] %v3123_v39   ;;  %v2571_v9 = vadd.f32 %v4603_v38, %v2538_v37  ;;  %v2539_v57 = vmax.f32 %v4886_v41, %v2513_v52 }
 0x2a4   :  { %v2002_v34 = vpop.f32.mrb[200].mxu1 }
 0x2a5   :  { %v2572_v43 = vadd.f32 %v4603_v38, %v2539_v57  ;;  %v2452_v16 = vadd.f32 %v2451_v60, %v2002_v34  ;;  %v2004_v53 = vpop.f32.mrb[201].mxu1  ;;  %v2597_v40 = vmax.f32 %v2571_v9, 0.0 }
 0x2a6   :  { %v2005_v32 = vpop.f32.mrb[202].mxu1 }
 0x2a7   :  { %v2598_v20 = vmax.f32 %v2572_v43, 0.0  ;;  %v2514_v17 = vmax.f32 %v4887_v23, %v2452_v16  ;;  %v2455_v31 = vadd.f32 %v2454_v7, %v2005_v32  ;;  %v2007_v47 = vpop.f32.mrb[203].mxu1 }
 0x2a9   :  { %v3128_v8 = vpack.c.bf16 %v2598_v20, %v2597_v40  ;;  %v2540_v2 = vmax.f32 %v4890_v4, %v2514_v17  ;;  %v2515_v51 = vmax.f32 %v4891_v44, %v2455_v31 }
 0x2ab   :  { %3149 = vst [vmem:[%s4776_s3 + $0x50] sm:$0xff] %v3128_v8   ;;  %v2573_v60 = vadd.f32 %v4603_v38, %v2540_v2  ;;  %v2541_v30 = vmax.f32 %v4894_v46, %v2515_v51 }
 0x2ac   :  { %v2010_v10 = vpop.f32.mrb[204].mxu1 }
 0x2ad   :  { %v2574_v7 = vadd.f32 %v4603_v38, %v2541_v30  ;;  %v2460_v36 = vadd.f32 %v2459_v58, %v2010_v10  ;;  %v2012_v3 = vpop.f32.mrb[205].mxu1  ;;  %v2599_v14 = vmax.f32 %v2573_v60, 0.0 }
 0x2ae   :  { %v2013_v54 = vpop.f32.mrb[206].mxu1 }
 0x2af   :  { %v2600_v22 = vmax.f32 %v2574_v7, 0.0  ;;  %v2516_v28 = vmax.f32 %v4595_v29, %v2460_v36  ;;  %v2463_v26 = vadd.f32 %v2462_v33, %v2013_v54  ;;  %v2015_v19 = vpop.f32.mrb[207].mxu1 }
 0x2b1   :  { %v3133_v5 = vpack.c.bf16 %v2600_v22, %v2599_v14  ;;  %v2542_v59 = vmax.f32 %v4897_v12, %v2516_v28  ;;  %v2517_v49 = vmax.f32 %v4597_v6, %v2463_v26 }
 0x2b3   :  { %3150 = vst [vmem:[%s4776_s3 + $0x58] sm:$0xff] %v3133_v5   ;;  %v2575_v58 = vadd.f32 %v4603_v38, %v2542_v59  ;;  %v2543_v1 = vmax.f32 %v4900_v11, %v2517_v49 }
 0x2b5   :  { %v2576_v29 = vadd.f32 %v4603_v38, %v2543_v1  ;;  %v2601_v33 = vmax.f32 %v2575_v58, 0.0 }
 0x2b7   :  { %v2602_v13 = vmax.f32 %v2576_v29, 0.0 }
 0x2b9   :  { %v3138_v24 = vpack.c.bf16 %v2602_v13, %v2601_v33 }
 0x2bb   :  { %3151 = vst [vmem:[%s4776_s3 + $0x60] sm:$0xff] %v3138_v24  }

// kernel: convolutional_net_forward.5
= control target key start
LH: loop header
LB: loop body
LE: loop exit
PB: predicated region body
PF: predicated region fallthrough
CT: control target
= control target key end

     0   :  { %vm1558_vm0 = vmmov 0   ;;  %vm885_vm1 = vcmask 261120   ;;  %s1921_s1 = inlined_call_operand.vmem [shape: bf16[1568,128], index: 1, kind: input, shape index: {}]   ;;  %s1922_s0 = inlined_call_operand.vmem [shape: bf16[16,1568], index: 0, kind: input, shape index: {}]   ;;  %s1923_s2 = inlined_call_operand.vmem [shape: f32[1,128], index: 2, kind: input, shape index: {}]   ;;  %s1924_s3 = inlined_call_operand.vmem [shape: f32[16,128], index: 3, kind: output, shape index: {}]  }
   0x1   :  { %v1440_v0 = vld [vmem:[%s1921_s1 + $0x40] sm:$0xff]   ;;  %v1444_v4 = vld [vmem:[%s1921_s1 + $0x48] sm:$0xff]   ;;  %v1448_v8 = vld [vmem:[%s1921_s1 + $0x50] sm:$0xff]  }
   0x2   :  { %v1441_v1 = vld [vmem:[%s1921_s1] sm:$0xff]   ;;  %1295 = vmatprep.subr.bf16.mxu0 %v1440_v0  ;;  %v1445_v5 = vld [vmem:[%s1921_s1 + $0x8] sm:$0xff]   ;;  %v1449_v9 = vld [vmem:[%s1921_s1 + $0x10] sm:$0xff]  }
   0x3   :  { %v1442_v2 = vld [vmem:[%s1921_s1 + $0xc0] sm:$0xff]   ;;  %1296 = vmatpush3.bf16.msra.mxu0 %v1441_v1  ;;  %v1446_v6 = vld [vmem:[%s1921_s1 + $0xc8] sm:$0xff]   ;;  %v1450_v10 = vld [vmem:[%s1921_s1 + $0xd0] sm:$0xff]  }
   0x4   :  { %v1443_v3 = vld [vmem:[%s1921_s1 + $0x80] sm:$0xff]   ;;  %1317 = vmatprep.subr.bf16.mxu1 %v1442_v2  ;;  %1297 = vmatprep.subr.bf16.mxu0 %v1444_v4  ;;  %v1447_v7 = vld [vmem:[%s1921_s1 + $0x88] sm:$0xff]   ;;  %v1451_v11 = vld [vmem:[%s1921_s1 + $0x90] sm:$0xff]  }
   0x5   :  { %1318 = vmatpush3.bf16.msra.mxu1 %v1443_v3  ;;  %v1452_v12 = vld [vmem:[%s1921_s1 + $0x58] sm:$0xff]   ;;  %v1456_v16 = vld [vmem:[%s1921_s1 + $0x60] sm:$0xff]   ;;  %v1460_v20 = vld [vmem:[%s1921_s1 + $0x68] sm:$0xff]  }
   0x6   :  { %1319 = vmatprep.subr.bf16.mxu1 %v1446_v6  ;;  %v1453_v13 = vld [vmem:[%s1921_s1 + $0x18] sm:$0xff]   ;;  %v1457_v17 = vld [vmem:[%s1921_s1 + $0x20] sm:$0xff]   ;;  %v1461_v21 = vld [vmem:[%s1921_s1 + $0x28] sm:$0xff]  }
   0x7   :  { %1298 = vmatpush3.bf16.msra.mxu0 %v1445_v5  ;;  %v1454_v14 = vld [vmem:[%s1921_s1 + $0xd8] sm:$0xff]   ;;  %v1458_v18 = vld [vmem:[%s1921_s1 + $0xe0] sm:$0xff]   ;;  %v1462_v22 = vld [vmem:[%s1921_s1 + $0xe8] sm:$0xff]  }
   0x8   :  { %1299 = vmatprep.subr.bf16.mxu0 %v1448_v8  ;;  %v1455_v15 = vld [vmem:[%s1921_s1 + $0x98] sm:$0xff]   ;;  %v1459_v19 = vld [vmem:[%s1921_s1 + $0xa0] sm:$0xff]   ;;  %v1463_v23 = vld [vmem:[%s1921_s1 + $0xa8] sm:$0xff]  }
   0x9   :  { %1320 = vmatpush3.bf16.msra.mxu1 %v1447_v7  ;;  %v1464_v24 = vld [vmem:[%s1921_s1 + $0x70] sm:$0xff]   ;;  %v1468_v28 = vld [vmem:[%s1921_s1 + $0x78] sm:$0xff]   ;;  %v1475_v34 = vld [vmem:[%s1921_s1 + $0x140] sm:$0xff]  }
   0xa   :  { %1321 = vmatprep.subr.bf16.mxu1 %v1450_v10  ;;  %v1465_v25 = vld [vmem:[%s1921_s1 + $0x30] sm:$0xff]   ;;  %v1469_v29 = vld [vmem:[%s1921_s1 + $0x38] sm:$0xff]   ;;  %v1478_v36 = vld [vmem:[%s1922_s0 + $0xc] ss:$52 sps:$4 sm:$0xff]  }
   0xb   :  { %1300 = vmatpush3.bf16.msra.mxu0 %v1449_v9  ;;  %v1466_v26 = vld [vmem:[%s1921_s1 + $0xf0] sm:$0xff]   ;;  %v1470_v30 = vld [vmem:[%s1921_s1 + $0xf8] sm:$0xff]   ;;  %v1479_v37 = vld [vmem:[%s1921_s1 + $0x100] sm:$0xff]   ;;  %962 = vmatprep.mubr.bf16.mxu1 %v1478_v36 }
   0xc   :  { %1301 = vmatprep.subr.bf16.mxu0 %v1452_v12  ;;  %v1467_v27 = vld [vmem:[%s1921_s1 + $0xb0] sm:$0xff]   ;;  %v1471_v31 = vld [vmem:[%s1921_s1 + $0xb8] sm:$0xff]   ;;  %v1480_v38 = vld [vmem:[%s1921_s1 + $0x1c0] sm:$0xff]  }
   0xd   :  { %1322 = vmatpush3.bf16.msra.mxu1 %v1451_v11  ;;  %v1472_v32 = vld [vmem:[%s1922_s0] ss:$52 sps:$4 sm:$0xff]   ;;  %v1474_v33 = vld [vmem:[%s1922_s0 + $0x4] ss:$52 sps:$4 sm:$0xff]   ;;  %v1476_v35 = vld [vmem:[%s1922_s0 + $0x8] ss:$52 sps:$4 sm:$0xff]  }
   0xe   :  { %1323 = vmatprep.subr.bf16.mxu1 %v1454_v14  ;;  %921 = vmatprep.mubr.bf16.mxu0 %v1474_v33  ;;  %v1481_v39 = vld [vmem:[%s1921_s1 + $0x180] sm:$0xff]   ;;  %v1482_v40 = vld [vmem:[%s1921_s1 + $0x148] sm:$0xff]   ;;  %v1486_v44 = vld [vmem:[%s1921_s1 + $0x150] sm:$0xff]  }
   0xf   :  { %1302 = vmatpush3.bf16.msra.mxu0 %v1453_v13  ;;  %v1483_v41 = vld [vmem:[%s1921_s1 + $0x108] sm:$0xff]   ;;  %v1487_v45 = vld [vmem:[%s1921_s1 + $0x110] sm:$0xff]   ;;  %v1490_v48 = vld [vmem:[%s1921_s1 + $0x158] sm:$0xff]  }
  0x10   :  { %1303 = vmatprep.subr.bf16.mxu0 %v1456_v16  ;;  %v1484_v42 = vld [vmem:[%s1921_s1 + $0x1c8] sm:$0xff]   ;;  %v1488_v46 = vld [vmem:[%s1921_s1 + $0x1d0] sm:$0xff]   ;;  %v1491_v49 = vld [vmem:[%s1921_s1 + $0x118] sm:$0xff]  }
  0x11   :  { %1324 = vmatpush3.bf16.msra.mxu1 %v1455_v15  ;;  %v1485_v43 = vld [vmem:[%s1921_s1 + $0x188] sm:$0xff]   ;;  %v1489_v47 = vld [vmem:[%s1921_s1 + $0x190] sm:$0xff]   ;;  %v1492_v50 = vld [vmem:[%s1921_s1 + $0x1d8] sm:$0xff]  }
  0x12   :  { %1325 = vmatprep.subr.bf16.mxu1 %v1458_v18  ;;  %v1493_v51 = vld [vmem:[%s1921_s1 + $0x198] sm:$0xff]   ;;  %v1494_v52 = vld [vmem:[%s1921_s1 + $0x160] sm:$0xff]   ;;  %v1498_v56 = vld [vmem:[%s1921_s1 + $0x168] sm:$0xff]  }
  0x13   :  { %1304 = vmatpush3.bf16.msra.mxu0 %v1457_v17  ;;  %v1495_v53 = vld [vmem:[%s1921_s1 + $0x120] sm:$0xff]   ;;  %v1499_v57 = vld [vmem:[%s1921_s1 + $0x128] sm:$0xff]   ;;  %v1502_v60 = vld [vmem:[%s1921_s1 + $0x170] sm:$0xff]  }
  0x14   :  { %1305 = vmatprep.subr.bf16.mxu0 %v1460_v20  ;;  %v1496_v54 = vld [vmem:[%s1921_s1 + $0x1e0] sm:$0xff]   ;;  %v1500_v58 = vld [vmem:[%s1921_s1 + $0x1e8] sm:$0xff]   ;;  %v1503_v61 = vld [vmem:[%s1921_s1 + $0x130] sm:$0xff]  }
  0x15   :  { %1326 = vmatpush3.bf16.msra.mxu1 %v1459_v19  ;;  %v1497_v55 = vld [vmem:[%s1921_s1 + $0x1a0] sm:$0xff]   ;;  %v1501_v59 = vld [vmem:[%s1921_s1 + $0x1a8] sm:$0xff]   ;;  %v1504_v62 = vld [vmem:[%s1921_s1 + $0x1f0] sm:$0xff]  }
  0x16   :  { %1327 = vmatprep.subr.bf16.mxu1 %v1462_v22  ;;  %v1505_v63 = vld [vmem:[%s1921_s1 + $0x1b0] sm:$0xff]   ;;  %v1506_v0 = vld [vmem:[%s1921_s1 + $0x178] sm:$0xff]   ;;  %v1513_v6 = vld [vmem:[%s1921_s1 + $0x240] sm:$0xff]  }
  0x17   :  { %1306 = vmatpush3.bf16.msra.mxu0 %v1461_v21  ;;  %v1507_v1 = vld [vmem:[%s1921_s1 + $0x138] sm:$0xff]   ;;  %v1510_v4 = vld [vmem:[%s1922_s0 + $0x10] ss:$52 sps:$4 sm:$0xff]   ;;  %v1512_v5 = vld [vmem:[%s1922_s0 + $0x14] ss:$52 sps:$4 sm:$0xff]  }
  0x18   :  { %1307 = vmatprep.subr.bf16.mxu0 %v1464_v24  ;;  %v1508_v2 = vld [vmem:[%s1921_s1 + $0x1f8] sm:$0xff]   ;;  %v1517_v9 = vld [vmem:[%s1921_s1 + $0x200] sm:$0xff]   ;;  %v1520_v12 = vld [vmem:[%s1921_s1 + $0x248] sm:$0xff]  }
  0x19   :  { %1328 = vmatpush3.bf16.msra.mxu1 %v1463_v23  ;;  %v1509_v3 = vld [vmem:[%s1921_s1 + $0x1b8] sm:$0xff]   ;;  %v1518_v10 = vld [vmem:[%s1921_s1 + $0x2c0] sm:$0xff]   ;;  %v1521_v13 = vld [vmem:[%s1921_s1 + $0x208] sm:$0xff]  }
  0x1a   :  { %1329 = vmatprep.subr.bf16.mxu1 %v1466_v26  ;;  %v1514_v7 = vld [vmem:[%s1922_s0 + $0x18] ss:$52 sps:$4 sm:$0xff]   ;;  %v1516_v8 = vld [vmem:[%s1922_s0 + $0x1c] ss:$52 sps:$4 sm:$0xff]   ;;  %v1519_v11 = vld [vmem:[%s1921_s1 + $0x280] sm:$0xff]  }
  0x1b   :  { %1308 = vmatpush3.bf16.msra.mxu0 %v1465_v25  ;;  %v1522_v14 = vld [vmem:[%s1921_s1 + $0x2c8] sm:$0xff]   ;;  %v1524_v16 = vld [vmem:[%s1921_s1 + $0x250] sm:$0xff]   ;;  %v1528_v20 = vld [vmem:[%s1921_s1 + $0x258] sm:$0xff]  }
  0x1c   :  { %1309 = vmatprep.subr.bf16.mxu0 %v1468_v28  ;;  %v1523_v15 = vld [vmem:[%s1921_s1 + $0x288] sm:$0xff]   ;;  %v1525_v17 = vld [vmem:[%s1921_s1 + $0x210] sm:$0xff]   ;;  %v1529_v21 = vld [vmem:[%s1921_s1 + $0x218] sm:$0xff]  }
  0x1d   :  { %1330 = vmatpush3.bf16.msra.mxu1 %v1467_v27  ;;  %v1526_v18 = vld [vmem:[%s1921_s1 + $0x2d0] sm:$0xff]   ;;  %v1530_v22 = vld [vmem:[%s1921_s1 + $0x2d8] sm:$0xff]   ;;  %v1532_v24 = vld [vmem:[%s1921_s1 + $0x260] sm:$0xff]  }
  0x1e   :  { %1331 = vmatprep.subr.bf16.mxu1 %v1470_v30  ;;  %v1527_v19 = vld [vmem:[%s1921_s1 + $0x290] sm:$0xff]   ;;  %v1531_v23 = vld [vmem:[%s1921_s1 + $0x298] sm:$0xff]   ;;  %v1533_v25 = vld [vmem:[%s1921_s1 + $0x220] sm:$0xff]  }
  0x1f   :  { %1310 = vmatpush3.bf16.msra.mxu0 %v1469_v29  ;;  %v1534_v26 = vld [vmem:[%s1921_s1 + $0x2e0] sm:$0xff]   ;;  %v1536_v28 = vld [vmem:[%s1921_s1 + $0x268] sm:$0xff]   ;;  %v1541_v33 = vld [vmem:[%s1921_s1 + $0x230] sm:$0xff]  }
  0x20   :  { %1339 = vmatprep.subr.bf16.mxu0 %v1475_v34  ;;  %v1535_v27 = vld [vmem:[%s1921_s1 + $0x2a0] sm:$0xff]   ;;  %v1537_v29 = vld [vmem:[%s1921_s1 + $0x228] sm:$0xff]   ;;  %v1542_v34 = vld [vmem:[%s1921_s1 + $0x2f0] sm:$0xff]  }
  0x21   :  { %1332 = vmatpush3.bf16.msra.mxu1 %v1471_v31  ;;  %v1538_v30 = vld [vmem:[%s1921_s1 + $0x2e8] sm:$0xff]   ;;  %v1544_v36 = vld [vmem:[%s1921_s1 + $0x278] sm:$0xff]  }
  0x22   :  { %922 = vmatmul.mubr.bf16.vlgmr.msra.gmra.mrb[0].mxu0 %v1472_v32  ;;  %1361 = vmatprep.subr.bf16.mxu1 %v1480_v38  ;;  %v1539_v31 = vld [vmem:[%s1921_s1 + $0x2a8] sm:$0xff]   ;;  %v1540_v32 = vld [vmem:[%s1921_s1 + $0x270] sm:$0xff]   ;;  %v1546_v38 = vld [vmem:[%s1921_s1 + $0x2f8] sm:$0xff]  }
  0x23   :  { %1340 = vmatpush3.bf16.msra.mxu0 %v1479_v37  ;;  %1003 = vmatprep.mubr.bf16.mxu0 %v1512_v5  ;;  %v1545_v37 = vld [vmem:[%s1921_s1 + $0x238] sm:$0xff]  }
  0x24   :  { %963 = vmatmul.mubr.bf16.vlgmr.msra.gmra.mrb[0].mxu1 %v1476_v35  ;;  %1341 = vmatprep.subr.bf16.mxu0 %v1482_v40  ;;  %v1543_v35 = vld [vmem:[%s1921_s1 + $0x2b0] sm:$0xff]  }
  0x25   :  { %1362 = vmatpush3.bf16.msra.mxu1 %v1481_v39  ;;  %1044 = vmatprep.mubr.bf16.mxu1 %v1516_v8  ;;  %v1547_v39 = vld [vmem:[%s1921_s1 + $0x2b8] sm:$0xff]   ;;  %v1548_v40 = vld [vmem:[%s1922_s0 + $0x20] ss:$52 sps:$4 sm:$0xff]  }
  0x26   :  { %1363 = vmatprep.subr.bf16.mxu1 %v1484_v42  ;;  %v1557_v42 = vmov 0.0  }
  0x27   :  { %1342 = vmatpush3.bf16.msra.mxu0 %v1483_v41  ;;  %v1550_v41 = vld [vmem:[%s1922_s0 + $0x24] ss:$52 sps:$4 sm:$0xff]  }
  0x28   :  { %1343 = vmatprep.subr.bf16.mxu0 %v1486_v44  ;;  %v1553_v44 = vld [vmem:[%s1922_s0 + $0x2c] ss:$52 sps:$4 sm:$0xff]  }
  0x29   :  { %1364 = vmatpush3.bf16.msra.mxu1 %v1485_v43  ;;  %v1551_v43 = vld [vmem:[%s1922_s0 + $0x28] ss:$52 sps:$4 sm:$0xff]  }
  0x2a   :  { %1365 = vmatprep.subr.bf16.mxu1 %v1488_v46  ;;  %v1555_v46 = vld [vmem:[%s1921_s1 + $0x308] sm:$0xff]  }
  0x2b   :  { %1344 = vmatpush3.bf16.msra.mxu0 %v1487_v45  ;;  %v1554_v45 = vld [vmem:[%s1921_s1 + $0x300] sm:$0xff]  }
  0x2c   :  { %1345 = vmatprep.subr.bf16.mxu0 %v1490_v48 }
  0x2d   :  { %1366 = vmatpush3.bf16.msra.mxu1 %v1489_v47  ;;  %v1556_v47 = vld [vmem:[%s1922_s0 + $0x30] ss:$52 sps:$4 sm:$0xff]  }
  0x2e   :  { %1367 = vmatprep.subr.bf16.mxu1 %v1492_v50 }
  0x2f   :  { %1346 = vmatpush3.bf16.msra.mxu0 %v1491_v49  ;;  %v1182_v49 = vld [vmem:[%s1923_s2] ss:$0 sm:$0xff] }
  0x30   :  { %1347 = vmatprep.subr.bf16.mxu0 %v1494_v52 }
  0x31   :  { %1368 = vmatpush3.bf16.msra.mxu1 %v1493_v51 }
  0x32   :  { %1369 = vmatprep.subr.bf16.mxu1 %v1496_v54 }
  0x33   :  { %1348 = vmatpush3.bf16.msra.mxu0 %v1495_v53 }
  0x34   :  { %1349 = vmatprep.subr.bf16.mxu0 %v1498_v56 }
  0x35   :  { %1370 = vmatpush3.bf16.msra.mxu1 %v1497_v55 }
  0x36   :  { %1371 = vmatprep.subr.bf16.mxu1 %v1500_v58 }
  0x37   :  { %1350 = vmatpush3.bf16.msra.mxu0 %v1499_v57 }
  0x38   :  { %1351 = vmatprep.subr.bf16.mxu0 %v1502_v60 }
  0x39   :  { %1372 = vmatpush3.bf16.msra.mxu1 %v1501_v59 }
  0x3a   :  { %1373 = vmatprep.subr.bf16.mxu1 %v1504_v62 }
  0x3b   :  { %1352 = vmatpush3.bf16.msra.mxu0 %v1503_v61 }
  0x3c   :  { %1353 = vmatprep.subr.bf16.mxu0 %v1506_v0 }
  0x3d   :  { %1374 = vmatpush3.bf16.msra.mxu1 %v1505_v63 }
  0x3e   :  { %1375 = vmatprep.subr.bf16.mxu1 %v1508_v2 }
  0x3f   :  { %1354 = vmatpush3.bf16.msra.mxu0 %v1507_v1 }
  0x40   :  { %1383 = vmatprep.subr.bf16.mxu0 %v1513_v6 }
  0x41   :  { %1376 = vmatpush3.bf16.msra.mxu1 %v1509_v3 }
  0x42   :  { %1004 = vmatmul.mubr.bf16.vlgmr.msra.gmra.mrb[4].mxu0 %v1510_v4  ;;  %1405 = vmatprep.subr.bf16.mxu1 %v1518_v10 }
  0x43   :  { %1384 = vmatpush3.bf16.msra.mxu0 %v1517_v9  ;;  %1085 = vmatprep.mubr.bf16.mxu0 %v1550_v41 }
  0x44   :  { %1045 = vmatmul.mubr.bf16.vlgmr.msra.gmra.mrb[4].mxu1 %v1514_v7  ;;  %1385 = vmatprep.subr.bf16.mxu0 %v1520_v12 }
  0x45   :  { %1406 = vmatpush3.bf16.msra.mxu1 %v1519_v11  ;;  %1126 = vmatprep.mubr.bf16.mxu1 %v1553_v44 }
  0x46   :  { %1407 = vmatprep.subr.bf16.mxu1 %v1522_v14 }
  0x47   :  { %1386 = vmatpush3.bf16.msra.mxu0 %v1521_v13 }
  0x48   :  { %1387 = vmatprep.subr.bf16.mxu0 %v1524_v16 }
  0x49   :  { %1408 = vmatpush3.bf16.msra.mxu1 %v1523_v15 }
  0x4a   :  { %1409 = vmatprep.subr.bf16.mxu1 %v1526_v18 }
  0x4b   :  { %1388 = vmatpush3.bf16.msra.mxu0 %v1525_v17 }
  0x4c   :  { %1389 = vmatprep.subr.bf16.mxu0 %v1528_v20 }
  0x4d   :  { %1410 = vmatpush3.bf16.msra.mxu1 %v1527_v19 }
  0x4e   :  { %1411 = vmatprep.subr.bf16.mxu1 %v1530_v22 }
  0x4f   :  { %1390 = vmatpush3.bf16.msra.mxu0 %v1529_v21 }
  0x50   :  { %1391 = vmatprep.subr.bf16.mxu0 %v1532_v24 }
  0x51   :  { %1412 = vmatpush3.bf16.msra.mxu1 %v1531_v23 }
  0x52   :  { %1413 = vmatprep.subr.bf16.mxu1 %v1534_v26 }
  0x53   :  { %1392 = vmatpush3.bf16.msra.mxu0 %v1533_v25 }
  0x54   :  { %1393 = vmatprep.subr.bf16.mxu0 %v1536_v28 }
  0x55   :  { %1414 = vmatpush3.bf16.msra.mxu1 %v1535_v27 }
  0x56   :  { %1415 = vmatprep.subr.bf16.mxu1 %v1538_v30 }
  0x57   :  { %1394 = vmatpush3.bf16.msra.mxu0 %v1537_v29 }
  0x58   :  { %1395 = vmatprep.subr.bf16.mxu0 %v1540_v32 }
  0x59   :  { %1416 = vmatpush3.bf16.msra.mxu1 %v1539_v31 }
  0x5a   :  { %1417 = vmatprep.subr.bf16.mxu1 %v1542_v34 }
  0x5b   :  { %1396 = vmatpush3.bf16.msra.mxu0 %v1541_v33 }
  0x5c   :  { %1397 = vmatprep.subr.bf16.mxu0 %v1544_v36 }
  0x5d   :  { %1418 = vmatpush3.bf16.msra.mxu1 %v1543_v35 }
  0x5e   :  { %1419 = vmatprep.subr.bf16.mxu1 %v1546_v38 }
  0x5f   :  { %1398 = vmatpush3.bf16.msra.mxu0 %v1545_v37 }
  0x60   :  { %1430 = vmatprep.subr.bf16.mxu0 %v1557_v42 }
  0x61   :  { %1420 = vmatpush3.bf16.msra.mxu1 %v1547_v39 }
  0x62   :  { %1086 = vmatmul.mubr.bf16.vlgmr.msra.gmra.mrb[8].mxu0 %v1548_v40 }
  0x63   :  { %1431 = vmatpush3.bf16.msra.mxu0 %v1554_v45  ;;  %1434 = vmatprep.mubr.msk.bf16.mxu0 %vm1558_vm0, %v1557_v42 }
  0x64   :  { %1127 = vmatmul.mubr.bf16.vlgmr.msra.gmra.mrb[8].mxu1 %v1551_v43  ;;  %1432 = vmatprep.subr.bf16.mxu0 %v1557_v42 }
  0x67   :  { %1433 = vmatpush3.bf16.msra.mxu0 %v1555_v46 }
  0x6a   :  { %1435 = vmatmul.mubr.msk.bf16.vlgmr.msra.gmra.mrb[12].mxu0 %vm885_vm1, %v1556_v47 }
  0xf5   :  { %v1311_v48 = vpop.f32.mrb[0].mxu0 }
  0xf6   :  { %v1312_v50 = vpop.f32.mrb[1].mxu0 }
  0xf7   :  { %v1313_v51 = vadd.f32 %v1312_v50, %v1311_v48  ;;  %v1314_v52 = vpop.f32.mrb[2].mxu0  ;;  %v1333_v53 = vpop.f32.mrb[0].mxu1 }
  0xf8   :  { %v1315_v54 = vpop.f32.mrb[3].mxu0  ;;  %v1334_v55 = vpop.f32.mrb[1].mxu1 }
  0xf9   :  { %v924_v56 = vadd.f32 %v1313_v51, %v1182_v49  ;;  %v1316_v57 = vadd.f32 %v1315_v54, %v1314_v52  ;;  %v1335_v58 = vadd.f32 %v1334_v55, %v1333_v53  ;;  %v1336_v59 = vpop.f32.mrb[2].mxu1 }
  0xfa   :  { %v1337_v60 = vpop.f32.mrb[3].mxu1 }
  0xfb   :  { %v927_v61 = vadd.f32 %v1316_v57, %v1182_v49  ;;  %v965_v62 = vadd.f32 %v1335_v58, %v924_v56  ;;  %v1338_v63 = vadd.f32 %v1337_v60, %v1336_v59 }
  0xfd   :  { %v968_v0 = vadd.f32 %v1338_v63, %v927_v61 }
 0x115   :  { %v1355_v1 = vpop.f32.mrb[4].mxu0 }
 0x116   :  { %v1356_v2 = vpop.f32.mrb[5].mxu0 }
 0x117   :  { %v1357_v3 = vadd.f32 %v1356_v2, %v1355_v1  ;;  %v1358_v4 = vpop.f32.mrb[6].mxu0  ;;  %v1377_v5 = vpop.f32.mrb[4].mxu1 }
 0x118   :  { %v1359_v6 = vpop.f32.mrb[7].mxu0  ;;  %v1378_v9 = vpop.f32.mrb[5].mxu1 }
 0x119   :  { %v1006_v7 = vadd.f32 %v1357_v3, %v965_v62  ;;  %v1360_v8 = vadd.f32 %v1359_v6, %v1358_v4  ;;  %v1379_v10 = vadd.f32 %v1378_v9, %v1377_v5  ;;  %v1380_v11 = vpop.f32.mrb[6].mxu1 }
 0x11a   :  { %v1381_v13 = vpop.f32.mrb[7].mxu1 }
 0x11b   :  { %v1009_v12 = vadd.f32 %v1360_v8, %v968_v0  ;;  %v1047_v14 = vadd.f32 %v1379_v10, %v1006_v7  ;;  %v1382_v15 = vadd.f32 %v1381_v13, %v1380_v11 }
 0x11d   :  { %v1050_v16 = vadd.f32 %v1382_v15, %v1009_v12 }
 0x135   :  { %v1399_v17 = vpop.f32.mrb[8].mxu0 }
 0x136   :  { %v1400_v18 = vpop.f32.mrb[9].mxu0 }
 0x137   :  { %v1421_v19 = vpop.f32.mrb[8].mxu1  ;;  %v1401_v20 = vadd.f32 %v1400_v18, %v1399_v17  ;;  %v1402_v21 = vpop.f32.mrb[10].mxu0 }
 0x138   :  { %v1422_v22 = vpop.f32.mrb[9].mxu1  ;;  %v1403_v24 = vpop.f32.mrb[11].mxu0 }
 0x139   :  { %v1423_v23 = vadd.f32 %v1422_v22, %v1421_v19  ;;  %v1424_v25 = vpop.f32.mrb[10].mxu1  ;;  %v1088_v26 = vadd.f32 %v1401_v20, %v1047_v14  ;;  %v1404_v27 = vadd.f32 %v1403_v24, %v1402_v21 }
 0x13a   :  { %v1425_v28 = vpop.f32.mrb[11].mxu1 }
 0x13b   :  { %v1426_v29 = vadd.f32 %v1425_v28, %v1424_v25  ;;  %v1091_v30 = vadd.f32 %v1404_v27, %v1050_v16  ;;  %v1129_v31 = vadd.f32 %v1423_v23, %v1088_v26 }
 0x13d   :  { %v1169_v32 = vpop.f32.mrb[12].mxu0  ;;  %v1132_v33 = vadd.f32 %v1426_v29, %v1091_v30 }
 0x13e   :  { %v1170_v34 = vadd.f32 %v1169_v32, %v1129_v31  ;;  %v1436_v35 = vpop.f32.mrb[13].mxu0 }
 0x13f   :  { %v1172_v36 = vpop.f32.mrb[14].mxu0 }
 0x140   :  { %1176 = vst [vmem:[%s1924_s3] sm:$0xff] %v1170_v34  ;;  %v1173_v37 = vadd.f32 %v1172_v36, %v1132_v33  ;;  %v1437_v38 = vpop.f32.mrb[15].mxu0 }
 0x142   :  { %1177 = vst [vmem:[%s1924_s3 + $0x8] sm:$0xff] %v1173_v37 }

</bundles_post_ra>
